<compile_context>
chip_gen: v5e
topology: v5e:2x2
jax: 0.10.0
libtpu: 0.0.40
codegen_flags: <defaults>
</compile_context>

<pallas_src>
import math
from functools import partial

import jax
import jax.numpy as jnp
from jax.experimental import pallas as pl
from jax.experimental.pallas import tpu as pltpu

LANE = 128
_NEG = float(jnp.finfo(jnp.float32).min)   # max-pool "padding" value


# ----------------------------------------------------------------------------
# Pallas kernels
# ----------------------------------------------------------------------------

def _first_conv_kernel(x_ref, w_ref, b_ref, o_ref, pool_sc, *, th, W, cp_in,
                       cp_out, pool):
    """firstconv (3x3, pad 1) fused with the 3x3/stride-2 max-pool.

    x_ref:   (th+4, W+4, cp_in) bf16   row tile of the 2-zero-padded input
    w_ref:   (9*cp_in, cp_out)  bf16
    b_ref:   (1, cp_out)        f32
    o_ref:   (tp or th, W, cp_out) bf16
    pool_sc: (tp, W+2, cp_out)  f32 scratch (pool path only)
    """
    xf = x_ref[...].astype(jnp.float32)                      # (th+4, W+4, cp_in)
    A = th + 2 if pool else th      # pool path also needs conv rows r0-1 / r0+th
    dy0 = 0 if pool else 1

    # in-kernel im2col -> single big-K matmul (K = 9*cp_in), bf16 MXU, f32 acc
    taps = jnp.concatenate(
        [xf[dy0 + dy: dy0 + dy + A, 1 + dx: 1 + dx + W, :]
         for dy in range(3) for dx in range(3)], axis=-1)    # (A, W, 9*cp_in)
    taps = taps.reshape(A * W, 9 * cp_in).astype(jnp.bfloat16)
    y = jnp.dot(taps, w_ref[...], preferred_element_type=jnp.float32)
    y = y + b_ref[...]                                       # (A*W, cp_out) f32
    y = y.reshape(A, W, cp_out)

    if not pool:
        o_ref[...] = y.astype(o_ref.dtype)
        return

    # Fused max_pool2d(kernel=3, stride=2, padding=1).
    # Conv values were computed for image rows [r*th-1, r*th+th+1); the value
    # at image row -1 (top tile only) is pool padding -> exclude via -inf.
    r = pl.program_id(1)
    row_idx = jax.lax.broadcasted_iota(jnp.int32, (A, W, cp_out), 0)
    y = jnp.where((row_idx == 0) & (r == 0), _NEG, y)

    tp = th // 2
    # row window-max (window 3) then keep even rows (stride 2)
    wm = jnp.maximum(jnp.maximum(y[0:th], y[1:th + 1]), y[2:th + 2])  # (th, W, C)
    rp = wm.reshape(tp, 2, W, cp_out)[:, 0]                           # (tp, W, C)
    # column window-max via a -inf padded scratch; the stride-2 column
    # subsample is done by the wrapper as a lane-dense slice.
    # TODO(synk): fold the column stride-2 into the kernel once the
    # sublane-split reshape path is validated on all TPU generations.
    pool_sc[:, 0:1, :] = jnp.full((tp, 1, cp_out), _NEG, jnp.float32)
    pool_sc[:, W + 1:W + 2, :] = jnp.full((tp, 1, cp_out), _NEG, jnp.float32)
    pool_sc[:, 1:W + 1, :] = rp
    rpw = pool_sc[...]
    out = jnp.maximum(jnp.maximum(rpw[:, 0:W, :], rpw[:, 1:W + 1, :]),
                      rpw[:, 2:W + 2, :])                             # (tp, W, C)
    o_ref[...] = out.astype(o_ref.dtype)


def _res_block_kernel(x_ref, w0_ref, w1_ref, b0_ref, b1_ref, o_ref, hpad_sc, *,
                      th, W, cp):
    """One fused IMPALA residual block: x + conv1(relu(conv0(relu(x)))).

    x_ref:   (th+4, W+4, cp) bf16   row tile of the 2-zero-padded input
    w*_ref:  (9*cp, cp)      bf16
    b*_ref:  (1, cp)         f32
    o_ref:   (th, W, cp)     bf16
    hpad_sc: (th+2, W+2, cp) f32    column-zero-padded relu(h), stays in VMEM
    """
    r = pl.program_id(1)
    R = pl.num_programs(1)
    A = th + 2

    xf = x_ref[...].astype(jnp.float32)           # pre-relu x (skip path)
    xr = jnp.maximum(xf, 0.0)                     # relu applied once per element

    # conv0 on image rows [r*th-1, r*th+th+1), cols [0, W): one big-K matmul
    taps0 = jnp.concatenate(
        [xr[dy: dy + A, 1 + dx: 1 + dx + W, :]
         for dy in range(3) for dx in range(3)], axis=-1)    # (A, W, 9*cp)
    taps0 = taps0.reshape(A * W, 9 * cp).astype(jnp.bfloat16)
    h = jnp.dot(taps0, w0_ref[...], preferred_element_type=jnp.float32)
    h = jnp.maximum(h + b0_ref[...], 0.0)                    # relu(conv0(relu(x)))
    h = h.reshape(A, W, cp)
    # rows that fall outside the image act as conv1's zero padding
    row_idx = jax.lax.broadcasted_iota(jnp.int32, (A, W, cp), 0)
    h = jnp.where((row_idx == 0) & (r == 0), 0.0, h)
    h = jnp.where((row_idx == A - 1) & (r == R - 1), 0.0, h)
    # column-zero-pad h inside a VMEM scratch (h never round-trips HBM)
    hpad_sc[:, 0:1, :] = jnp.zeros((A, 1, cp), jnp.float32)
    hpad_sc[:, W + 1:W + 2, :] = jnp.zeros((A, 1, cp), jnp.float32)
    hpad_sc[:, 1:W + 1, :] = h
    hp = hpad_sc[...]                                        # (A, W+2, cp)

    # conv1 on image rows [r*th, (r+1)*th), cols [0, W), then add the skip
    taps1 = jnp.concatenate(
        [hp[dy: dy + th, dx: dx + W, :]
         for dy in range(3) for dx in range(3)], axis=-1)    # (th, W, 9*cp)
    taps1 = taps1.reshape(th * W, 9 * cp).astype(jnp.bfloat16)
    y = jnp.dot(taps1, w1_ref[...], preferred_element_type=jnp.float32)
    y = y + b1_ref[...]
    y = y + xf[2:2 + th, 2:2 + W, :].reshape(th * W, cp)     # residual skip (f32)
    o_ref[...] = y.reshape(th, W, cp).astype(o_ref.dtype)


# ----------------------------------------------------------------------------
# Wrappers: tiling / packing glue + pallas_call plumbing
# ----------------------------------------------------------------------------

def _round_up(x, m):
    return (x + m - 1) // m * m


def _pick_row_tile(H, need_even):
    # ~8-64 rows per tile keeps the per-step VMEM footprint well under the
    # v7x 64 MiB budget at realistic IMPALA widths while still amortizing the
    # ~0.35us per-step pipeline overhead.
    cap = max(8, H // 2)
    for th in (64, 32, 16, 8, 4, 2, 1):
        if th <= cap and H % th == 0 and (th % 2 == 0 or not need_even):
            return th
    return H


def _pad_channels(x, cp):
    c = x.shape[-1]
    if c == cp:
        return x
    return jnp.pad(x, [(0, 0)] * (x.ndim - 1) + [(0, cp - c)])


def _row_tiles(x_nhwc, th):
    """(N,H,W,C) -> (N, R, th+4, W+4, C): overlapping row tiles (2-row halo)
    cut from the 2-pixel zero-padded image.  Only the 4 halo rows per tile get
    duplicated in HBM (vs. 9x duplication of a full im2col stack)."""
    N, H, W, C = x_nhwc.shape
    R = H // th
    xp = jnp.pad(x_nhwc, ((0, 0), (2, 2), (2, 2), (0, 0)))
    return jnp.stack([xp[:, r * th: r * th + th + 4] for r in range(R)], axis=1)


def _pack_conv(w, b, cp_in, cp_out):
    """(3,3,Cin,Cout) f32 -> (9*cp_in, cp_out) bf16 (+ (1,cp_out) f32 bias),
    zero padded so K and N are multiples of 128 (lane-dense)."""
    kh, kw, cin, cout = w.shape
    w = jnp.pad(w, ((0, 0), (0, 0), (0, cp_in - cin), (0, cp_out - cout)))
    w = w.reshape(kh * kw * cp_in, cp_out).astype(jnp.bfloat16)
    b = jnp.pad(b, (0, cp_out - cout)).reshape(1, cp_out).astype(jnp.float32)
    return w, b


def _compiler_params():
    return pltpu.CompilerParams(
        dimension_semantics=("parallel", "parallel"),
        vmem_limit_bytes=64 * 1024 * 1024)


def _first_conv(x_bf16, w, b, pool):
    N, H, W, cp_in = x_bf16.shape
    cp_out = _round_up(max(w.shape[-1], 1), LANE)
    th = _pick_row_tile(H, need_even=pool)
    R = H // th
    tiles = _row_tiles(x_bf16, th)
    wp, bp = _pack_conv(w, b, cp_in, cp_out)
    tp = th // 2 if pool else th
    out_h = R * tp
    kern = partial(_first_conv_kernel, th=th, W=W, cp_in=cp_in, cp_out=cp_out,
                   pool=pool)
    y = pl.pallas_call(
        kern,
        out_shape=jax.ShapeDtypeStruct((N, out_h, W, cp_out), jnp.bfloat16),
        grid=(N, R),
        in_specs=[
            pl.BlockSpec((None, None, th + 4, W + 4, cp_in),
                         lambda n, r: (n, r, 0, 0, 0)),
            pl.BlockSpec((9 * cp_in, cp_out), lambda n, r: (0, 0)),
            pl.BlockSpec((1, cp_out), lambda n, r: (0, 0)),
        ],
        out_specs=pl.BlockSpec((None, tp, W, cp_out), lambda n, r: (n, r, 0, 0)),
        scratch_shapes=[pltpu.VMEM((tp if pool else 1, W + 2, cp_out),
                                   jnp.float32)],
        compiler_params=_compiler_params(),
    )(tiles, wp, bp)
    if pool:
        # stride-2 column subsample of the column-window-maxed map
        y = y[:, :, ::2, :]
    return y


def _residual_block(x_bf16, w0, b0, w1, b1):
    N, H, W, cp = x_bf16.shape
    th = _pick_row_tile(H, need_even=False)
    R = H // th
    tiles = _row_tiles(x_bf16, th)
    w0p, b0p = _pack_conv(w0, b0, cp, cp)
    w1p, b1p = _pack_conv(w1, b1, cp, cp)
    kern = partial(_res_block_kernel, th=th, W=W, cp=cp)
    return pl.pallas_call(
        kern,
        out_shape=jax.ShapeDtypeStruct((N, H, W, cp), jnp.bfloat16),
        grid=(N, R),
        in_specs=[
            pl.BlockSpec((None, None, th + 4, W + 4, cp),
                         lambda n, r: (n, r, 0, 0, 0)),
            pl.BlockSpec((9 * cp, cp), lambda n, r: (0, 0)),
            pl.BlockSpec((9 * cp, cp), lambda n, r: (0, 0)),
            pl.BlockSpec((1, cp), lambda n, r: (0, 0)),
            pl.BlockSpec((1, cp), lambda n, r: (0, 0)),
        ],
        out_specs=pl.BlockSpec((None, th, W, cp), lambda n, r: (n, r, 0, 0)),
        scratch_shapes=[pltpu.VMEM((th + 2, W + 2, cp), jnp.float32)],
        compiler_params=_compiler_params(),
    )(tiles, w0p, w1p, b0p, b1p)


# ----------------------------------------------------------------------------
# Parameter construction (mirrors normed_conv2d init semantics)
# ----------------------------------------------------------------------------

def _make_conv_params(key, cin, cout, scale):
    w = jax.random.normal(key, (3, 3, cin, cout), jnp.float32)
    norm = jnp.sqrt(jnp.sum(w * w, axis=(0, 1, 2), keepdims=True))
    w = w * (scale / norm)
    b = jnp.zeros((cout,), jnp.float32)           # normed_conv2d zeroes bias
    return w, b


def init_down_stack_params(key, in_channel, nblock, out_channel, scale=1.0):
    keys = jax.random.split(key, 1 + 2 * nblock)
    params = {"firstconv": _make_conv_params(keys[0], in_channel, out_channel, 1.0),
              "blocks": []}
    s = math.sqrt(scale / math.sqrt(nblock))      # per-conv scale inside a block
    for i in range(nblock):
        w0, b0 = _make_conv_params(keys[1 + 2 * i], out_channel, out_channel, s)
        w1, b1 = _make_conv_params(keys[2 + 2 * i], out_channel, out_channel, s)
        params["blocks"].append(((w0, b0), (w1, b1)))
    return params


# ----------------------------------------------------------------------------
# Forward pass (matches IMPALACnnDownStack.forward, batch_norm=False)
# ----------------------------------------------------------------------------

def impala_down_stack(x_nchw, params, pool=True):
    x = jnp.transpose(x_nchw, (0, 2, 3, 1)).astype(jnp.float32)    # NHWC
    N, H, W, cin = x.shape
    w_first, b_first = params["firstconv"]
    cout = w_first.shape[-1]
    cp_in = _round_up(max(cin, 1), LANE)

    assert W % 8 == 0, "W must be a multiple of 8"
    if pool:
        assert H % 2 == 0 and W % 2 == 0, "pool path assumes even H and W"
        assert (W // 2) % 8 == 0, "post-pool width must be a multiple of 8"
        # TODO(synk): support odd spatial sizes with extra edge masking.

    xb = _pad_channels(x, cp_in).astype(jnp.bfloat16)
    y = _first_conv(xb, w_first, b_first, pool)        # (N, H', W', cp_out) bf16
    for (w0, b0), (w1, b1) in params["blocks"]:
        y = _residual_block(y, w0, b0, w1, b1)

    y = y[..., :cout].astype(jnp.float32)
    return jnp.transpose(y, (0, 3, 1, 2))


# ----------------------------------------------------------------------------
# Pure-JAX reference (for a numeric sanity check)
# ----------------------------------------------------------------------------

def _reference_forward(x_nchw, params, pool=True):
    x = jnp.transpose(x_nchw, (0, 2, 3, 1)).astype(jnp.float32)

    def conv(v, w, b):
        return jax.lax.conv_general_dilated(
            v, w, window_strides=(1, 1), padding=((1, 1), (1, 1)),
            dimension_numbers=("NHWC", "HWIO", "NHWC")) + b

    w, b = params["firstconv"]
    x = conv(x, w, b)
    if pool:
        x = jax.lax.reduce_window(x, -jnp.inf, jax.lax.max,
                                  (1, 3, 3, 1), (1, 2, 2, 1),
                                  ((0, 0), (1, 1), (1, 1), (0, 0)))
    for (w0, b0), (w1, b1) in params["blocks"]:
        h = conv(jax.nn.relu(x), w0, b0)
        x = x + conv(jax.nn.relu(h), w1, b1)
    return jnp.transpose(x, (0, 3, 1, 2))


if __name__ == "__main__":
    key = jax.random.PRNGKey(0)
    kx, kp = jax.random.split(key)

    N, Cin, H, W = 2, 4, 16, 16
    nblock, Cout = 2, 8

    x = jax.random.normal(kx, (N, Cin, H, W), jnp.float32)
    params = init_down_stack_params(kp, Cin, nblock, Cout, scale=1.0)

    fwd = jax.jit(partial(impala_down_stack, pool=True))
    y = jax.block_until_ready(fwd(x, params))

    assert y.shape == (N, Cout, (H + 1) // 2, (W + 1) // 2), y.shape
    assert bool(jnp.all(jnp.isfinite(y)))

    y_ref = _reference_forward(x, params, pool=True)
    err = float(jnp.max(jnp.abs(y - y_ref)))
    assert err < 2e-1, f"max abs error vs f32 reference too large: {err}"

    print("KERNEL_OK")
</pallas_src>

<mosaic_0001>
module attributes {stable_mosaic.version = 11 : i64} {
  func.func @_first_conv_kernel(%arg0: i32, %arg1: i32, %arg2: memref<1x1x12x20x128xbf16, #tpu.memory_space<vmem>>, %arg3: memref<1152x128xbf16, #tpu.memory_space<vmem>>, %arg4: memref<1x128xf32, #tpu.memory_space<vmem>>, %arg5: memref<1x4x16x128xbf16, #tpu.memory_space<vmem>>, %arg6: memref<4x18x128xf32, #tpu.memory_space<vmem>>) attributes {dimension_semantics = [#tpu.dimension_semantics<parallel>, #tpu.dimension_semantics<parallel>], iteration_bounds = array<i64: 2, 2>, scalar_prefetch = 0 : i64, scratch_operands = 1 : i64, tpu.core_type = #tpu.core_type<tc>, window_params = [{transform_indices = @transform_0, window_bounds = array<i64: 1, 1, 12, 20, 128>}, {pipeline_mode = #tpu.pipeline_mode<synchronous>, transform_indices = @transform_1, window_bounds = array<i64: 1152, 128>}, {pipeline_mode = #tpu.pipeline_mode<synchronous>, transform_indices = @transform_2, window_bounds = array<i64: 1, 128>}, {transform_indices = @transform_3, window_bounds = array<i64: 1, 4, 16, 128>}]} {
    %c0 = arith.constant 0 : index
    %c0_0 = arith.constant 0 : index
    %c0_1 = arith.constant 0 : index
    %c0_2 = arith.constant 0 : index
    %c0_3 = arith.constant 0 : index
    %0 = vector.load %arg2[%c0, %c0_0, %c0_1, %c0_2, %c0_3] : memref<1x1x12x20x128xbf16, #tpu.memory_space<vmem>>, vector<1x1x12x20x128xbf16>
    %1 = vector.shape_cast %0 : vector<1x1x12x20x128xbf16> to vector<12x20x128xbf16>
    %2 = arith.extf %1 : vector<12x20x128xbf16> to vector<12x20x128xf32>
    %3 = vector.extract_strided_slice %2 {offsets = [0, 1, 0], sizes = [10, 16, 128], strides = [1, 1, 1]} : vector<12x20x128xf32> to vector<10x16x128xf32>
    %4 = vector.extract_strided_slice %2 {offsets = [0, 2, 0], sizes = [10, 16, 128], strides = [1, 1, 1]} : vector<12x20x128xf32> to vector<10x16x128xf32>
    %5 = vector.extract_strided_slice %2 {offsets = [0, 3, 0], sizes = [10, 16, 128], strides = [1, 1, 1]} : vector<12x20x128xf32> to vector<10x16x128xf32>
    %6 = vector.extract_strided_slice %2 {offsets = [1, 1, 0], sizes = [10, 16, 128], strides = [1, 1, 1]} : vector<12x20x128xf32> to vector<10x16x128xf32>
    %7 = vector.extract_strided_slice %2 {offsets = [1, 2, 0], sizes = [10, 16, 128], strides = [1, 1, 1]} : vector<12x20x128xf32> to vector<10x16x128xf32>
    %8 = vector.extract_strided_slice %2 {offsets = [1, 3, 0], sizes = [10, 16, 128], strides = [1, 1, 1]} : vector<12x20x128xf32> to vector<10x16x128xf32>
    %9 = vector.extract_strided_slice %2 {offsets = [2, 1, 0], sizes = [10, 16, 128], strides = [1, 1, 1]} : vector<12x20x128xf32> to vector<10x16x128xf32>
    %10 = vector.extract_strided_slice %2 {offsets = [2, 2, 0], sizes = [10, 16, 128], strides = [1, 1, 1]} : vector<12x20x128xf32> to vector<10x16x128xf32>
    %11 = vector.extract_strided_slice %2 {offsets = [2, 3, 0], sizes = [10, 16, 128], strides = [1, 1, 1]} : vector<12x20x128xf32> to vector<10x16x128xf32>
    %12 = tpu.concatenate %3, %4, %5, %6, %7, %8, %9, %10, %11 in 2 : vector<10x16x128xf32>, vector<10x16x128xf32>, vector<10x16x128xf32>, vector<10x16x128xf32>, vector<10x16x128xf32>, vector<10x16x128xf32>, vector<10x16x128xf32>, vector<10x16x128xf32>, vector<10x16x128xf32> -> vector<10x16x1152xf32>
    %13 = vector.shape_cast %12 : vector<10x16x1152xf32> to vector<160x1152xf32>
    %14 = arith.truncf %13 : vector<160x1152xf32> to vector<160x1152xbf16>
    %c0_4 = arith.constant 0 : index
    %c0_5 = arith.constant 0 : index
    %15 = vector.load %arg3[%c0_4, %c0_5] : memref<1152x128xbf16, #tpu.memory_space<vmem>>, vector<1152x128xbf16>
    %cst = arith.constant dense<0.000000e+00> : vector<160x128xf32>
    %16 = tpu.matmul %14, %15, %cst {dimension_numbers = #tpu.dot_dimension_numbers<[1], [0], [0], [1], [0, 0, 1, 1], [], []>} : vector<160x1152xbf16>, vector<1152x128xbf16>, vector<160x128xf32> -> vector<160x128xf32>
    %c0_6 = arith.constant 0 : index
    %c0_7 = arith.constant 0 : index
    %17 = vector.load %arg4[%c0_6, %c0_7] : memref<1x128xf32, #tpu.memory_space<vmem>>, vector<1x128xf32>
    %18 = vector.broadcast %17 : vector<1x128xf32> to vector<160x128xf32>
    %19 = arith.addf %16, %18 : vector<160x128xf32>
    %20 = vector.shape_cast %19 : vector<160x128xf32> to vector<10x16x128xf32>
    %21 = tpu.iota {dimensions = array<i32: 0>} : vector<10x16x128xi32>
    %c0_i32 = arith.constant 0 : i32
    %22 = vector.broadcast %c0_i32 : i32 to vector<10x16x128xi32>
    %23 = arith.cmpi eq, %21, %22 : vector<10x16x128xi32>
    %c0_i32_8 = arith.constant 0 : i32
    %24 = arith.cmpi eq, %arg1, %c0_i32_8 : i32
    %25 = vector.broadcast %24 : i1 to vector<10x16x128xi1>
    %26 = arith.andi %23, %25 : vector<10x16x128xi1>
    %cst_9 = arith.constant -3.40282347E+38 : f32
    %27 = vector.broadcast %cst_9 : f32 to vector<10x16x128xf32>
    %28 = arith.select %26, %27, %20 : vector<10x16x128xi1>, vector<10x16x128xf32>
    %29 = vector.extract_strided_slice %28 {offsets = [0, 0, 0], sizes = [8, 16, 128], strides = [1, 1, 1]} : vector<10x16x128xf32> to vector<8x16x128xf32>
    %30 = vector.extract_strided_slice %28 {offsets = [1, 0, 0], sizes = [8, 16, 128], strides = [1, 1, 1]} : vector<10x16x128xf32> to vector<8x16x128xf32>
    %31 = arith.maximumf %29, %30 : vector<8x16x128xf32>
    %32 = vector.extract_strided_slice %28 {offsets = [2, 0, 0], sizes = [8, 16, 128], strides = [1, 1, 1]} : vector<10x16x128xf32> to vector<8x16x128xf32>
    %33 = arith.maximumf %31, %32 : vector<8x16x128xf32>
    %34 = vector.shape_cast %33 : vector<8x16x128xf32> to vector<4x2x16x128xf32>
    %35 = vector.extract_strided_slice %34 {offsets = [0, 0, 0, 0], sizes = [4, 1, 16, 128], strides = [1, 1, 1, 1]} : vector<4x2x16x128xf32> to vector<4x1x16x128xf32>
    %36 = vector.shape_cast %35 : vector<4x1x16x128xf32> to vector<4x16x128xf32>
    %cst_10 = arith.constant -3.40282347E+38 : f32
    %37 = vector.broadcast %cst_10 : f32 to vector<4x1x128xf32>
    %c0_11 = arith.constant 0 : index
    %c0_12 = arith.constant 0 : index
    %c0_13 = arith.constant 0 : index
    %38 = vector.load %arg6[%c0_11, %c0_12, %c0_13] : memref<4x18x128xf32, #tpu.memory_space<vmem>>, vector<4x1x128xf32>
    tpu.vector_store %arg6[%c0_11, %c0_12, %c0_13], %37 {strides = array<i32>} : memref<4x18x128xf32, #tpu.memory_space<vmem>>, vector<4x1x128xf32>,
    %cst_14 = arith.constant -3.40282347E+38 : f32
    %39 = vector.broadcast %cst_14 : f32 to vector<4x1x128xf32>
    %c0_15 = arith.constant 0 : index
    %c17 = arith.constant 17 : index
    %c0_16 = arith.constant 0 : index
    %40 = vector.load %arg6[%c0_15, %c17, %c0_16] : memref<4x18x128xf32, #tpu.memory_space<vmem>>, vector<4x1x128xf32>
    tpu.vector_store %arg6[%c0_15, %c17, %c0_16], %39 {strides = array<i32>} : memref<4x18x128xf32, #tpu.memory_space<vmem>>, vector<4x1x128xf32>,
    %c0_17 = arith.constant 0 : index
    %c1 = arith.constant 1 : index
    %c0_18 = arith.constant 0 : index
    %41 = vector.load %arg6[%c0_17, %c1, %c0_18] : memref<4x18x128xf32, #tpu.memory_space<vmem>>, vector<4x16x128xf32>
    tpu.vector_store %arg6[%c0_17, %c1, %c0_18], %36 {strides = array<i32>} : memref<4x18x128xf32, #tpu.memory_space<vmem>>, vector<4x16x128xf32>,
    %c0_19 = arith.constant 0 : index
    %c0_20 = arith.constant 0 : index
    %c0_21 = arith.constant 0 : index
    %42 = vector.load %arg6[%c0_19, %c0_20, %c0_21] : memref<4x18x128xf32, #tpu.memory_space<vmem>>, vector<4x18x128xf32>
    %43 = vector.extract_strided_slice %42 {offsets = [0, 0, 0], sizes = [4, 16, 128], strides = [1, 1, 1]} : vector<4x18x128xf32> to vector<4x16x128xf32>
    %44 = vector.extract_strided_slice %42 {offsets = [0, 1, 0], sizes = [4, 16, 128], strides = [1, 1, 1]} : vector<4x18x128xf32> to vector<4x16x128xf32>
    %45 = arith.maximumf %43, %44 : vector<4x16x128xf32>
    %46 = vector.extract_strided_slice %42 {offsets = [0, 2, 0], sizes = [4, 16, 128], strides = [1, 1, 1]} : vector<4x18x128xf32> to vector<4x16x128xf32>
    %47 = arith.maximumf %45, %46 : vector<4x16x128xf32>
    %48 = arith.truncf %47 : vector<4x16x128xf32> to vector<4x16x128xbf16>
    %c0_22 = arith.constant 0 : index
    %c0_23 = arith.constant 0 : index
    %c0_24 = arith.constant 0 : index
    %c0_25 = arith.constant 0 : index
    %49 = vector.load %arg5[%c0_22, %c0_23, %c0_24, %c0_25] : memref<1x4x16x128xbf16, #tpu.memory_space<vmem>>, vector<1x4x16x128xbf16>
    %50 = vector.shape_cast %49 : vector<1x4x16x128xbf16> to vector<4x16x128xbf16>
    %51 = vector.shape_cast %48 : vector<4x16x128xbf16> to vector<1x4x16x128xbf16>
    tpu.vector_store %arg5[%c0_22, %c0_23, %c0_24, %c0_25], %51 {strides = array<i32>} : memref<1x4x16x128xbf16, #tpu.memory_space<vmem>>, vector<1x4x16x128xbf16>,
    return
  }
  func.func @transform_0(%arg0: i32, %arg1: i32) -> (i32, i32, i32, i32, i32) {
    %c0_i32 = arith.constant 0 : i32
    %c0_i32_0 = arith.constant 0 : i32
    %c0_i32_1 = arith.constant 0 : i32
    %c0_i32_2 = arith.constant 0 : i32
    return %arg0, %arg1, %c0_i32, %c0_i32_0, %c0_i32_1 : i32, i32, i32, i32, i32
  }
  func.func @transform_1(%arg0: i32, %arg1: i32) -> (i32, i32) {
    %c0_i32 = arith.constant 0 : i32
    %c0_i32_0 = arith.constant 0 : i32
    %c0_i32_1 = arith.constant 0 : i32
    return %c0_i32, %c0_i32_0 : i32, i32
  }
  func.func @transform_2(%arg0: i32, %arg1: i32) -> (i32, i32) {
    %c0_i32 = arith.constant 0 : i32
    %c0_i32_0 = arith.constant 0 : i32
    %c0_i32_1 = arith.constant 0 : i32
    return %c0_i32, %c0_i32_0 : i32, i32
  }
  func.func @transform_3(%arg0: i32, %arg1: i32) -> (i32, i32, i32, i32) {
    %c0_i32 = arith.constant 0 : i32
    %c0_i32_0 = arith.constant 0 : i32
    %c0_i32_1 = arith.constant 0 : i32
    return %arg0, %arg1, %c0_i32, %c0_i32_0 : i32, i32, i32, i32
  }
}

module attributes {stable_mosaic.version = 11 : i64} {
  func.func @_res_block_kernel(%arg0: i32, %arg1: i32, %arg2: memref<1x1x12x12x128xbf16, #tpu.memory_space<vmem>>, %arg3: memref<1152x128xbf16, #tpu.memory_space<vmem>>, %arg4: memref<1152x128xbf16, #tpu.memory_space<vmem>>, %arg5: memref<1x128xf32, #tpu.memory_space<vmem>>, %arg6: memref<1x128xf32, #tpu.memory_space<vmem>>, %arg7: memref<1x8x8x128xbf16, #tpu.memory_space<vmem>>, %arg8: memref<10x10x128xf32, #tpu.memory_space<vmem>>) attributes {dimension_semantics = [#tpu.dimension_semantics<parallel>, #tpu.dimension_semantics<parallel>], iteration_bounds = array<i64: 2, 1>, scalar_prefetch = 0 : i64, scratch_operands = 1 : i64, tpu.core_type = #tpu.core_type<tc>, window_params = [{transform_indices = @transform_0, window_bounds = array<i64: 1, 1, 12, 12, 128>}, {pipeline_mode = #tpu.pipeline_mode<synchronous>, transform_indices = @transform_1, window_bounds = array<i64: 1152, 128>}, {pipeline_mode = #tpu.pipeline_mode<synchronous>, transform_indices = @transform_2, window_bounds = array<i64: 1152, 128>}, {pipeline_mode = #tpu.pipeline_mode<synchronous>, transform_indices = @transform_3, window_bounds = array<i64: 1, 128>}, {pipeline_mode = #tpu.pipeline_mode<synchronous>, transform_indices = @transform_4, window_bounds = array<i64: 1, 128>}, {transform_indices = @transform_5, window_bounds = array<i64: 1, 8, 8, 128>}]} {
    %c0 = arith.constant 0 : index
    %c0_0 = arith.constant 0 : index
    %c0_1 = arith.constant 0 : index
    %c0_2 = arith.constant 0 : index
    %c0_3 = arith.constant 0 : index
    %0 = vector.load %arg2[%c0, %c0_0, %c0_1, %c0_2, %c0_3] : memref<1x1x12x12x128xbf16, #tpu.memory_space<vmem>>, vector<1x1x12x12x128xbf16>
    %1 = vector.shape_cast %0 : vector<1x1x12x12x128xbf16> to vector<12x12x128xbf16>
    %2 = arith.extf %1 : vector<12x12x128xbf16> to vector<12x12x128xf32>
    %cst = arith.constant 0.000000e+00 : f32
    %3 = vector.broadcast %cst : f32 to vector<12x12x128xf32>
    %4 = arith.maximumf %2, %3 : vector<12x12x128xf32>
    %5 = vector.extract_strided_slice %4 {offsets = [0, 1, 0], sizes = [10, 8, 128], strides = [1, 1, 1]} : vector<12x12x128xf32> to vector<10x8x128xf32>
    %6 = vector.extract_strided_slice %4 {offsets = [0, 2, 0], sizes = [10, 8, 128], strides = [1, 1, 1]} : vector<12x12x128xf32> to vector<10x8x128xf32>
    %7 = vector.extract_strided_slice %4 {offsets = [0, 3, 0], sizes = [10, 8, 128], strides = [1, 1, 1]} : vector<12x12x128xf32> to vector<10x8x128xf32>
    %8 = vector.extract_strided_slice %4 {offsets = [1, 1, 0], sizes = [10, 8, 128], strides = [1, 1, 1]} : vector<12x12x128xf32> to vector<10x8x128xf32>
    %9 = vector.extract_strided_slice %4 {offsets = [1, 2, 0], sizes = [10, 8, 128], strides = [1, 1, 1]} : vector<12x12x128xf32> to vector<10x8x128xf32>
    %10 = vector.extract_strided_slice %4 {offsets = [1, 3, 0], sizes = [10, 8, 128], strides = [1, 1, 1]} : vector<12x12x128xf32> to vector<10x8x128xf32>
    %11 = vector.extract_strided_slice %4 {offsets = [2, 1, 0], sizes = [10, 8, 128], strides = [1, 1, 1]} : vector<12x12x128xf32> to vector<10x8x128xf32>
    %12 = vector.extract_strided_slice %4 {offsets = [2, 2, 0], sizes = [10, 8, 128], strides = [1, 1, 1]} : vector<12x12x128xf32> to vector<10x8x128xf32>
    %13 = vector.extract_strided_slice %4 {offsets = [2, 3, 0], sizes = [10, 8, 128], strides = [1, 1, 1]} : vector<12x12x128xf32> to vector<10x8x128xf32>
    %14 = tpu.concatenate %5, %6, %7, %8, %9, %10, %11, %12, %13 in 2 : vector<10x8x128xf32>, vector<10x8x128xf32>, vector<10x8x128xf32>, vector<10x8x128xf32>, vector<10x8x128xf32>, vector<10x8x128xf32>, vector<10x8x128xf32>, vector<10x8x128xf32>, vector<10x8x128xf32> -> vector<10x8x1152xf32>
    %15 = vector.shape_cast %14 : vector<10x8x1152xf32> to vector<80x1152xf32>
    %16 = arith.truncf %15 : vector<80x1152xf32> to vector<80x1152xbf16>
    %c0_4 = arith.constant 0 : index
    %c0_5 = arith.constant 0 : index
    %17 = vector.load %arg3[%c0_4, %c0_5] : memref<1152x128xbf16, #tpu.memory_space<vmem>>, vector<1152x128xbf16>
    %cst_6 = arith.constant dense<0.000000e+00> : vector<80x128xf32>
    %18 = tpu.matmul %16, %17, %cst_6 {dimension_numbers = #tpu.dot_dimension_numbers<[1], [0], [0], [1], [0, 0, 1, 1], [], []>} : vector<80x1152xbf16>, vector<1152x128xbf16>, vector<80x128xf32> -> vector<80x128xf32>
    %c0_7 = arith.constant 0 : index
    %c0_8 = arith.constant 0 : index
    %19 = vector.load %arg5[%c0_7, %c0_8] : memref<1x128xf32, #tpu.memory_space<vmem>>, vector<1x128xf32>
    %20 = vector.broadcast %19 : vector<1x128xf32> to vector<80x128xf32>
    %21 = arith.addf %18, %20 : vector<80x128xf32>
    %cst_9 = arith.constant 0.000000e+00 : f32
    %22 = vector.broadcast %cst_9 : f32 to vector<80x128xf32>
    %23 = arith.maximumf %21, %22 : vector<80x128xf32>
    %24 = vector.shape_cast %23 : vector<80x128xf32> to vector<10x8x128xf32>
    %25 = tpu.iota {dimensions = array<i32: 0>} : vector<10x8x128xi32>
    %c0_i32 = arith.constant 0 : i32
    %26 = vector.broadcast %c0_i32 : i32 to vector<10x8x128xi32>
    %27 = arith.cmpi eq, %25, %26 : vector<10x8x128xi32>
    %c0_i32_10 = arith.constant 0 : i32
    %28 = arith.cmpi eq, %arg1, %c0_i32_10 : i32
    %29 = vector.broadcast %28 : i1 to vector<10x8x128xi1>
    %30 = arith.andi %27, %29 : vector<10x8x128xi1>
    %cst_11 = arith.constant 0.000000e+00 : f32
    %31 = vector.broadcast %cst_11 : f32 to vector<10x8x128xf32>
    %32 = arith.select %30, %31, %24 : vector<10x8x128xi1>, vector<10x8x128xf32>
    %c9_i32 = arith.constant 9 : i32
    %33 = vector.broadcast %c9_i32 : i32 to vector<10x8x128xi32>
    %34 = arith.cmpi eq, %25, %33 : vector<10x8x128xi32>
    %c0_i32_12 = arith.constant 0 : i32
    %35 = arith.cmpi eq, %arg1, %c0_i32_12 : i32
    %36 = vector.broadcast %35 : i1 to vector<10x8x128xi1>
    %37 = arith.andi %34, %36 : vector<10x8x128xi1>
    %cst_13 = arith.constant 0.000000e+00 : f32
    %38 = vector.broadcast %cst_13 : f32 to vector<10x8x128xf32>
    %39 = arith.select %37, %38, %32 : vector<10x8x128xi1>, vector<10x8x128xf32>
    %cst_14 = arith.constant 0.000000e+00 : f32
    %40 = vector.broadcast %cst_14 : f32 to vector<10x1x128xf32>
    %c0_15 = arith.constant 0 : index
    %c0_16 = arith.constant 0 : index
    %c0_17 = arith.constant 0 : index
    %41 = vector.load %arg8[%c0_15, %c0_16, %c0_17] : memref<10x10x128xf32, #tpu.memory_space<vmem>>, vector<10x1x128xf32>
    tpu.vector_store %arg8[%c0_15, %c0_16, %c0_17], %40 {strides = array<i32>} : memref<10x10x128xf32, #tpu.memory_space<vmem>>, vector<10x1x128xf32>,
    %cst_18 = arith.constant 0.000000e+00 : f32
    %42 = vector.broadcast %cst_18 : f32 to vector<10x1x128xf32>
    %c0_19 = arith.constant 0 : index
    %c9 = arith.constant 9 : index
    %c0_20 = arith.constant 0 : index
    %43 = vector.load %arg8[%c0_19, %c9, %c0_20] : memref<10x10x128xf32, #tpu.memory_space<vmem>>, vector<10x1x128xf32>
    tpu.vector_store %arg8[%c0_19, %c9, %c0_20], %42 {strides = array<i32>} : memref<10x10x128xf32, #tpu.memory_space<vmem>>, vector<10x1x128xf32>,
    %c0_21 = arith.constant 0 : index
    %c1 = arith.constant 1 : index
    %c0_22 = arith.constant 0 : index
    %44 = vector.load %arg8[%c0_21, %c1, %c0_22] : memref<10x10x128xf32, #tpu.memory_space<vmem>>, vector<10x8x128xf32>
    tpu.vector_store %arg8[%c0_21, %c1, %c0_22], %39 {strides = array<i32>} : memref<10x10x128xf32, #tpu.memory_space<vmem>>, vector<10x8x128xf32>,
    %c0_23 = arith.constant 0 : index
    %c0_24 = arith.constant 0 : index
    %c0_25 = arith.constant 0 : index
    %45 = vector.load %arg8[%c0_23, %c0_24, %c0_25] : memref<10x10x128xf32, #tpu.memory_space<vmem>>, vector<10x10x128xf32>
    %46 = vector.extract_strided_slice %45 {offsets = [0, 0, 0], sizes = [8, 8, 128], strides = [1, 1, 1]} : vector<10x10x128xf32> to vector<8x8x128xf32>
    %47 = vector.extract_strided_slice %45 {offsets = [0, 1, 0], sizes = [8, 8, 128], strides = [1, 1, 1]} : vector<10x10x128xf32> to vector<8x8x128xf32>
    %48 = vector.extract_strided_slice %45 {offsets = [0, 2, 0], sizes = [8, 8, 128], strides = [1, 1, 1]} : vector<10x10x128xf32> to vector<8x8x128xf32>
    %49 = vector.extract_strided_slice %45 {offsets = [1, 0, 0], sizes = [8, 8, 128], strides = [1, 1, 1]} : vector<10x10x128xf32> to vector<8x8x128xf32>
    %50 = vector.extract_strided_slice %45 {offsets = [1, 1, 0], sizes = [8, 8, 128], strides = [1, 1, 1]} : vector<10x10x128xf32> to vector<8x8x128xf32>
    %51 = vector.extract_strided_slice %45 {offsets = [1, 2, 0], sizes = [8, 8, 128], strides = [1, 1, 1]} : vector<10x10x128xf32> to vector<8x8x128xf32>
    %52 = vector.extract_strided_slice %45 {offsets = [2, 0, 0], sizes = [8, 8, 128], strides = [1, 1, 1]} : vector<10x10x128xf32> to vector<8x8x128xf32>
    %53 = vector.extract_strided_slice %45 {offsets = [2, 1, 0], sizes = [8, 8, 128], strides = [1, 1, 1]} : vector<10x10x128xf32> to vector<8x8x128xf32>
    %54 = vector.extract_strided_slice %45 {offsets = [2, 2, 0], sizes = [8, 8, 128], strides = [1, 1, 1]} : vector<10x10x128xf32> to vector<8x8x128xf32>
    %55 = tpu.concatenate %46, %47, %48, %49, %50, %51, %52, %53, %54 in 2 : vector<8x8x128xf32>, vector<8x8x128xf32>, vector<8x8x128xf32>, vector<8x8x128xf32>, vector<8x8x128xf32>, vector<8x8x128xf32>, vector<8x8x128xf32>, vector<8x8x128xf32>, vector<8x8x128xf32> -> vector<8x8x1152xf32>
    %56 = vector.shape_cast %55 : vector<8x8x1152xf32> to vector<64x1152xf32>
    %57 = arith.truncf %56 : vector<64x1152xf32> to vector<64x1152xbf16>
    %c0_26 = arith.constant 0 : index
    %c0_27 = arith.constant 0 : index
    %58 = vector.load %arg4[%c0_26, %c0_27] : memref<1152x128xbf16, #tpu.memory_space<vmem>>, vector<1152x128xbf16>
    %cst_28 = arith.constant dense<0.000000e+00> : vector<64x128xf32>
    %59 = tpu.matmul %57, %58, %cst_28 {dimension_numbers = #tpu.dot_dimension_numbers<[1], [0], [0], [1], [0, 0, 1, 1], [], []>} : vector<64x1152xbf16>, vector<1152x128xbf16>, vector<64x128xf32> -> vector<64x128xf32>
    %c0_29 = arith.constant 0 : index
    %c0_30 = arith.constant 0 : index
    %60 = vector.load %arg6[%c0_29, %c0_30] : memref<1x128xf32, #tpu.memory_space<vmem>>, vector<1x128xf32>
    %61 = vector.broadcast %60 : vector<1x128xf32> to vector<64x128xf32>
    %62 = arith.addf %59, %61 : vector<64x128xf32>
    %63 = vector.extract_strided_slice %2 {offsets = [2, 2, 0], sizes = [8, 8, 128], strides = [1, 1, 1]} : vector<12x12x128xf32> to vector<8x8x128xf32>
    %64 = vector.shape_cast %63 : vector<8x8x128xf32> to vector<64x128xf32>
    %65 = arith.addf %62, %64 : vector<64x128xf32>
    %66 = vector.shape_cast %65 : vector<64x128xf32> to vector<8x8x128xf32>
    %67 = arith.truncf %66 : vector<8x8x128xf32> to vector<8x8x128xbf16>
    %c0_31 = arith.constant 0 : index
    %c0_32 = arith.constant 0 : index
    %c0_33 = arith.constant 0 : index
    %c0_34 = arith.constant 0 : index
    %68 = vector.load %arg7[%c0_31, %c0_32, %c0_33, %c0_34] : memref<1x8x8x128xbf16, #tpu.memory_space<vmem>>, vector<1x8x8x128xbf16>
    %69 = vector.shape_cast %68 : vector<1x8x8x128xbf16> to vector<8x8x128xbf16>
    %70 = vector.shape_cast %67 : vector<8x8x128xbf16> to vector<1x8x8x128xbf16>
    tpu.vector_store %arg7[%c0_31, %c0_32, %c0_33, %c0_34], %70 {strides = array<i32>} : memref<1x8x8x128xbf16, #tpu.memory_space<vmem>>, vector<1x8x8x128xbf16>,
    return
  }
  func.func @transform_0(%arg0: i32, %arg1: i32) -> (i32, i32, i32, i32, i32) {
    %c0_i32 = arith.constant 0 : i32
    %c0_i32_0 = arith.constant 0 : i32
    %c0_i32_1 = arith.constant 0 : i32
    %c0_i32_2 = arith.constant 0 : i32
    return %arg0, %arg1, %c0_i32, %c0_i32_0, %c0_i32_1 : i32, i32, i32, i32, i32
  }
  func.func @transform_1(%arg0: i32, %arg1: i32) -> (i32, i32) {
    %c0_i32 = arith.constant 0 : i32
    %c0_i32_0 = arith.constant 0 : i32
    %c0_i32_1 = arith.constant 0 : i32
    return %c0_i32, %c0_i32_0 : i32, i32
  }
  func.func @transform_2(%arg0: i32, %arg1: i32) -> (i32, i32) {
    %c0_i32 = arith.constant 0 : i32
    %c0_i32_0 = arith.constant 0 : i32
    %c0_i32_1 = arith.constant 0 : i32
    return %c0_i32, %c0_i32_0 : i32, i32
  }
  func.func @transform_3(%arg0: i32, %arg1: i32) -> (i32, i32) {
    %c0_i32 = arith.constant 0 : i32
    %c0_i32_0 = arith.constant 0 : i32
    %c0_i32_1 = arith.constant 0 : i32
    return %c0_i32, %c0_i32_0 : i32, i32
  }
  func.func @transform_4(%arg0: i32, %arg1: i32) -> (i32, i32) {
    %c0_i32 = arith.constant 0 : i32
    %c0_i32_0 = arith.constant 0 : i32
    %c0_i32_1 = arith.constant 0 : i32
    return %c0_i32, %c0_i32_0 : i32, i32
  }
  func.func @transform_5(%arg0: i32, %arg1: i32) -> (i32, i32, i32, i32) {
    %c0_i32 = arith.constant 0 : i32
    %c0_i32_0 = arith.constant 0 : i32
    %c0_i32_1 = arith.constant 0 : i32
    return %arg0, %arg1, %c0_i32, %c0_i32_0 : i32, i32, i32, i32
  }
}

</mosaic_0001>

<bundles_post_ra>
// kernel: impala_down_stack.3
= control target key start
LH: loop header
LB: loop body
LE: loop exit
PB: predicated region body
PF: predicated region fallthrough
CT: control target
= control target key end

     0   :  { %s2579_s12 = smov 0   ;;  %s2581_s13 = smov 0   ;;  %s3616_s0 = inlined_call_operand.vmem [shape: bf16[2,2,12,20,128], index: 0, kind: input, shape index: {}]   ;;  %s3617_s1 = inlined_call_operand.vmem [shape: bf16[1152,128], index: 1, kind: input, shape index: {}]   ;;  %s3618_s2 = inlined_call_operand.vmem [shape: f32[1,128], index: 2, kind: input, shape index: {}]   ;;  %s3619_s3 = inlined_call_operand.vmem [shape: bf16[2,8,16,128], index: 3, kind: output, shape index: {}]  }
   0x1   :  { %s2583_s14 = smov 0   ;;  %s2585_s15 = smov 0  }
   0x2   :  { %s2587_s16 = smov 0  }
   0x3 LB: > { %s22_s17 = sadd.s32 1, %s2548_s14  ;;  %s25_s18 = sadd.s32 1, %s2552_s15  ;;  %s2556_s16 = sphi %s2587_s16, %s13_s16   ;;  %s2552_s15 = sphi %s2585_s15, %s3725_s15   ;;  %s2548_s14 = sphi %s2583_s14, %s3724_s14   ;;  %s2544_s13 = sphi %s2581_s13, %s3723_s13   ;;  %s2540_s12 = sphi %s2579_s12, %s3722_s12  }
   0x4   : > { %p23_p0 = scmp.ge.s32.totalorder %s22_s17, 2  ;;  %p2030_p1 = scmp.ge.s32.totalorder %s2556_s16, 1 }
   0x5   : > { %p157_p2 = scmp.lt.s32.totalorder %s2556_s16, 5 }
   0x6   : > { %s3727_s17 = smov (%p23_p0, %s22_s17), 0  ;;  %s3729_s18 = smov (!%p23_p0, %s25_s18), %s2552_s15 }
   0x7   : > { %p158_p3 = pnand %p2030_p1, %p157_p2  ;;  %p27_p4 = scmp.ge.s32.totalorder %s3729_s18, 2 }
   0x9   : > { %s3731_s18 = smov (%p27_p4, %s3729_s18), 0  ;;  %161 = sbr.rel (%p158_p3) target bundleno = 546 (0x222), region = 32 }
   0xe   : > { %v2333_v0 = vld [vmem:[%s3617_s1 + $0x38] sm:$0xff]  ;;  %p190_p5 = scmp.lt.s32.totalorder %s2544_s13, 1  ;;  %p192_p6 = scmp.lt.s32.totalorder %s2540_s12, 1  ;;  %v2332_v1 = vld [vmem:[%s3617_s1 + $0x30] sm:$0xff]  ;;  %v2331_v2 = vld [vmem:[%s3617_s1 + $0x28] sm:$0xff]  ;;  %vm312_vm0 = vcmask 1046528  }
   0xf   : > { %1248 = vmatpush.bf16.msra.mxu0 %v2333_v0  ;;  %2450 = vmatpush.bf16.msra.mxu1 %v2333_v0  ;;  %v2330_v3 = vld [vmem:[%s3617_s1 + $0x20] sm:$0xff]  ;;  %v2329_v4 = vld [vmem:[%s3617_s1 + $0x18] sm:$0xff]  ;;  %v2328_v15 = vld [vmem:[%s3617_s1 + $0x10] sm:$0xff]  ;;  %vm363_vm1 = vcmask 1045504   ;;  %p1761_p7 = scmp.eq.s32.totalorder %s2540_s12, 0  ;;  %s2032_s20 = sshll.u32 %s2540_s12, 2 }
  0x10   : > { %s3733_s13 = smov (!%p190_p5, %s2544_s13), 1  ;;  %2451 = vmatpush.bf16.msra.mxu2 %v2333_v0  ;;  %2452 = vmatpush.bf16.msra.mxu3 %v2333_v0  ;;  %v2327_v28 = vld [vmem:[%s3617_s1 + $0x8] sm:$0xff]  ;;  %v2326_v40 = vld [vmem:[%s3617_s1] sm:$0xff]  ;;  %v2341_v44 = vld [vmem:[%s3617_s1 + $0x78] sm:$0xff]  ;;  %p202_p8 = scmp.lt.s32.totalorder %s2032_s20, 7 }
  0x11   : > { %s193_s23 = scalar_select %p192_p6, %s2540_s12, 1  ;;  %v2349_v47 = vld [vmem:[%s3617_s1 + $0xb8] sm:$0xff]  ;;  %v2340_v52 = vld [vmem:[%s3617_s1 + $0x70] sm:$0xff] }
  0x12   : > { %s2475_s24 = smul.u32 72, %s3733_s13  ;;  %v2365_v54 = vld [vmem:[%s3617_s1 + $0x138] sm:$0xff]  ;;  %v2348_v61 = vld [vmem:[%s3617_s1 + $0xb0] sm:$0xff]  ;;  %s3735_s20 = smov (!%p202_p8, %s2032_s20), 7 }
  0x13   : > { %s2474_s25 = smul.u32 36, %s193_s23  ;;  %1249 = vmatpush.bf16.msra.mxu0 %v2332_v1  ;;  %2453 = vmatpush.bf16.msra.mxu1 %v2332_v1  ;;  %v2357_v55 = vld [vmem:[%s3617_s1 + $0xf8] sm:$0xff]  ;;  %s2033_s12 = sshll.u32 %s3735_s20, 1 }
  0x14   : > { %2454 = vmatpush.bf16.msra.mxu2 %v2332_v1  ;;  %2455 = vmatpush.bf16.msra.mxu3 %v2332_v1  ;;  %s2034_s21 = sshll.u32 %s3733_s13, 4 }
  0x15   : > { %s196_s28 = sadd.s32 %s2475_s24, %s2474_s25  ;;  %s206_s22 = sadd.s32 %s2034_s21, %s2033_s12 }
  0x16   : > { %s2031_s29 = sshll.u32 %s196_s28, 2  ;;  %s2035_s13 = sshll.u32 %s206_s22, 2 }
  0x17   : > { %1250 = vmatpush.bf16.msra.mxu0 %v2331_v2  ;;  %2456 = vmatpush.bf16.msra.mxu1 %v2331_v2  ;;  %s2631_s7 = scalar_lea.vmem %s3616_s0, %s2031_s29  ;;  %s3572_s25 = scalar_lea.vmem %s3619_s3, %s2035_s13 }
  0x18   : > { %2457 = vmatpush.bf16.msra.mxu2 %v2331_v2  ;;  %2458 = vmatpush.bf16.msra.mxu3 %v2331_v2  ;;  %v2637_v5 = vld [vmem:[%s2631_s7] sm:$0xff]   ;;  %v2640_v6 = vld [vmem:[%s2631_s7 + $0x8] sm:$0x3]  ;;  %v2646_v8 = vld [vmem:[%s2631_s7 + $0x2c] sm:$0x3] }
  0x19   : > { %v2643_v7 = vld [vmem:[%s2631_s7 + $0x24] sm:$0xff]   ;;  %v2652_v10 = vld [vmem:[%s2631_s7 + $0x50] sm:$0x3]  ;;  %v2400_v11 = vunpack.c.l.bf16 %v2637_v5  ;;  %v2401_v12 = vunpack.c.h.bf16 %v2637_v5  ;;  %v248_v16 = vunpack.c.l.bf16 %v2640_v6  ;;  %v3635_v19 = vunpack.c.l.bf16 %v2646_v8  ;;  %v2774_v58 = vld [vmem:[%s2631_s7 + $0x14] sm:$0x3] }
  0x1a   : > { %v2649_v9 = vld [vmem:[%s2631_s7 + $0x48] sm:$0xff]   ;;  %v2657_v13 = vld [vmem:[%s2631_s7 + $0x60] sm:$0xff]   ;;  %v3637_v17 = vunpack.c.l.bf16 %v2643_v7  ;;  %v3636_v18 = vunpack.c.h.bf16 %v2643_v7  ;;  %v3623_v22 = vunpack.c.l.bf16 %v2652_v10  ;;  %v2777_v59 = vld [vmem:[%s2631_s7 + $0x30] sm:$0xff]  }
  0x1b   : > { %1251 = vmatpush.bf16.msra.mxu0 %v2330_v3  ;;  %2459 = vmatpush.bf16.msra.mxu1 %v2330_v3  ;;  %v2660_v14 = vld [vmem:[%s2631_s7 + $0x68] sm:$0x3]  ;;  %v3625_v20 = vunpack.c.l.bf16 %v2649_v9  ;;  %v3624_v21 = vunpack.c.h.bf16 %v2649_v9  ;;  %v3622_v23 = vunpack.c.l.bf16 %v2657_v13  ;;  %v3621_v24 = vunpack.c.h.bf16 %v2657_v13  ;;  %v2767_v56 = vld [vmem:[%s2631_s7 + $0xc] sm:$0xff]   ;;  %v2780_v60 = vld [vmem:[%s2631_s7 + $0x38] sm:$0x3] }
  0x1c   : > { %2460 = vmatpush.bf16.msra.mxu2 %v2330_v3  ;;  %2461 = vmatpush.bf16.msra.mxu3 %v2330_v3  ;;  %v3620_v25 = vunpack.c.l.bf16 %v2660_v14  ;;  %v313_v26 = vrot.slane %v2400_v11, 1  ;;  %v314_v27 = vrot.slane %v2401_v12, 1  ;;  %v2684_v29 = vrot.slane %v248_v16, 1  ;;  %v2786_v62 = vld [vmem:[%s2631_s7 + $0x54] sm:$0xff]   ;;  %v2789_v63 = vld [vmem:[%s2631_s7 + $0x5c] sm:$0x3] }
  0x1d   : > { %v328_v30 = vrot.slane %v3637_v17, 1  ;;  %v329_v31 = vrot.slane %v3636_v18, 1  ;;  %v2692_v32 = vrot.slane %v3635_v19, 1  ;;  %v343_v33 = vrot.slane %v3625_v20, 1  ;;  %v2795_v2 = vld [vmem:[%s2631_s7 + $0x6c] sm:$0xff]   ;;  %v2346_v20 = vld [vmem:[%s3617_s1 + $0xa0] sm:$0xff] }
  0x1e   : > { %v344_v34 = vrot.slane %v3624_v21, 1  ;;  %v2700_v35 = vrot.slane %v3623_v22, 1  ;;  %v353_v36 = vrot.slane %v3622_v23, 1  ;;  %v354_v37 = vrot.slane %v3621_v24, 1  ;;  %3662 = vst [vmem:[#allocation4_spill] sm:$0xff] %v2795_v2  ;;  %v2363_v24 = vld [vmem:[%s3617_s1 + $0x128] sm:$0xff] }
  0x1f   : > { %1252 = vmatpush.bf16.msra.mxu0 %v2329_v4  ;;  %2462 = vmatpush.bf16.msra.mxu1 %v2329_v4  ;;  %v2708_v38 = vrot.slane %v3620_v25, 1  ;;  %v2711_v39 = vsel %vm312_vm0, %v313_v26, %v314_v27  ;;  %v2718_v41 = vsel %vm312_vm0, %v314_v27, %v2684_v29  ;;  %v2721_v42 = vsel %vm312_vm0, %v328_v30, %v329_v31  ;;  %v2798_v3 = vld [vmem:[%s2631_s7 + $0x74] sm:$0x3]  ;;  %v2339_v30 = vld [vmem:[%s3617_s1 + $0x68] sm:$0xff]  ;;  %v2937_v19 = vld [vmem:[%s2631_s7 + $0x3c] sm:$0xff]  }
  0x20   : > { %2463 = vmatpush.bf16.msra.mxu2 %v2329_v4  ;;  %2464 = vmatpush.bf16.msra.mxu3 %v2329_v4  ;;  %v2725_v43 = vsel %vm312_vm0, %v329_v31, %v2692_v32  ;;  %v2731_v45 = vsel %vm312_vm0, %v343_v33, %v344_v34  ;;  %v2735_v46 = vsel %vm312_vm0, %v344_v34, %v2700_v35  ;;  %v3640_v0 = vunpack.c.l.bf16 %v2767_v56  ;;  %v2364_v4 = vld [vmem:[%s3617_s1 + $0x130] sm:$0xff] }
  0x21   : > { %v2741_v48 = vsel %vm312_vm0, %v353_v36, %v354_v37  ;;  %v2745_v49 = vsel %vm312_vm0, %v354_v37, %v2708_v38  ;;  %v632_v50 = vpack.c.bf16 %v2718_v41, %v2711_v39  ;;  %v2751_v51 = vpack.c.bf16 %v2725_v43, %v2721_v42  ;;  %3663 = vst [vmem:[#allocation5_spill] sm:$0xff] %v2798_v3  ;;  %v2356_v36 = vld [vmem:[%s3617_s1 + $0xf0] sm:$0xff]  ;;  %v2347_v37 = vld [vmem:[%s3617_s1 + $0xa8] sm:$0xff] }
  0x22   : > { %v2758_v53 = vpack.c.bf16 %v2735_v46, %v2731_v45  ;;  %v2771_v57 = vpack.c.bf16 %v2745_v49, %v2741_v48  ;;  %v3639_v1 = vunpack.c.h.bf16 %v2767_v56  ;;  %v3634_v26 = vunpack.c.l.bf16 %v2777_v59 }
  0x23   : > { %1253 = vmatpush.bf16.msra.mxu0 %v2328_v15  ;;  %2465 = vmatpush.bf16.msra.mxu1 %v2328_v15  ;;  %v3633_v27 = vunpack.c.h.bf16 %v2777_v59  ;;  %v3626_v31 = vunpack.c.l.bf16 %v2786_v62  ;;  %v3627_v33 = vunpack.c.h.bf16 %v2786_v62  ;;  %v3628_v34 = vunpack.c.l.bf16 %v2789_v63 }
  0x24   : > { %2466 = vmatpush.bf16.msra.mxu2 %v2328_v15  ;;  %2467 = vmatpush.bf16.msra.mxu3 %v2328_v15  ;;  %3661 = vst [vmem:[#allocation3_spill] sm:$0xff] %v2771_v57  ;;  %v3638_v15 = vunpack.c.l.bf16 %v2774_v58  ;;  %v364_v18 = vrot.slane %v2400_v11, 2  ;;  %v365_v17 = vrot.slane %v2401_v12, 2 }
  0x25   : > { %v348_v23 = vrot.slane %v3626_v31, 1  ;;  %v349_v22 = vrot.slane %v3627_v33, 1  ;;  %v2852_v21 = vrot.slane %v3628_v34, 1 }
  0x27   : > { %1254 = vmatpush.bf16.msra.mxu0 %v2327_v28  ;;  %2468 = vmatpush.bf16.msra.mxu1 %v2327_v28 }
  0x28   : > { %2469 = vmatpush.bf16.msra.mxu2 %v2327_v28  ;;  %2470 = vmatpush.bf16.msra.mxu3 %v2327_v28  ;;  %v3629_v28 = vunpack.c.l.bf16 %v2780_v60 }
  0x2a   : > { %v2838_v25 = vrot.slane %v3629_v28, 1 }
  0x2b   : > { %1255 = vmatpush.bf16.msra.mxu0 %v2326_v40  ;;  %2471 = vmatpush.bf16.msra.mxu1 %v2326_v40 }
  0x2c   : > { %2472 = vmatpush.bf16.msra.mxu2 %v2326_v40  ;;  %2473 = vmatpush.bf16.msra.mxu3 %v2326_v40  ;;  %v3630_v40 = vunpack.c.l.bf16 %v2795_v2 }
  0x2e   : > { %1256 = vmatmul.bf16.vlgmr.msra.gmra.mxu0 %v632_v50  ;;  %1271 = vmatmul.bf16.vlgmr.msra.gmra.mxu1 %v2751_v51  ;;  %v318_v50 = vrot.slane %v3640_v0, 1  ;;  %v358_v31 = vrot.slane %v3630_v40, 1  ;;  %v2335_v0 = vld [vmem:[%s3617_s1 + $0x48] sm:$0xff] }
  0x2f   : > { %1305 = vmatpush.bf16.msrb.mxu1 %v2341_v44  ;;  %1286 = vmatmul.bf16.vlgmr.msra.gmra.mxu2 %v2758_v53  ;;  %v3632_v44 = vunpack.c.h.bf16 %v2795_v2 }
  0x30   : > { %1362 = vmatpush.bf16.msrb.mxu2 %v2349_v47  ;;  %1476 = vmatpush.bf16.msrb.mxu0 %v2365_v54  ;;  %v3631_v47 = vunpack.c.l.bf16 %v2798_v3  ;;  %v2830_v54 = vrot.slane %v3638_v15, 1  ;;  %v367_v15 = vrot.slane %v248_v16, 2  ;;  %v366_v16 = vsel %vm363_vm1, %v364_v18, %v365_v17 }
  0x31   : > { %1296 = vmatmul.bf16.vlgmr.msra.gmra.mxu3 %v2771_v57  ;;  %v359_v33 = vrot.slane %v3632_v44, 1  ;;  %v2927_v44 = vld [vmem:[%s2631_s7 + $0x18] sm:$0xff]   ;;  %v3671_v3 = vunpack.c.h.bf16 %v2937_v19 }
  0x32   : > { %1419 = vmatpush.bf16.msrb.mxu3 %v2357_v55  ;;  %v333_v55 = vrot.slane %v3634_v26, 1  ;;  %v2866_v34 = vrot.slane %v3631_v47, 1  ;;  %v2362_v47 = vld [vmem:[%s3617_s1 + $0x120] sm:$0xff]  ;;  %v3650_v5 = vunpack.c.l.bf16 %v2927_v44  ;;  %v3649_v11 = vunpack.c.h.bf16 %v2927_v44 }
  0x33   : > { %1306 = vmatpush.bf16.msrb.mxu1 %v2340_v52  ;;  %v319_v52 = vrot.slane %v3639_v1, 1  ;;  %v2934_v26 = vld [vmem:[%s2631_s7 + $0x20] sm:$0x3]  ;;  %v2344_v1 = vld [vmem:[%s3617_s1 + $0x90] sm:$0xff]  ;;  %v368_v12 = vsel %vm363_vm1, %v365_v17, %v367_v15  ;;  %v2359_v17 = vld [vmem:[%s3617_s1 + $0x108] sm:$0xff] }
  0x34   : > { %1363 = vmatpush.bf16.msrb.mxu2 %v2348_v61  ;;  %1477 = vmatpush.bf16.msrb.mxu0 %v2364_v4  ;;  %v334_v61 = vrot.slane %v3633_v27, 1  ;;  %v2338_v4 = vld [vmem:[%s3617_s1 + $0x60] sm:$0xff]  ;;  %3664 = vst [vmem:[#allocation6_spill] sm:$0xff] %v2866_v34  ;;  %v324_v6 = vrot.slane %v3649_v11, 1  ;;  %v443_v11 = vrot.slane %v366_v16, 1 }
  0x36   : > { %1420 = vmatpush.bf16.msrb.mxu3 %v2356_v36  ;;  %v2869_v36 = vsel %vm312_vm0, %v318_v50, %v319_v52  ;;  %v2876_v28 = vsel %vm312_vm0, %v333_v55, %v334_v61  ;;  %v2880_v40 = vsel %vm312_vm0, %v334_v61, %v2838_v25  ;;  %v2886_v50 = vsel %vm312_vm0, %v348_v23, %v349_v22  ;;  %v2337_v55 = vld [vmem:[%s3617_s1 + $0x58] sm:$0xff] }
  0x37   : > { %1307 = vmatpush.bf16.msrb.mxu1 %v2339_v30  ;;  %v2355_v30 = vld [vmem:[%s3617_s1 + $0xe8] sm:$0xff]  ;;  %v2345_v23 = vld [vmem:[%s3617_s1 + $0x98] sm:$0xff]  ;;  %v2906_v61 = vsel %vm312_vm0, %v359_v33, %v2866_v34  ;;  %v339_v34 = vrot.slane %v3671_v3, 1 }
  0x38   : > { %1364 = vmatpush.bf16.msrb.mxu2 %v2347_v37  ;;  %v2873_v37 = vsel %vm312_vm0, %v319_v52, %v2830_v54  ;;  %1478 = vmatpush.bf16.msrb.mxu0 %v2363_v24  ;;  %v2890_v52 = vsel %vm312_vm0, %v349_v22, %v2852_v21  ;;  %v2354_v24 = vld [vmem:[%s3617_s1 + $0xe0] sm:$0xff]  ;;  %v2902_v22 = vsel %vm312_vm0, %v358_v31, %v359_v33  ;;  %v2336_v31 = vld [vmem:[%s3617_s1 + $0x50] sm:$0xff]  ;;  %v2361_v33 = vld [vmem:[%s3617_s1 + $0x118] sm:$0xff] }
  0x39   : > { %3665 = vst [vmem:[#allocation7_spill] sm:$0xff] %v2902_v22  ;;  %v2931_v27 = vpack.c.bf16 %v2906_v61, %v2902_v22  ;;  %v2351_v3 = vld [vmem:[%s3617_s1 + $0xc8] sm:$0xff]  ;;  %v3675_v22 = vunpack.c.l.bf16 %v2774_v58  ;;  %v2396_v58 = vld [vmem:[%s3617_s1 + $0x230] sm:$0xff] }
  0x3a   : > { %1421 = vmatpush.bf16.msrb.mxu3 %v2355_v30  ;;  %3666 = vst [vmem:[#allocation8_spill] sm:$0xff] %v2906_v61  ;;  %v2918_v30 = vpack.c.bf16 %v2890_v52, %v2886_v50 }
  0x3b   : > { %1308 = vmatpush.bf16.msrb.mxu1 %v2338_v4  ;;  %v2910_v4 = vpack.c.bf16 %v2873_v37, %v2869_v36  ;;  %3668 = vst [vmem:[#allocation10_spill] sm:$0xff] %v2931_v27 }
  0x3c   : > { %1365 = vmatpush.bf16.msrb.mxu2 %v2346_v20  ;;  %v2914_v20 = vpack.c.bf16 %v2880_v40, %v2876_v28  ;;  %3667 = vst [vmem:[#allocation9_spill] sm:$0xff] %v2918_v30  ;;  %1479 = vmatpush.bf16.msrb.mxu0 %v2362_v47  ;;  %v2940_v47 = vld [vmem:[%s2631_s7 + $0x44] sm:$0x3] }
  0x3d   : > { %v3672_v18 = vunpack.c.l.bf16 %v2940_v47 }
  0x3e   : > { %1422 = vmatpush.bf16.msrb.mxu3 %v2354_v24  ;;  %1261 = vmatmul.bf16.gmra.mxu0 %v2910_v4  ;;  %v2343_v24 = vld [vmem:[%s3617_s1 + $0x88] sm:$0xff] }
  0x3f   : > { %1309 = vmatpush.bf16.msrb.mxu1 %v2337_v55  ;;  %v2353_v55 = vld [vmem:[%s3617_s1 + $0xd8] sm:$0xff]  ;;  %1291 = vmatmul.bf16.gmra.mxu2 %v2918_v30  ;;  %v2992_v2 = vrot.slane %v3672_v18, 1  ;;  %v2358_v18 = vld [vmem:[%s3617_s1 + $0x100] sm:$0xff]  ;;  %v372_v30 = vrot.slane %v3675_v22, 2 }
  0x40   : > { %1366 = vmatpush.bf16.msrb.mxu2 %v2345_v23  ;;  %1276 = vmatmul.bf16.gmra.mxu1 %v2914_v20  ;;  %v2360_v23 = vld [vmem:[%s3617_s1 + $0x110] sm:$0xff] }
  0x41   : > { %1480 = vmatpush.bf16.msrb.mxu0 %v2361_v33  ;;  %1301 = vmatmul.bf16.gmra.mxu3 %v2931_v27  ;;  %v2352_v33 = vld [vmem:[%s3617_s1 + $0xd0] sm:$0xff]  ;;  %v3670_v27 = vunpack.c.l.bf16 %v2937_v19 }
  0x42   : > { %1423 = vmatpush.bf16.msrb.mxu3 %v2353_v55 }
  0x43   : > { %1310 = vmatpush.bf16.msrb.mxu1 %v2336_v31  ;;  %v323_v31 = vrot.slane %v3650_v5, 1  ;;  %v338_v57 = vrot.slane %v3670_v27, 1  ;;  %v444_v5 = vrot.slane %v368_v12, 1  ;;  %v2334_v27 = vld [vmem:[%s3617_s1 + $0x40] sm:$0xff] }
  0x44   : > { %1367 = vmatpush.bf16.msrb.mxu2 %v2344_v1  ;;  %v3669_v1 = vunpack.c.l.bf16 %v2934_v26 }
  0x45   : > { %1481 = vmatpush.bf16.msrb.mxu0 %v2360_v23  ;;  %v2342_v23 = vld [vmem:[%s3617_s1 + $0x80] sm:$0xff]  ;;  %v3013_v12 = vsel %vm312_vm0, %v323_v31, %v324_v6  ;;  %v445_v61 = vsel %vm312_vm0, %v443_v11, %v444_v5 }
  0x46   : > { %v2984_v55 = vrot.slane %v3669_v1, 1  ;;  %v460_v1 = vrot.slane %v367_v15, 1  ;;  %1424 = vmatpush.bf16.msrb.mxu3 %v2352_v33  ;;  %v2373_v15 = vld [vmem:[%s3617_s1 + $0x178] sm:$0xff]  ;;  %v3024_v33 = vsel %vm312_vm0, %v339_v34, %v2992_v2 }
  0x47   : > { %1311 = vmatpush.bf16.msrb.mxu1 %v2335_v0  ;;  %v2381_v0 = vld [vmem:[%s3617_s1 + $0x1b8] sm:$0xff] }
  0x48   : > { %1368 = vmatpush.bf16.msrb.mxu2 %v2343_v24  ;;  %v3017_v16 = vsel %vm312_vm0, %v324_v6, %v2984_v55  ;;  %v3020_v24 = vsel %vm312_vm0, %v338_v57, %v339_v34  ;;  %v461_v31 = vsel %vm312_vm0, %v444_v5, %v460_v1  ;;  %v2397_v6 = vld [vmem:[%s3617_s1 + $0x238] sm:$0xff]  ;;  %v2350_v57 = vld [vmem:[%s3617_s1 + $0xc0] sm:$0xff]  ;;  %v3673_v1 = vunpack.c.l.bf16 %v2767_v56 }
  0x49   : > { %1482 = vmatpush.bf16.msrb.mxu0 %v2359_v17  ;;  %v3039_v34 = vpack.c.bf16 %v3017_v16, %v3013_v12  ;;  %v3043_v11 = vpack.c.bf16 %v3024_v33, %v3020_v24  ;;  %v634_v5 = vpack.c.bf16 %v461_v31, %v445_v61  ;;  %v2389_v17 = vld [vmem:[%s3617_s1 + $0x1f8] sm:$0xff]  ;;  %v2380_v61 = vld [vmem:[%s3617_s1 + $0x1b0] sm:$0xff]  ;;  %v458_v31 = vrot.slane %v2684_v29, 1 }
  0x4a   : > { %1425 = vmatpush.bf16.msrb.mxu3 %v2351_v3  ;;  %v3674_v3 = vunpack.c.h.bf16 %v2767_v56  ;;  %v2372_v56 = vld [vmem:[%s3617_s1 + $0x170] sm:$0xff] }
  0x4b   : > { %1312 = vmatpush.bf16.msrb.mxu1 %v2334_v27  ;;  %v369_v27 = vrot.slane %v3673_v1, 2 }
  0x4c   : > { %1369 = vmatpush.bf16.msrb.mxu2 %v2342_v23  ;;  %v370_v23 = vrot.slane %v3674_v3, 2  ;;  %v470_v3 = vrot.slane %v2721_v42, 1 }
  0x4d   : > { %1483 = vmatpush.bf16.msrb.mxu0 %v2358_v18  ;;  %v440_v18 = vrot.slane %v2711_v39, 1 }
  0x4e   : > { %1426 = vmatpush.bf16.msrb.mxu3 %v2350_v57  ;;  %1266 = vmatmul.bf16.gmra.mxu0 %v3039_v34  ;;  %v371_v22 = vsel %vm363_vm1, %v369_v27, %v370_v23  ;;  %v446_v57 = vrot.slane %v2869_v36, 1  ;;  %v464_v27 = vrot.slane %v372_v30, 1 }
  0x4f   : > { %1533 = vmatpush.bf16.msra.mxu1 %v2373_v15  ;;  %1370 = vmatmul.bf16.vlgmr.msrb.gmra.mxu2 %v634_v5  ;;  %v373_v15 = vsel %vm363_vm1, %v370_v23, %v372_v30  ;;  %v462_v5 = vrot.slane %v2830_v54, 1  ;;  %v471_v23 = vrot.slane %v2725_v43, 1  ;;  %v3677_v54 = vunpack.c.h.bf16 %v2643_v7 }
  0x50   : > { %1590 = vmatpush.bf16.msra.mxu2 %v2381_v0  ;;  %1281 = vmatmul.bf16.gmra.mxu1 %v3043_v11  ;;  %v2388_v0 = vld [vmem:[%s3617_s1 + $0x1f0] sm:$0xff]  ;;  %v450_v1 = vrot.slane %v373_v15, 1  ;;  %v476_v43 = vrot.slane %v2692_v32, 1 }
  0x51   : > { %1704 = vmatpush.bf16.msra.mxu0 %v2397_v6  ;;  %1427 = vmatmul.bf16.vlgmr.msrb.gmra.mxu3 %v2910_v4  ;;  %v441_v6 = vrot.slane %v2718_v41, 1  ;;  %v447_v4 = vrot.slane %v2873_v37, 1  ;;  %v3676_v37 = vunpack.c.l.bf16 %v2643_v7 }
  0x52   : > { %1647 = vmatpush.bf16.msra.mxu3 %v2389_v17  ;;  %v449_v17 = vrot.slane %v371_v22, 1  ;;  %v465_v42 = vsel %vm312_vm0, %v450_v1, %v464_v27  ;;  %v3678_v22 = vunpack.c.l.bf16 %v2646_v8  ;;  %v477_v7 = vsel %vm312_vm0, %v471_v23, %v476_v43 }
  0x53   : > { %1534 = vmatpush.bf16.msra.mxu1 %v2372_v56  ;;  %v442_v39 = vsel %vm312_vm0, %v440_v18, %v441_v6  ;;  %v459_v29 = vsel %vm312_vm0, %v441_v6, %v458_v31  ;;  %v448_v41 = vsel %vm312_vm0, %v446_v57, %v447_v4  ;;  %v463_v36 = vsel %vm312_vm0, %v447_v4, %v462_v5 }
  0x54   : > { %1591 = vmatpush.bf16.msra.mxu2 %v2380_v61  ;;  %v379_v61 = vrot.slane %v3676_v37, 2  ;;  %v451_v30 = vsel %vm312_vm0, %v449_v17, %v450_v1  ;;  %v633_v56 = vpack.c.bf16 %v459_v29, %v442_v39  ;;  %v382_v15 = vrot.slane %v3678_v22, 2  ;;  %v2371_v37 = vld [vmem:[%s3617_s1 + $0x168] sm:$0xff] }
  0x55   : > { %1705 = vmatpush.bf16.msra.mxu0 %v2396_v58  ;;  %v636_v58 = vpack.c.bf16 %v463_v36, %v448_v41  ;;  %v3679_v18 = vunpack.c.l.bf16 %v2927_v44  ;;  %v3094_v6 = vpack.c.bf16 %v465_v42, %v451_v30  ;;  %v472_v57 = vsel %vm312_vm0, %v470_v3, %v471_v23  ;;  %v2379_v23 = vld [vmem:[%s3617_s1 + $0x1a8] sm:$0xff] }
  0x56   : > { %1648 = vmatpush.bf16.msra.mxu3 %v2388_v0  ;;  %v380_v0 = vrot.slane %v3677_v54, 2  ;;  %v3680_v4 = vunpack.c.h.bf16 %v2927_v44  ;;  %v3100_v17 = vpack.c.bf16 %v477_v7, %v472_v57  ;;  %v3681_v8 = vunpack.c.l.bf16 %v2934_v26  ;;  %v2387_v26 = vld [vmem:[%s3617_s1 + $0x1e8] sm:$0xff] }
  0x57   : > { %v374_v31 = vrot.slane %v3679_v18, 2  ;;  %v478_v41 = vrot.slane %v382_v15, 1  ;;  %1535 = vmatpush.bf16.msra.mxu1 %v2371_v37  ;;  %v452_v30 = vrot.slane %v3013_v12, 1  ;;  %v453_v42 = vrot.slane %v3017_v16, 1 }
  0x58   : > { %v375_v5 = vrot.slane %v3680_v4, 2  ;;  %v381_v32 = vsel %vm363_vm1, %v379_v61, %v380_v0  ;;  %v383_v1 = vsel %vm363_vm1, %v380_v0, %v382_v15  ;;  %v377_v27 = vrot.slane %v3681_v8, 2  ;;  %v2395_v61 = vld [vmem:[%s3617_s1 + $0x228] sm:$0xff]  ;;  %1592 = vmatpush.bf16.msra.mxu2 %v2379_v23 }
  0x59   : > { %v473_v39 = vrot.slane %v381_v32, 1  ;;  %v474_v29 = vrot.slane %v383_v1, 1  ;;  %v466_v43 = vrot.slane %v2984_v55, 1  ;;  %1706 = vmatpush.bf16.msra.mxu0 %v2395_v61  ;;  %v480_v18 = vrot.slane %v2876_v28, 1  ;;  %v2378_v61 = vld [vmem:[%s3617_s1 + $0x1a0] sm:$0xff] }
  0x5a   : > { %v376_v54 = vsel %vm363_vm1, %v374_v31, %v375_v5  ;;  %v378_v0 = vsel %vm363_vm1, %v375_v5, %v377_v27  ;;  %1649 = vmatpush.bf16.msra.mxu3 %v2387_v26  ;;  %v468_v15 = vrot.slane %v377_v27, 1  ;;  %v481_v57 = vrot.slane %v2880_v40, 1 }
  0x5b   : > { %v475_v3 = vsel %vm312_vm0, %v473_v39, %v474_v29  ;;  %v479_v44 = vsel %vm312_vm0, %v474_v29, %v478_v41  ;;  %v456_v22 = vrot.slane %v378_v0, 1  ;;  %v454_v31 = vsel %vm312_vm0, %v452_v30, %v453_v42 }
  0x5c   : > { %v3113_v36 = vpack.c.bf16 %v479_v44, %v475_v3  ;;  %v467_v7 = vsel %vm312_vm0, %v453_v42, %v466_v43  ;;  %v3682_v4 = vunpack.c.l.bf16 %v2777_v59  ;;  %v3683_v12 = vunpack.c.h.bf16 %v2777_v59  ;;  %1593 = vmatpush.bf16.msra.mxu2 %v2378_v61 }
  0x5d   : > { %v469_v32 = vsel %vm312_vm0, %v456_v22, %v468_v15  ;;  %v486_v1 = vrot.slane %v2838_v25, 1  ;;  %v3140_v8 = vpack.c.bf16 %v467_v7, %v454_v31  ;;  %v3684_v28 = vunpack.c.l.bf16 %v2780_v60 }
  0x5e   : > { %1484 = vmatmul.bf16.vlgmr.msrb.gmra.mxu0 %v636_v58  ;;  %v384_v5 = vrot.slane %v3682_v4, 2  ;;  %v385_v16 = vrot.slane %v3683_v12, 2  ;;  %v482_v39 = vsel %vm312_vm0, %v480_v18, %v481_v57  ;;  %v490_v0 = vrot.slane %v3020_v24, 1 }
  0x5f   : > { %1375 = vmatmul.bf16.gmra.mxu2 %v3094_v6  ;;  %v387_v40 = vrot.slane %v3684_v28, 2  ;;  %v487_v29 = vsel %vm312_vm0, %v481_v57, %v486_v1  ;;  %v491_v30 = vrot.slane %v3024_v33, 1  ;;  %v3685_v42 = vunpack.c.l.bf16 %v2937_v19 }
  0x60   : > { %1313 = vmatmul.bf16.vlgmr.msrb.gmra.mxu1 %v633_v56  ;;  %v455_v56 = vrot.slane %v376_v54, 1  ;;  %v3148_v41 = vpack.c.bf16 %v487_v29, %v482_v39  ;;  %v386_v59 = vsel %vm363_vm1, %v384_v5, %v385_v16  ;;  %v2370_v54 = vld [vmem:[%s3617_s1 + $0x160] sm:$0xff]  ;;  %v496_v15 = vrot.slane %v2992_v2, 1 }
  0x61   : > { %1432 = vmatmul.bf16.gmra.mxu3 %v3039_v34  ;;  %v388_v3 = vsel %vm363_vm1, %v385_v16, %v387_v40  ;;  %v483_v44 = vrot.slane %v386_v59, 1  ;;  %v488_v25 = vrot.slane %v387_v40, 1  ;;  %1536 = vmatpush.bf16.msra.mxu1 %v2370_v54  ;;  %v389_v43 = vrot.slane %v3685_v42, 2  ;;  %v2393_v42 = vld [vmem:[%s3617_s1 + $0x218] sm:$0xff] }
  0x62   : > { %v457_v55 = vsel %vm312_vm0, %v455_v56, %v456_v22  ;;  %v484_v23 = vrot.slane %v388_v3, 1  ;;  %v3686_v56 = vunpack.c.h.bf16 %v2937_v19  ;;  %v3687_v18 = vunpack.c.l.bf16 %v2940_v47  ;;  %v2394_v19 = vld [vmem:[%s3617_s1 + $0x220] sm:$0xff] }
  0x63   : > { %v3144_v27 = vpack.c.bf16 %v469_v32, %v457_v55  ;;  %v492_v31 = vsel %vm312_vm0, %v490_v0, %v491_v30  ;;  %v497_v7 = vsel %vm312_vm0, %v491_v30, %v496_v15  ;;  %1707 = vmatpush.bf16.msra.mxu0 %v2394_v19  ;;  %v2377_v32 = vld [vmem:[%s3617_s1 + $0x198] sm:$0xff]  ;;  %v500_v1 = vrot.slane %v2731_v45, 1 }
  0x64   : > { %v485_v60 = vsel %vm312_vm0, %v483_v44, %v484_v23  ;;  %v489_v26 = vsel %vm312_vm0, %v484_v23, %v488_v25  ;;  %v390_v22 = vrot.slane %v3686_v56, 2  ;;  %v392_v57 = vrot.slane %v3687_v18, 2  ;;  %1594 = vmatpush.bf16.msra.mxu2 %v2377_v32  ;;  %v2385_v45 = vld [vmem:[%s3617_s1 + $0x1d8] sm:$0xff]  ;;  %v2368_v32 = vld [vmem:[%s3617_s1 + $0x150] sm:$0xff] }
  0x65   : > { %v3157_v37 = vpack.c.bf16 %v489_v26, %v485_v60  ;;  %v3179_v4 = vpack.c.bf16 %v497_v7, %v492_v31  ;;  %v501_v28 = vrot.slane %v2735_v46, 1  ;;  %v3688_v40 = vunpack.c.l.bf16 %v2649_v9 }
  0x66   : > { %v391_v24 = vsel %vm363_vm1, %v389_v43, %v390_v22  ;;  %v393_v33 = vsel %vm363_vm1, %v390_v22, %v392_v57  ;;  %v498_v16 = vrot.slane %v392_v57, 1  ;;  %v3689_v29 = vunpack.c.h.bf16 %v2649_v9 }
  0x67   : > { %v493_v5 = vrot.slane %v391_v24, 1  ;;  %v494_v12 = vrot.slane %v393_v33, 1  ;;  %v394_v39 = vrot.slane %v3688_v40, 2  ;;  %v506_v3 = vrot.slane %v2700_v35, 1  ;;  %1708 = vmatpush.bf16.msra.mxu0 %v2393_v42  ;;  %v3295_v42 = vld [vmem:[%s3618_s2] ss:$0 sm:$0xff] }
  0x68   : > { %v395_v59 = vrot.slane %v3689_v29, 2  ;;  %v3690_v44 = vunpack.c.l.bf16 %v2652_v10  ;;  %v502_v25 = vsel %vm312_vm0, %v500_v1, %v501_v28  ;;  %v2369_v10 = vld [vmem:[%s3617_s1 + $0x158] sm:$0xff]  ;;  %v510_v43 = vrot.slane %v2886_v50, 1 }
  0x69   : > { %v495_v2 = vsel %vm312_vm0, %v493_v5, %v494_v12  ;;  %v499_v47 = vsel %vm312_vm0, %v494_v12, %v498_v16  ;;  %v507_v60 = vsel %vm312_vm0, %v501_v28, %v506_v3  ;;  %1537 = vmatpush.bf16.msra.mxu1 %v2369_v10  ;;  %v511_v56 = vrot.slane %v2890_v52, 1  ;;  %v2392_v28 = vld [vmem:[%s3617_s1 + $0x210] sm:$0xff] }
  0x6a   : > { %v3192_v55 = vpack.c.bf16 %v499_v47, %v495_v2  ;;  %v397_v23 = vrot.slane %v3690_v44, 2  ;;  %v3211_v46 = vpack.c.bf16 %v507_v60, %v502_v25  ;;  %v396_v26 = vsel %vm363_vm1, %v394_v39, %v395_v59  ;;  %v3697_v10 = vld [vmem:[#allocation9_spill] sm:$0xff] }
  0x6b   : > { %v503_v61 = vrot.slane %v396_v26, 1  ;;  %v3691_v22 = vunpack.c.l.bf16 %v2786_v62  ;;  %v3692_v18 = vunpack.c.h.bf16 %v2786_v62  ;;  %v516_v31 = vrot.slane %v2852_v21, 1  ;;  %v2376_v21 = vld [vmem:[%s3617_s1 + $0x190] sm:$0xff]  ;;  %1709 = vmatpush.bf16.msra.mxu0 %v2392_v28 }
  0x6c   : > { %v398_v9 = vsel %vm363_vm1, %v395_v59, %v397_v23  ;;  %v508_v35 = vrot.slane %v397_v23, 1  ;;  %v3693_v7 = vunpack.c.l.bf16 %v2789_v63  ;;  %v512_v33 = vsel %vm312_vm0, %v510_v43, %v511_v56  ;;  %v2384_v62 = vld [vmem:[%s3617_s1 + $0x1d0] sm:$0xff]  ;;  %1595 = vmatpush.bf16.msra.mxu2 %v2376_v21 }
  0x6d   : > { %v399_v15 = vrot.slane %v3691_v22, 2  ;;  %v400_v57 = vrot.slane %v3692_v18, 2  ;;  %v517_v5 = vsel %vm312_vm0, %v511_v56, %v516_v31  ;;  %1538 = vmatpush.bf16.msra.mxu1 %v2368_v32  ;;  %v520_v40 = vrot.slane %v2741_v48, 1  ;;  %v2383_v31 = vld [vmem:[%s3617_s1 + $0x1c8] sm:$0xff]  ;;  %v3705_v28 = vld [vmem:[#allocation5_spill] sm:$0xff] }
  0x6e   : > { %1489 = vmatmul.bf16.gmra.mxu0 %v3140_v8  ;;  %v402_v24 = vrot.slane %v3693_v7, 2  ;;  %v3240_v12 = vpack.c.bf16 %v517_v5, %v512_v33  ;;  %v521_v39 = vrot.slane %v2745_v49, 1  ;;  %v3694_v29 = vunpack.c.l.bf16 %v2657_v13  ;;  %v2367_v7 = vld [vmem:[%s3617_s1 + $0x148] sm:$0xff]  ;;  %v3699_v33 = vld [vmem:[#allocation7_spill] sm:$0xff] }
  0x6f   : > { %1380 = vmatmul.bf16.gmra.mxu2 %v3144_v27  ;;  %v401_v50 = vsel %vm363_vm1, %v399_v15, %v400_v57  ;;  %v3695_v3 = vunpack.c.h.bf16 %v2657_v13  ;;  %v526_v23 = vrot.slane %v2708_v38, 1  ;;  %v3696_v25 = vunpack.c.l.bf16 %v2660_v14  ;;  %v2375_v38 = vld [vmem:[%s3617_s1 + $0x188] sm:$0xff] }
  0x70   : > { %1318 = vmatmul.bf16.gmra.mxu1 %v636_v58  ;;  %v2386_v58 = vld [vmem:[%s3617_s1 + $0x1e0] sm:$0xff]  ;;  %v403_v52 = vsel %vm363_vm1, %v400_v57, %v402_v24  ;;  %v513_v16 = vrot.slane %v401_v50, 1  ;;  %v518_v2 = vrot.slane %v402_v24, 1  ;;  %v404_v59 = vrot.slane %v3694_v29, 2  ;;  %1596 = vmatpush.bf16.msra.mxu2 %v2375_v38  ;;  %v3700_v50 = vld [vmem:[#allocation8_spill] sm:$0xff] }
  0x71   : > { %1437 = vmatmul.bf16.gmra.mxu3 %v2751_v51  ;;  %v514_v19 = vrot.slane %v403_v52, 1  ;;  %v405_v44 = vrot.slane %v3695_v3, 2  ;;  %v407_v60 = vrot.slane %v3696_v25, 2  ;;  %v527_v48 = vsel %vm312_vm0, %v521_v39, %v526_v23  ;;  %1539 = vmatpush.bf16.msra.mxu1 %v2367_v7 }
  0x72   : > { %1650 = vmatpush.bf16.msra.mxu3 %v2386_v58  ;;  %v504_v58 = vrot.slane %v398_v9, 1  ;;  %v522_v9 = vsel %vm312_vm0, %v520_v40, %v521_v39  ;;  %v530_v5 = vrot.slane %v3699_v33, 1  ;;  %v531_v52 = vrot.slane %v3700_v50, 1 }
  0x73   : > { %v515_v63 = vsel %vm312_vm0, %v513_v16, %v514_v19  ;;  %v519_v47 = vsel %vm312_vm0, %v514_v19, %v518_v2  ;;  %v3279_v49 = vpack.c.bf16 %v527_v48, %v522_v9  ;;  %v408_v13 = vsel %vm363_vm1, %v405_v44, %v407_v60  ;;  %v3701_v16 = vld [vmem:[#allocation4_spill] sm:$0xff] }
  0x74   : > { %v505_v54 = vsel %vm312_vm0, %v503_v61, %v504_v58  ;;  %v509_v0 = vsel %vm312_vm0, %v504_v58, %v508_v35  ;;  %v3259_v1 = vpack.c.bf16 %v519_v47, %v515_v63  ;;  %v406_v61 = vsel %vm363_vm1, %v404_v59, %v405_v44  ;;  %v3704_v63 = vld [vmem:[#allocation6_spill] sm:$0xff] }
  0x75   : > { %v3224_v30 = vpack.c.bf16 %v509_v0, %v505_v54  ;;  %v523_v58 = vrot.slane %v406_v61, 1  ;;  %v528_v35 = vrot.slane %v407_v60, 1  ;;  %v524_v14 = vrot.slane %v408_v13, 1 }
  0x76   : > { %1651 = vmatpush.bf16.msra.mxu3 %v2385_v45  ;;  %v3702_v19 = vunpack.c.l.bf16 %v3701_v16  ;;  %v3703_v21 = vunpack.c.h.bf16 %v3701_v16  ;;  %v536_v47 = vrot.slane %v3704_v63, 1  ;;  %v3706_v40 = vunpack.c.l.bf16 %v3705_v28  ;;  %v2382_v16 = vld [vmem:[%s3617_s1 + $0x1c0] sm:$0xff] }
  0x77   : > { %v525_v54 = vsel %vm312_vm0, %v523_v58, %v524_v14  ;;  %v529_v0 = vsel %vm312_vm0, %v524_v14, %v528_v35  ;;  %v532_v44 = vsel %vm312_vm0, %v530_v5, %v531_v52  ;;  %v3708_v14 = vld [vmem:[#allocation3_spill] sm:$0xff] }
  0x78   : > { %v3297_v43 = vpack.c.bf16 %v529_v0, %v525_v54  ;;  %v409_v2 = vrot.slane %v3702_v19, 2  ;;  %v412_v39 = vrot.slane %v3706_v40, 2  ;;  %v537_v23 = vsel %vm312_vm0, %v531_v52, %v536_v47  ;;  %v2374_v52 = vld [vmem:[%s3617_s1 + $0x180] sm:$0xff]  ;;  %v3709_v40 = vld [vmem:[#allocation10_spill] sm:$0xff] }
  0x79   : > { %v3333_v60 = vpack.c.bf16 %v537_v23, %v532_v44  ;;  %v2366_v19 = vld [vmem:[%s3617_s1 + $0x140] sm:$0xff]  ;;  %1597 = vmatpush.bf16.msra.mxu2 %v2374_v52 }
  0x7a   : > { %1652 = vmatpush.bf16.msra.mxu3 %v2384_v62  ;;  %3698 = vst [vmem:[#allocation9_spill] sm:$0xff] %v3297_v43  ;;  %v410_v62 = vrot.slane %v3703_v21, 2  ;;  %v538_v58 = vrot.slane %v412_v39, 1  ;;  %1540 = vmatpush.bf16.msra.mxu1 %v2366_v19  ;;  %v3381_v28 = vld [vmem:[%s2631_s7 + $0x80] sm:$0x3] }
  0x7b   : > { %v3655_v23 = vunpack.c.l.bf16 %v3381_v28 }
  0x7c   : > { %v411_v9 = vsel %vm363_vm1, %v409_v2, %v410_v62  ;;  %v413_v61 = vsel %vm363_vm1, %v410_v62, %v412_v39 }
  0x7d   : > { %v533_v13 = vrot.slane %v411_v9, 1  ;;  %v534_v35 = vrot.slane %v413_v61, 1  ;;  %v2390_v9 = vld [vmem:[%s3617_s1 + $0x200] sm:$0xff] }
  0x7e   : > { %1494 = vmatmul.bf16.gmra.mxu0 %v3100_v17  ;;  %1653 = vmatpush.bf16.msra.mxu3 %v2383_v31 }
  0x7f   : > { %1385 = vmatmul.bf16.gmra.mxu2 %v3113_v36  ;;  %v535_v38 = vsel %vm312_vm0, %v533_v13, %v534_v35  ;;  %v539_v54 = vsel %vm312_vm0, %v534_v35, %v538_v58 }
  0x80   : > { %1323 = vmatmul.bf16.gmra.mxu1 %v3140_v8  ;;  %v3346_v0 = vpack.c.bf16 %v539_v54, %v535_v38 }
  0x81   : > { %1442 = vmatmul.bf16.gmra.mxu3 %v2914_v20 }
  0x82   : > { %1654 = vmatpush.bf16.msra.mxu3 %v2382_v16 }
  0x8e   : > { %1499 = vmatmul.bf16.gmra.mxu0 %v3148_v41 }
  0x8f   : > { %1390 = vmatmul.bf16.gmra.mxu2 %v3157_v37 }
  0x90   : > { %1328 = vmatmul.bf16.gmra.mxu1 %v3100_v17 }
  0x91   : > { %1447 = vmatmul.bf16.gmra.mxu3 %v3043_v11 }
  0x9e   : > { %1504 = vmatmul.bf16.gmra.mxu0 %v3179_v4 }
  0x9f   : > { %1395 = vmatmul.bf16.gmra.mxu2 %v3192_v55 }
  0xa0   : > { %1333 = vmatmul.bf16.gmra.mxu1 %v3148_v41 }
  0xa1   : > { %1452 = vmatmul.bf16.gmra.mxu3 %v2758_v53 }
  0xab   : > { %v3273_v45 = vpop.f32.mrf.mxu0  ;;  %v3275_v26 = vpop.f32.mrf.mxu1 }
  0xae   : > { %1509 = vmatmul.bf16.gmra.mxu0 %v3211_v46 }
  0xaf   : > { %1400 = vmatmul.bf16.gmra.mxu2 %v3224_v30 }
  0xb0   : > { %1338 = vmatmul.bf16.gmra.mxu1 %v3179_v4 }
  0xb1   : > { %1457 = vmatmul.bf16.gmra.mxu3 %v3697_v10 }
  0xb2   : > { %v1287_v56 = vpop.f32.mrf.mxu2 }
  0xb3   : > { %v3299_v22 = vpop.f32.mrf.mxu0  ;;  %v3301_v15 = vpop.f32.mrf.mxu1  ;;  %v3304_v18 = vadd.f32 %v3295_v42, %v1287_v56 }
  0xb4   : > { %v1297_v57 = vpop.f32.mrf.mxu3 }
  0xb5   : > { %v3313_v24 = vadd.f32 %v3295_v42, %v1297_v57  ;;  %v2391_v57 = vld [vmem:[%s3617_s1 + $0x208] sm:$0xff] }
  0xb6   : > { %1710 = vmatpush.bf16.msra.mxu0 %v2391_v57 }
  0xba   : > { %v1289_v32 = vpop.f32.mrf.mxu2  ;;  %1711 = vmatpush.bf16.msra.mxu0 %v2390_v9 }
  0xbb   : > { %v3324_v29 = vpop.f32.mrf.mxu0  ;;  %v3329_v3 = vadd.f32 %v3295_v42, %v1289_v32  ;;  %v3378_v32 = vld [vmem:[%s2631_s7 + $0x78] sm:$0xff]  }
  0xbc   : > { %v1299_v25 = vpop.f32.mrf.mxu3  ;;  %v3657_v39 = vunpack.c.l.bf16 %v3378_v32  ;;  %v3656_v44 = vunpack.c.h.bf16 %v3378_v32 }
  0xbd   : > { %v3326_v59 = vpop.f32.mrf.mxu1  ;;  %v3337_v48 = vadd.f32 %v3295_v42, %v1299_v25 }
  0xbe   : > { %1514 = vmatmul.bf16.gmra.mxu0 %v3240_v12  ;;  %v417_v38 = vrot.slane %v3657_v39, 1  ;;  %v418_v54 = vrot.slane %v3656_v44, 1 }
  0xbf   : > { %3707 = vst [vmem:[#allocation7_spill] sm:$0xff] %v3337_v48  ;;  %1405 = vmatmul.bf16.gmra.mxu2 %v3259_v1 }
  0xc0   : > { %1343 = vmatmul.bf16.gmra.mxu1 %v3211_v46  ;;  %v419_v57 = vsel %vm312_vm0, %v417_v38, %v418_v54 }
  0xc1   : > { %1462 = vmatmul.bf16.gmra.mxu3 %v3708_v14  ;;  %v540_v44 = vrot.slane %v419_v57, 1 }
  0xc2   : > { %v1292_v56 = vpop.f32.mrf.mxu2 }
  0xc3   : > { %v3351_v31 = vpop.f32.mrf.mxu0  ;;  %v3356_v33 = vadd.f32 %v3295_v42, %v1292_v56  ;;  %v420_v56 = vrot.slane %v3655_v23, 1 }
  0xc4   : > { %v1302_v5 = vpop.f32.mrf.mxu3 }
  0xc5   : > { %v3353_v7 = vpop.f32.mrf.mxu1  ;;  %v421_v5 = vsel %vm312_vm0, %v418_v54, %v420_v56 }
  0xc6   : > { %v3406_v9 = vpack.c.bf16 %v421_v5, %v419_v57  ;;  %v541_v39 = vrot.slane %v421_v5, 1 }
  0xc8   : > { %3710 = vst [vmem:[#allocation8_spill] sm:$0xff] %v3406_v9 }
  0xca   : > { %v1294_v50 = vpop.f32.mrf.mxu2 }
  0xcb   : > { %v3367_v2 = vpop.f32.mrf.mxu0  ;;  %v3370_v62 = vadd.f32 %v3295_v42, %v1294_v50  ;;  %v1258_v50 = vadd.f32 %v3295_v42, %v3273_v45  ;;  %v1260_v45 = vadd.f32 %v3295_v42, %v3299_v22 }
  0xcc   : > { %v1303_v47 = vpop.f32.mrf.mxu3 }
  0xcd   : > { %v1282_v21 = vpop.f32.mrf.mxu1 }
  0xce   : > { %v3373_v63 = vadd.f32 %v3295_v42, %v1282_v21  ;;  %1519 = vmatmul.bf16.gmra.mxu0 %v3279_v49 }
  0xcf   : > { %1410 = vmatmul.bf16.gmra.mxu2 %v3297_v43  ;;  %v542_v43 = vsel %vm312_vm0, %v540_v44, %v541_v39 }
  0xd0   : > { %1348 = vmatmul.bf16.gmra.mxu1 %v3240_v12 }
  0xd1   : > { %1467 = vmatmul.bf16.gmra.mxu3 %v3709_v40 }
  0xd2   : > { %v1371_v25 = vpop.f32.mrf.mxu2 }
  0xd3   : > { %v3391_v61 = vpop.f32.mrf.mxu0 }
  0xd4   : > { %v1428_v35 = vpop.f32.mrf.mxu3 }
  0xd5   : > { %v1284_v13 = vpop.f32.mrf.mxu1 }
  0xd6   : > { %v3394_v58 = vadd.f32 %v3295_v42, %v1284_v13 }
  0xda   : > { %v1373_v52 = vpop.f32.mrf.mxu2 }
  0xdb   : > { %v1485_v19 = vpop.f32.mrf.mxu0 }
  0xdc   : > { %v1430_v47 = vpop.f32.mrf.mxu3 }
  0xdd   : > { %v1314_v16 = vpop.f32.mrf.mxu1 }
  0xde   : > { %v1315_v21 = vadd.f32 %v1314_v16, %v1258_v50  ;;  %1524 = vmatmul.bf16.gmra.mxu0 %v3333_v60 }
  0xdf   : > { %1415 = vmatmul.bf16.gmra.mxu2 %v3346_v0 }
  0xe0   : > { %v1372_v13 = vadd.f32 %v1371_v25, %v1315_v21  ;;  %1353 = vmatmul.bf16.gmra.mxu1 %v3279_v49  ;;  %v546_v25 = vrot.slane %v420_v56, 1 }
  0xe1   : > { %1472 = vmatmul.bf16.gmra.mxu3 %v3406_v9  ;;  %v1263_v9 = vadd.f32 %v3295_v42, %v3324_v29  ;;  %v1265_v29 = vadd.f32 %v3295_v42, %v3351_v31 }
  0xe2   : > { %v1429_v38 = vadd.f32 %v1428_v35, %v1372_v13  ;;  %v1376_v23 = vpop.f32.mrf.mxu2  ;;  %v547_v35 = vsel %vm312_vm0, %v541_v39, %v546_v25 }
  0xe3   : > { %v1487_v16 = vpop.f32.mrf.mxu0 }
  0xe4   : > { %v3414_v54 = vadd.f32 %v1485_v19, %v1429_v38  ;;  %v1433_v48 = vpop.f32.mrf.mxu3  ;;  %v3422_v38 = vpack.c.bf16 %v547_v35, %v542_v43 }
  0xe5   : > { %v1316_v50 = vpop.f32.mrf.mxu1 }
  0xe6   : > { %3711 = vst [vmem:[#allocation4_spill] sm:$0xff] %v3414_v54  ;;  %v1317_v21 = vadd.f32 %v1316_v50, %v1260_v45  ;;  %v1268_v50 = vadd.f32 %v3295_v42, %v3367_v2  ;;  %v1270_v2 = vadd.f32 %v3295_v42, %v3391_v61 }
  0xe8   : > { %v1374_v40 = vadd.f32 %v1373_v52, %v1317_v21 }
  0xea   : > { %v1431_v13 = vadd.f32 %v1430_v47, %v1374_v40  ;;  %v1378_v19 = vpop.f32.mrf.mxu2 }
  0xeb   : > { %v1490_v57 = vpop.f32.mrf.mxu0 }
  0xec   : > { %v3420_v22 = vadd.f32 %v1487_v16, %v1431_v13  ;;  %v1435_v56 = vpop.f32.mrf.mxu3 }
  0xed   : > { %v1319_v54 = vpop.f32.mrf.mxu1 }
  0xee   : > { %v1320_v5 = vadd.f32 %v1319_v54, %v1263_v9  ;;  %1529 = vmatmul.bf16.gmra.mxu0 %v3422_v38 }
  0xef   : > { %1598 = vmatmul.bf16.vlgmr.msra.gmra.mxu2 %v3039_v34 }
  0xf0   : > { %v1377_v45 = vadd.f32 %v1376_v23, %v1320_v5  ;;  %1358 = vmatmul.bf16.gmra.mxu1 %v3333_v60 }
  0xf1   : > { %1655 = vmatmul.bf16.vlgmr.msra.gmra.mxu3 %v3140_v8 }
  0xf2   : > { %v1434_v40 = vadd.f32 %v1433_v48, %v1377_v45  ;;  %v1381_v43 = vpop.f32.mrf.mxu2 }
  0xf3   : > { %v1492_v52 = vpop.f32.mrf.mxu0 }
  0xf4   : > { %v3430_v39 = vadd.f32 %v1490_v57, %v1434_v40  ;;  %v1438_v9 = vpop.f32.mrf.mxu3 }
  0xf5   : > { %v1321_v44 = vpop.f32.mrf.mxu1 }
  0xf6   : > { %v1322_v47 = vadd.f32 %v1321_v44, %v1265_v29 }
  0xf8   : > { %v1379_v23 = vadd.f32 %v1378_v19, %v1322_v47 }
  0xfa   : > { %v1436_v54 = vadd.f32 %v1435_v56, %v1379_v23  ;;  %v1383_v34 = vpop.f32.mrf.mxu2 }
  0xfb   : > { %v1495_v8 = vpop.f32.mrf.mxu0 }
  0xfc   : > { %v3434_v16 = vadd.f32 %v1492_v52, %v1436_v54  ;;  %v1440_v21 = vpop.f32.mrf.mxu3 }
  0xfd   : > { %v1324_v48 = vpop.f32.mrf.mxu1 }
  0xfe   : > { %v1325_v25 = vadd.f32 %v1324_v48, %v1268_v50  ;;  %1712 = vmatmul.bf16.vlgmr.msra.gmra.mxu0 %v3144_v27 }
  0xff   : > { %1603 = vmatmul.bf16.gmra.mxu2 %v2751_v51 }
 0x100   : > { %v1382_v31 = vadd.f32 %v1381_v43, %v1325_v25  ;;  %1541 = vmatmul.bf16.vlgmr.msra.gmra.mxu1 %v3094_v6  ;;  %v1273_v6 = vadd.f32 %v3295_v42, %v3275_v26  ;;  %v1275_v26 = vadd.f32 %v3295_v42, %v3301_v15 }
 0x101   : > { %1660 = vmatmul.bf16.gmra.mxu3 %v3100_v17 }
 0x102   : > { %v1439_v35 = vadd.f32 %v1438_v9, %v1382_v31  ;;  %v1386_v19 = vpop.f32.mrf.mxu2 }
 0x103   : > { %v1497_v5 = vpop.f32.mrf.mxu0 }
 0x104   : > { %v3442_v13 = vadd.f32 %v1495_v8, %v1439_v35  ;;  %v1443_v45 = vpop.f32.mrf.mxu3 }
 0x105   : > { %v1326_v57 = vpop.f32.mrf.mxu1 }
 0x106   : > { %v1327_v56 = vadd.f32 %v1326_v57, %v1270_v2 }
 0x108   : > { %v1384_v40 = vadd.f32 %v1383_v34, %v1327_v56 }
 0x10a   : > { %v1441_v29 = vadd.f32 %v1440_v21, %v1384_v40  ;;  %v1388_v51 = vpop.f32.mrf.mxu2 }
 0x10b   : > { %v1500_v17 = vpop.f32.mrf.mxu0 }
 0x10c   : > { %v3446_v43 = vadd.f32 %v1497_v5, %v1441_v29  ;;  %v1445_v47 = vpop.f32.mrf.mxu3 }
 0x10d   : > { %v1329_v44 = vpop.f32.mrf.mxu1 }
 0x10e   : > { %v1330_v52 = vadd.f32 %v1329_v44, %v1273_v6  ;;  %1717 = vmatmul.bf16.gmra.mxu0 %v3113_v36 }
 0x10f   : > { %1608 = vmatmul.bf16.gmra.mxu2 %v2914_v20 }
 0x110   : > { %v1387_v61 = vadd.f32 %v1386_v19, %v1330_v52  ;;  %1546 = vmatmul.bf16.gmra.mxu1 %v3144_v27  ;;  %v1278_v27 = vadd.f32 %v3295_v42, %v3326_v59  ;;  %v1280_v59 = vadd.f32 %v3295_v42, %v3353_v7 }
 0x111   : > { %1665 = vmatmul.bf16.gmra.mxu3 %v3148_v41 }
 0x112   : > { %v1444_v9 = vadd.f32 %v1443_v45, %v1387_v61  ;;  %v1391_v54 = vpop.f32.mrf.mxu2 }
 0x113   : > { %v1502_v34 = vpop.f32.mrf.mxu0 }
 0x114   : > { %v3454_v23 = vadd.f32 %v1500_v17, %v1444_v9  ;;  %v1448_v8 = vpop.f32.mrf.mxu3 }
 0x115   : > { %v1331_v50 = vpop.f32.mrf.mxu1 }
 0x116   : > { %v1332_v48 = vadd.f32 %v1331_v50, %v1275_v26 }
 0x118   : > { %v1389_v25 = vadd.f32 %v1388_v51, %v1332_v48 }
 0x11a   : > { %v1446_v21 = vadd.f32 %v1445_v47, %v1389_v25  ;;  %v1393_v20 = vpop.f32.mrf.mxu2 }
 0x11b   : > { %v1505_v41 = vpop.f32.mrf.mxu0 }
 0x11c   : > { %v3458_v31 = vadd.f32 %v1502_v34, %v1446_v21  ;;  %v1450_v19 = vpop.f32.mrf.mxu3 }
 0x11d   : > { %v1334_v35 = vpop.f32.mrf.mxu1 }
 0x11e   : > { %v1335_v2 = vadd.f32 %v1334_v35, %v1278_v27  ;;  %1722 = vmatmul.bf16.gmra.mxu0 %v3157_v37 }
 0x11f   : > { %1613 = vmatmul.bf16.gmra.mxu2 %v3043_v11 }
 0x120   : > { %v1392_v15 = vadd.f32 %v1391_v54, %v1335_v2  ;;  %1551 = vmatmul.bf16.gmra.mxu1 %v3113_v36 }
 0x121   : > { %1670 = vmatmul.bf16.gmra.mxu3 %v3179_v4 }
 0x122   : > { %v1449_v57 = vadd.f32 %v1448_v8, %v1392_v15  ;;  %v1396_v56 = vpop.f32.mrf.mxu2 }
 0x123   : > { %v1507_v40 = vpop.f32.mrf.mxu0 }
 0x124   : > { %v3466_v5 = vadd.f32 %v1505_v41, %v1449_v57  ;;  %v1453_v6 = vpop.f32.mrf.mxu3 }
 0x125   : > { %v1336_v45 = vpop.f32.mrf.mxu1 }
 0x126   : > { %v1337_v29 = vadd.f32 %v1336_v45, %v1280_v59 }
 0x128   : > { %v1394_v51 = vadd.f32 %v1393_v20, %v1337_v29 }
 0x12a   : > { %v1451_v44 = vadd.f32 %v1450_v19, %v1394_v51  ;;  %v1398_v17 = vpop.f32.mrf.mxu2 }
 0x12b   : > { %v1510_v11 = vpop.f32.mrf.mxu0 }
 0x12c   : > { %v3468_v36 = vadd.f32 %v1507_v40, %v1451_v44  ;;  %v1455_v4 = vpop.f32.mrf.mxu3 }
 0x12d   : > { %v1339_v52 = vpop.f32.mrf.mxu1 }
 0x12e   : > { %v1340_v47 = vadd.f32 %v1339_v52, %v3373_v63  ;;  %1727 = vmatmul.bf16.gmra.mxu0 %v3192_v55 }
 0x12f   : > { %1618 = vmatmul.bf16.gmra.mxu2 %v2758_v53 }
 0x130   : > { %v1397_v61 = vadd.f32 %v1396_v56, %v1340_v47  ;;  %1556 = vmatmul.bf16.gmra.mxu1 %v3157_v37 }
 0x131   : > { %1675 = vmatmul.bf16.gmra.mxu3 %v3211_v46 }
 0x132   : > { %v1454_v42 = vadd.f32 %v1453_v6, %v1397_v61  ;;  %v1401_v9 = vpop.f32.mrf.mxu2 }
 0x133   : > { %v1512_v54 = vpop.f32.mrf.mxu0 }
 0x134   : > { %v3475_v7 = vadd.f32 %v1510_v11, %v1454_v42  ;;  %v1458_v34 = vpop.f32.mrf.mxu3 }
 0x135   : > { %v1341_v26 = vpop.f32.mrf.mxu1 }
 0x136   : > { %v1342_v50 = vadd.f32 %v1341_v26, %v3394_v58 }
 0x138   : > { %v1399_v63 = vadd.f32 %v1398_v17, %v1342_v50  ;;  %v3712_v17 = vunpack.c.l.bf16 %v3378_v32 }
 0x13a   : > { %v1456_v48 = vadd.f32 %v1455_v4, %v1399_v63  ;;  %v1403_v37 = vpop.f32.mrf.mxu2  ;;  %v422_v52 = vrot.slane %v3712_v17, 2 }
 0x13b   : > { %v1515_v21 = vpop.f32.mrf.mxu0 }
 0x13c   : > { %v3478_v8 = vadd.f32 %v1512_v54, %v1456_v48  ;;  %v1460_v27 = vpop.f32.mrf.mxu3 }
 0x13d   : > { %v1344_v25 = vpop.f32.mrf.mxu1 }
 0x13e   : > { %v1345_v53 = vadd.f32 %v1344_v25, %v3304_v18  ;;  %1732 = vmatmul.bf16.gmra.mxu0 %v3224_v30 }
 0x13f   : > { %1623 = vmatmul.bf16.gmra.mxu2 %v3697_v10 }
 0x140   : > { %v1402_v20 = vadd.f32 %v1401_v9, %v1345_v53  ;;  %1561 = vmatmul.bf16.gmra.mxu1 %v3192_v55 }
 0x141   : > { %1680 = vmatmul.bf16.gmra.mxu3 %v3240_v12 }
 0x142   : > { %v1459_v46 = vadd.f32 %v1458_v34, %v1402_v20  ;;  %v1406_v35 = vpop.f32.mrf.mxu2  ;;  %v3716_v20 = vld [vmem:[#allocation10_spill] sm:$0xff] }
 0x143   : > { %v1517_v2 = vpop.f32.mrf.mxu0 }
 0x144   : > { %v3485_v58 = vadd.f32 %v1515_v21, %v1459_v46  ;;  %v1463_v15 = vpop.f32.mrf.mxu3 }
 0x145   : > { %v1346_v41 = vpop.f32.mrf.mxu1 }
 0x146   : > { %v1347_v19 = vadd.f32 %v1346_v41, %v3329_v3 }
 0x148   : > { %v1404_v18 = vadd.f32 %v1403_v37, %v1347_v19  ;;  %v3717_v19 = vld [vmem:[#allocation7_spill] sm:$0xff] }
 0x14a   : > { %v1461_v57 = vadd.f32 %v1460_v27, %v1404_v18  ;;  %v1408_v55 = vpop.f32.mrf.mxu2  ;;  %v3715_v27 = vld [vmem:[#allocation9_spill] sm:$0xff] }
 0x14b   : > { %v1520_v45 = vpop.f32.mrf.mxu0 }
 0x14c   : > { %v3488_v59 = vadd.f32 %v1517_v2, %v1461_v57  ;;  %v1465_v40 = vpop.f32.mrf.mxu3 }
 0x14d   : > { %v1349_v56 = vpop.f32.mrf.mxu1 }
 0x14e   : > { %v1350_v10 = vadd.f32 %v1349_v56, %v3356_v33  ;;  %1737 = vmatmul.bf16.gmra.mxu0 %v3259_v1  ;;  %v3713_v33 = vunpack.c.h.bf16 %v3378_v32  ;;  %v245_v56 = vld [vmem:[%s2631_s7 + $0x8c] sm:$0x3] }
 0x14f   : > { %1628 = vmatmul.bf16.gmra.mxu2 %v3708_v14 }
 0x150   : > { %v1407_v29 = vadd.f32 %v1406_v35, %v1350_v10  ;;  %1566 = vmatmul.bf16.gmra.mxu1 %v3224_v30  ;;  %v423_v11 = vrot.slane %v3713_v33, 2  ;;  %v3714_v30 = vunpack.c.l.bf16 %v3381_v28  ;;  %v3718_v33 = vld [vmem:[#allocation8_spill] sm:$0xff] }
 0x151   : > { %1685 = vmatmul.bf16.gmra.mxu3 %v3279_v49 }
 0x152   : > { %v1464_v12 = vadd.f32 %v1463_v15, %v1407_v29  ;;  %v1411_v6 = vpop.f32.mrf.mxu2  ;;  %v425_v47 = vrot.slane %v3714_v30, 2  ;;  %v424_v49 = vsel %vm363_vm1, %v422_v52, %v423_v11 }
 0x153   : > { %v1522_v44 = vpop.f32.mrf.mxu0  ;;  %v543_v26 = vrot.slane %v424_v49, 1 }
 0x154   : > { %v3495_v3 = vadd.f32 %v1520_v45, %v1464_v12  ;;  %v1468_v14 = vpop.f32.mrf.mxu3  ;;  %v426_v9 = vsel %vm363_vm1, %v423_v11, %v425_v47  ;;  %v548_v50 = vrot.slane %v425_v47, 1  ;;  %v281_v12 = vunpack.c.l.bf16 %v245_v56 }
 0x155   : > { %v1351_v51 = vpop.f32.mrf.mxu1  ;;  %v544_v54 = vrot.slane %v426_v9, 1 }
 0x156   : > { %v1352_v4 = vadd.f32 %v1351_v51, %v3370_v62  ;;  %v433_v52 = vrot.slane %v281_v12, 1 }
 0x157   : > { %v545_v28 = vsel %vm312_vm0, %v543_v26, %v544_v54  ;;  %v549_v37 = vsel %vm312_vm0, %v544_v54, %v548_v50 }
 0x158   : > { %v1409_v61 = vadd.f32 %v1408_v55, %v1352_v4  ;;  %v3511_v21 = vpack.c.bf16 %v549_v37, %v545_v28  ;;  %v243_v55 = vld [vmem:[%s2631_s7 + $0x84] sm:$0xff]   ;;  %v556_v9 = vrot.slane %v433_v52, 1  ;;  %s1762_s7 = scalar_select %p1761_p7, 1, 0 }
 0x159   : > { %v280_v29 = vunpack.c.h.bf16 %v243_v55 }
 0x15a   : > { %v1466_v42 = vadd.f32 %v1465_v40, %v1409_v61  ;;  %v1413_v63 = vpop.f32.mrf.mxu2  ;;  %v279_v40 = vunpack.c.l.bf16 %v243_v55  ;;  %v2558_v55 = vmov -3.4028235e+38  }
 0x15b   : > { %v1525_v48 = vpop.f32.mrf.mxu0  ;;  %v431_v17 = vrot.slane %v280_v29, 1  ;;  %v436_v37 = vrot.slane %v280_v29, 2  ;;  %1799 = vst [vmem:[#allocation2] sm:$0x1] %v2558_v55 }
 0x15c   : > { %v3506_v34 = vadd.f32 %v1522_v44, %v1466_v42  ;;  %v1470_v25 = vpop.f32.mrf.mxu3  ;;  %v430_v44 = vrot.slane %v279_v40, 1  ;;  %v435_v28 = vrot.slane %v279_v40, 2  ;;  %1800 = vst [vmem:[#allocation2 + $0x18] sm:$0x1] %v2558_v55 }
 0x15d   : > { %v1354_v32 = vpop.f32.mrf.mxu1  ;;  %v434_v47 = vsel %vm312_vm0, %v431_v17, %v433_v52  ;;  %1801 = vst [vmem:[#allocation2 + $0x30] sm:$0x1] %v2558_v55 }
 0x15e   : > { %v1355_v62 = vadd.f32 %v1354_v32, %v3313_v24  ;;  %1742 = vmatmul.bf16.gmra.mxu0 %v3715_v27  ;;  %v432_v30 = vsel %vm312_vm0, %v430_v44, %v431_v17  ;;  %v551_v49 = vrot.slane %v434_v47, 1  ;;  %1802 = vst [vmem:[#allocation2 + $0x48] sm:$0x1] %v2558_v55  ;;  %v1763_v17 = vstv %s1762_s7 }
 0x15f   : > { %1633 = vmatmul.bf16.gmra.mxu2 %v3716_v20  ;;  %v550_v42 = vrot.slane %v432_v30, 1  ;;  %1803 = vst [vmem:[#allocation2 + $0x11] sm:$0x1] %v2558_v55  ;;  %vm3543_vm2 = vcmp.eq.s32.totalorder %v1763_v17, 1 }
 0x160   : > { %v1412_v53 = vadd.f32 %v1411_v6, %v1355_v62  ;;  %1571 = vmatmul.bf16.gmra.mxu1 %v3259_v1  ;;  %v557_v54 = vsel %vm312_vm0, %v551_v49, %v556_v9  ;;  %1804 = vst [vmem:[#allocation2 + $0x29] sm:$0x1] %v2558_v55 }
 0x161   : > { %1690 = vmatmul.bf16.gmra.mxu3 %v3333_v60  ;;  %v552_v26 = vsel %vm312_vm0, %v550_v42, %v551_v49  ;;  %1805 = vst [vmem:[#allocation2 + $0x41] sm:$0x1] %v2558_v55 }
 0x162   : > { %v1469_v46 = vadd.f32 %v1468_v14, %v1412_v53  ;;  %v1416_v41 = vpop.f32.mrf.mxu2  ;;  %v666_v62 = vpack.c.bf16 %v557_v54, %v552_v26  ;;  %v437_v53 = vsel %vm363_vm1, %v435_v28, %v436_v37  ;;  %1806 = vst [vmem:[#allocation2 + $0x59] sm:$0x1] %v2558_v55 }
 0x163   : > { %v1527_v24 = vpop.f32.mrf.mxu0 }
 0x164   : > { %v3517_v35 = vadd.f32 %v1525_v48, %v1469_v46  ;;  %v1473_v18 = vpop.f32.mrf.mxu3  ;;  %v665_v48 = vpack.c.bf16 %v434_v47, %v432_v30  ;;  %v3719_v46 = vld [vmem:[#allocation4_spill] sm:$0xff] }
 0x165   : > { %v1356_v2 = vpop.f32.mrf.mxu1 }
 0x166   : > { %v1357_v15 = vadd.f32 %v1356_v2, %v3717_v19  ;;  %v553_v19 = vrot.slane %v437_v53, 1 }
 0x168   : > { %v1414_v57 = vadd.f32 %v1413_v63, %v1357_v15 }
 0x16a   : > { %v1471_v45 = vadd.f32 %v1470_v25, %v1414_v57  ;;  %v1417_v10 = vpop.f32.mrf.mxu2  ;;  %v438_v25 = vrot.slane %v281_v12, 2 }
 0x16b   : > { %v1530_v60 = vpop.f32.mrf.mxu0 }
 0x16c   : > { %v3522_v1 = vadd.f32 %v1527_v24, %v1471_v45  ;;  %v1474_v51 = vpop.f32.mrf.mxu3  ;;  %v558_v18 = vrot.slane %v438_v25, 1 }
 0x16d   : > { %v1359_v6 = vpop.f32.mrf.mxu1 }
 0x16e   : > { %1747 = vmatmul.bf16.gmra.mxu0 %v3346_v0 }
 0x16f   : > { %1638 = vmatmul.bf16.gmra.mxu2 %v3718_v33 }
 0x170   : > { %1576 = vmatmul.bf16.gmra.mxu1 %v3715_v27  ;;  %v439_v27 = vsel %vm363_vm1, %v436_v37, %v438_v25 }
 0x171   : > { %1695 = vmatmul.bf16.gmra.mxu3 %v3422_v38  ;;  %v554_v15 = vrot.slane %v439_v27, 1 }
 0x172   : > { %v1599_v11 = vpop.f32.mrf.mxu2 }
 0x173   : > { %v1531_v14 = vpop.f32.mrf.mxu0  ;;  %v555_v56 = vsel %vm312_vm0, %v553_v19, %v554_v15  ;;  %v559_v45 = vsel %vm312_vm0, %v554_v15, %v558_v18 }
 0x174   : > { %v1656_v61 = vpop.f32.mrf.mxu3  ;;  %v667_v40 = vpack.c.bf16 %v559_v45, %v555_v56 }
 0x175   : > { %v1360_v4 = vpop.f32.mrf.mxu1 }
 0x17a   : > { %v1601_v50 = vpop.f32.mrf.mxu2 }
 0x17b   : > { %v1713_v32 = vpop.f32.mrf.mxu0 }
 0x17c   : > { %v1658_v38 = vpop.f32.mrf.mxu3 }
 0x17d   : > { %v1542_v63 = vpop.f32.mrf.mxu1 }
 0x17e   : > { %1752 = vmatmul.bf16.gmra.mxu0 %v3511_v21  ;;  %v1543_v41 = vadd.f32 %v1542_v63, %v3719_v46 }
 0x17f   : > { %1643 = vmatmul.bf16.gmra.mxu2 %v665_v48 }
 0x180   : > { %1581 = vmatmul.bf16.gmra.mxu1 %v3346_v0  ;;  %v1600_v0 = vadd.f32 %v1599_v11, %v1543_v41 }
 0x181   : > { %1700 = vmatmul.bf16.gmra.mxu3 %v666_v62 }
 0x182   : > { %v1604_v20 = vpop.f32.mrf.mxu2  ;;  %v1657_v29 = vadd.f32 %v1656_v61, %v1600_v0 }
 0x183   : > { %v1715_v24 = vpop.f32.mrf.mxu0 }
 0x184   : > { %v1661_v57 = vpop.f32.mrf.mxu3  ;;  %v1714_v33 = vadd.f32 %v1713_v32, %v1657_v29 }
 0x185   : > { %v1544_v2 = vpop.f32.mrf.mxu1 }
 0x186   : > { %v1545_v12 = vadd.f32 %v1544_v2, %v3420_v22  ;;  %v1765_v14 = vsel %vm3543_vm2, -3.4028235e+38, %v1714_v33 }
 0x188   : > { %v1602_v11 = vadd.f32 %v1601_v50, %v1545_v12 }
 0x18a   : > { %v1606_v10 = vpop.f32.mrf.mxu2 }
 0x18b   : > { %v1718_v60 = vpop.f32.mrf.mxu0 }
 0x18c   : > { %v1663_v44 = vpop.f32.mrf.mxu3 }
 0x18d   : > { %v1547_v6 = vpop.f32.mrf.mxu1 }
 0x18e   : > { %v1548_v51 = vadd.f32 %v1547_v6, %v3430_v39  ;;  %1757 = vmatmul.bf16.gmra.mxu0 %v667_v40  ;;  %v1659_v39 = vadd.f32 %v1658_v38, %v1602_v11 }
 0x190   : > { %v1605_v52 = vadd.f32 %v1604_v20, %v1548_v51  ;;  %1586 = vmatmul.bf16.gmra.mxu1 %v3511_v21  ;;  %v1716_v54 = vadd.f32 %v1715_v24, %v1659_v39 }
 0x192   : > { %v1662_v47 = vadd.f32 %v1661_v57, %v1605_v52  ;;  %v1609_v4 = vpop.f32.mrf.mxu2  ;;  %v1766_v48 = vsel %vm3543_vm2, -3.4028235e+38, %v1716_v54 }
 0x193   : > { %v1720_v42 = vpop.f32.mrf.mxu0 }
 0x194   : > { %v1719_v22 = vadd.f32 %v1718_v60, %v1662_v47  ;;  %v1666_v21 = vpop.f32.mrf.mxu3 }
 0x195   : > { %v1549_v61 = vpop.f32.mrf.mxu1 }
 0x196   : > { %v1783_v49 = vmax.f32 %v1765_v14, %v1719_v22  ;;  %v1550_v9 = vadd.f32 %v1549_v61, %v3434_v16 }
 0x198   : > { %v1607_v26 = vadd.f32 %v1606_v10, %v1550_v9 }
 0x19a   : > { %v1664_v50 = vadd.f32 %v1663_v44, %v1607_v26  ;;  %v1611_v32 = vpop.f32.mrf.mxu2 }
 0x19b   : > { %v1723_v37 = vpop.f32.mrf.mxu0 }
 0x19c   : > { %v1721_v63 = vadd.f32 %v1720_v42, %v1664_v50  ;;  %v1668_v25 = vpop.f32.mrf.mxu3 }
 0x19d   : > { %v1552_v28 = vpop.f32.mrf.mxu1 }
 0x19e   : > { %v1784_v62 = vmax.f32 %v1766_v48, %v1721_v63  ;;  %v1553_v38 = vadd.f32 %v1552_v28, %v3442_v13 }
 0x1a0   : > { %v1610_v53 = vadd.f32 %v1609_v4, %v1553_v38 }
 0x1a2   : > { %v1667_v27 = vadd.f32 %v1666_v21, %v1610_v53  ;;  %v1614_v16 = vpop.f32.mrf.mxu2 }
 0x1a3   : > { %v1725_v41 = vpop.f32.mrf.mxu0 }
 0x1a4   : > { %v3553_v20 = vadd.f32 %v1723_v37, %v1667_v27  ;;  %v1671_v19 = vpop.f32.mrf.mxu3 }
 0x1a5   : > { %v1554_v46 = vpop.f32.mrf.mxu1 }
 0x1a6   : > { %v1791_v2 = vmax.f32 %v1783_v49, %v3553_v20  ;;  %v1555_v24 = vadd.f32 %v1554_v46, %v3446_v43 }
 0x1a8   : > { %1807 = vst [vmem:[#allocation2 + $0x1] sm:$0xff] %v1791_v2  ;;  %v1612_v15 = vadd.f32 %v1611_v32, %v1555_v24 }
 0x1aa   : > { %v1669_v18 = vadd.f32 %v1668_v25, %v1612_v15  ;;  %v1616_v13 = vpop.f32.mrf.mxu2 }
 0x1ab   : > { %v1728_v0 = vpop.f32.mrf.mxu0 }
 0x1ac   : > { %v3558_v57 = vadd.f32 %v1725_v41, %v1669_v18  ;;  %v1673_v10 = vpop.f32.mrf.mxu3 }
 0x1ad   : > { %v1557_v55 = vpop.f32.mrf.mxu1 }
 0x1ae   : > { %v1792_v56 = vmax.f32 %v1784_v62, %v3558_v57  ;;  %v1558_v45 = vadd.f32 %v1557_v55, %v3454_v23 }
 0x1af   : > { %v1815_v29 = vld [vmem:[#allocation2] sm:$0xff] }
 0x1b0   : > { %1808 = vst [vmem:[#allocation2 + $0x9] sm:$0xff] %v1792_v56  ;;  %v1615_v40 = vadd.f32 %v1614_v16, %v1558_v45  ;;  %v1839_v33 = vrot.slane %v1815_v29, 1  ;;  %v1875_v39 = vrot.slane %v1815_v29, 2 }
 0x1b2   : > { %v1672_v43 = vadd.f32 %v1671_v19, %v1615_v40  ;;  %v1619_v6 = vpop.f32.mrf.mxu2 }
 0x1b3   : > { %v1730_v51 = vpop.f32.mrf.mxu0 }
 0x1b4   : > { %v1729_v12 = vadd.f32 %v1728_v0, %v1672_v43  ;;  %v1676_v52 = vpop.f32.mrf.mxu3 }
 0x1b5   : > { %v1559_v60 = vpop.f32.mrf.mxu1 }
 0x1b6   : > { %v1785_v44 = vmax.f32 %v3553_v20, %v1729_v12  ;;  %v1560_v17 = vadd.f32 %v1559_v60, %v3458_v31 }
 0x1b7   : > { %v1816_v11 = vld [vmem:[#allocation2 + $0x8] sm:$0xff]  ;;  %v1817_v23 = vld [vmem:[#allocation2 + $0x10] sm:$0x3] }
 0x1b8   : > { %v1840_v30 = vrot.slane %v1816_v11, 1  ;;  %v1842_v47 = vrot.slane %v1817_v23, 1  ;;  %v1876_v22 = vrot.slane %v1816_v11, 2  ;;  %v1878_v4 = vrot.slane %v1817_v23, 2 }
 0x1b9   : > { %v1617_v14 = vadd.f32 %v1616_v13, %v1560_v17 }
 0x1ba   : > { %v1841_v61 = vsel %vm312_vm0, %v1839_v33, %v1840_v30  ;;  %v1843_v42 = vsel %vm312_vm0, %v1840_v30, %v1842_v47  ;;  %v1877_v31 = vsel %vm363_vm1, %v1875_v39, %v1876_v22  ;;  %v1879_v26 = vsel %vm363_vm1, %v1876_v22, %v1878_v4  ;;  %v1621_v54 = vpop.f32.mrf.mxu2 }
 0x1bb   : > { %v1867_v49 = vmax.f32 %v1815_v29, %v1841_v61  ;;  %v1868_v9 = vmax.f32 %v1816_v11, %v1843_v42  ;;  %v1674_v21 = vadd.f32 %v1673_v10, %v1617_v14  ;;  %v1733_v28 = vpop.f32.mrf.mxu0 }
 0x1bc   : > { %v1678_v62 = vpop.f32.mrf.mxu3 }
 0x1bd   : > { %v1903_v50 = vmax.f32 %v1867_v49, %v1877_v31  ;;  %v1904_v63 = vmax.f32 %v1868_v9, %v1879_v26  ;;  %v1731_v32 = vadd.f32 %v1730_v51, %v1674_v21  ;;  %v1562_v48 = vpop.f32.mrf.mxu1 }
 0x1be   : > { %v1563_v37 = vadd.f32 %v1562_v48, %v3466_v5 }
 0x1bf   : > { %v2425_v38 = vpack.c.bf16 %v1904_v63, %v1903_v50  ;;  %v1786_v25 = vmax.f32 %v3558_v57, %v1731_v32 }
 0x1c0   : > { %v1620_v53 = vadd.f32 %v1619_v6, %v1563_v37 }
 0x1c1   : > { %2426 = vst [vmem:[%s3572_s25] sm:$0xff] %v2425_v38  }
 0x1c2   : > { %v1677_v27 = vadd.f32 %v1676_v52, %v1620_v53  ;;  %v1624_v16 = vpop.f32.mrf.mxu2 }
 0x1c3   : > { %v1735_v41 = vpop.f32.mrf.mxu0 }
 0x1c4   : > { %v1734_v20 = vadd.f32 %v1733_v28, %v1677_v27  ;;  %v1681_v19 = vpop.f32.mrf.mxu3 }
 0x1c5   : > { %v1564_v46 = vpop.f32.mrf.mxu1 }
 0x1c6   : > { %v1793_v2 = vmax.f32 %v1785_v44, %v1734_v20  ;;  %v1565_v24 = vadd.f32 %v1564_v46, %v3468_v36 }
 0x1c8   : > { %1809 = vst [vmem:[#allocation2 + $0x19] sm:$0xff] %v1793_v2  ;;  %v1622_v15 = vadd.f32 %v1621_v54, %v1565_v24 }
 0x1ca   : > { %v1679_v18 = vadd.f32 %v1678_v62, %v1622_v15  ;;  %v1626_v5 = vpop.f32.mrf.mxu2 }
 0x1cb   : > { %v1738_v0 = vpop.f32.mrf.mxu0 }
 0x1cc   : > { %v1736_v13 = vadd.f32 %v1735_v41, %v1679_v18  ;;  %v1683_v45 = vpop.f32.mrf.mxu3 }
 0x1cd   : > { %v1567_v55 = vpop.f32.mrf.mxu1 }
 0x1ce   : > { %v1794_v56 = vmax.f32 %v1786_v25, %v1736_v13  ;;  %v1568_v57 = vadd.f32 %v1567_v55, %v3475_v7 }
 0x1cf   : > { %v1818_v43 = vld [vmem:[#allocation2 + $0x18] sm:$0xff] }
 0x1d0   : > { %1810 = vst [vmem:[#allocation2 + $0x21] sm:$0xff] %v1794_v56  ;;  %v1625_v10 = vadd.f32 %v1624_v16, %v1568_v57  ;;  %v1844_v17 = vrot.slane %v1818_v43, 1  ;;  %v1880_v22 = vrot.slane %v1818_v43, 2 }
 0x1d2   : > { %v1682_v40 = vadd.f32 %v1681_v19, %v1625_v10  ;;  %v1629_v12 = vpop.f32.mrf.mxu2 }
 0x1d3   : > { %v1740_v36 = vpop.f32.mrf.mxu0 }
 0x1d4   : > { %v1739_v29 = vadd.f32 %v1738_v0, %v1682_v40  ;;  %v1686_v44 = vpop.f32.mrf.mxu3 }
 0x1d5   : > { %v1569_v6 = vpop.f32.mrf.mxu1 }
 0x1d6   : > { %v1787_v60 = vmax.f32 %v1734_v20, %v1739_v29  ;;  %v1570_v51 = vadd.f32 %v1569_v6, %v3478_v8 }
 0x1d7   : > { %v1819_v52 = vld [vmem:[#allocation2 + $0x20] sm:$0xff]  ;;  %v1820_v33 = vld [vmem:[#allocation2 + $0x28] sm:$0x3] }
 0x1d8   : > { %v1845_v11 = vrot.slane %v1819_v52, 1  ;;  %v1847_v23 = vrot.slane %v1820_v33, 1  ;;  %v1881_v30 = vrot.slane %v1819_v52, 2  ;;  %v1883_v7 = vrot.slane %v1820_v33, 2 }
 0x1d9   : > { %v1627_v47 = vadd.f32 %v1626_v5, %v1570_v51 }
 0x1da   : > { %v1846_v4 = vsel %vm312_vm0, %v1844_v17, %v1845_v11  ;;  %v1848_v14 = vsel %vm312_vm0, %v1845_v11, %v1847_v23  ;;  %v1882_v8 = vsel %vm363_vm1, %v1880_v22, %v1881_v30  ;;  %v1884_v49 = vsel %vm363_vm1, %v1881_v30, %v1883_v7  ;;  %v1631_v9 = vpop.f32.mrf.mxu2 }
 0x1db   : > { %v1869_v39 = vmax.f32 %v1818_v43, %v1846_v4  ;;  %v1870_v61 = vmax.f32 %v1819_v52, %v1848_v14  ;;  %v1684_v42 = vadd.f32 %v1683_v45, %v1627_v47  ;;  %v1743_v50 = vpop.f32.mrf.mxu0 }
 0x1dc   : > { %v1688_v32 = vpop.f32.mrf.mxu3 }
 0x1dd   : > { %v1905_v21 = vmax.f32 %v1869_v39, %v1882_v8  ;;  %v1906_v31 = vmax.f32 %v1870_v61, %v1884_v49  ;;  %v1741_v26 = vadd.f32 %v1740_v36, %v1684_v42  ;;  %v1572_v54 = vpop.f32.mrf.mxu1 }
 0x1de   : > { %v1573_v63 = vadd.f32 %v1572_v54, %v3485_v58 }
 0x1df   : > { %v2430_v48 = vpack.c.bf16 %v1906_v31, %v1905_v21  ;;  %v1788_v28 = vmax.f32 %v1736_v13, %v1741_v26 }
 0x1e0   : > { %v1630_v37 = vadd.f32 %v1629_v12, %v1573_v63 }
 0x1e1   : > { %2447 = vst [vmem:[%s3572_s25 + $0x8] sm:$0xff] %v2430_v48  }
 0x1e2   : > { %v1687_v62 = vadd.f32 %v1686_v44, %v1630_v37  ;;  %v1634_v25 = vpop.f32.mrf.mxu2 }
 0x1e3   : > { %v1745_v27 = vpop.f32.mrf.mxu0 }
 0x1e4   : > { %v1744_v38 = vadd.f32 %v1743_v50, %v1687_v62  ;;  %v1691_v46 = vpop.f32.mrf.mxu3 }
 0x1e5   : > { %v1574_v53 = vpop.f32.mrf.mxu1 }
 0x1e6   : > { %v1795_v20 = vmax.f32 %v1787_v60, %v1744_v38  ;;  %v1575_v16 = vadd.f32 %v1574_v53, %v3488_v59 }
 0x1e8   : > { %1811 = vst [vmem:[#allocation2 + $0x31] sm:$0xff] %v1795_v20  ;;  %v1632_v41 = vadd.f32 %v1631_v9, %v1575_v16 }
 0x1ea   : > { %v1689_v2 = vadd.f32 %v1688_v32, %v1632_v41  ;;  %v1636_v19 = vpop.f32.mrf.mxu2 }
 0x1eb   : > { %v1748_v15 = vpop.f32.mrf.mxu0 }
 0x1ec   : > { %v1746_v24 = vadd.f32 %v1745_v27, %v1689_v2  ;;  %v1693_v5 = vpop.f32.mrf.mxu3 }
 0x1ed   : > { %v1577_v58 = vpop.f32.mrf.mxu1 }
 0x1ee   : > { %v1796_v18 = vmax.f32 %v1788_v28, %v1746_v24  ;;  %v1578_v13 = vadd.f32 %v1577_v58, %v3495_v3 }
 0x1ef   : > { %v1821_v56 = vld [vmem:[#allocation2 + $0x30] sm:$0xff] }
 0x1f0   : > { %1812 = vst [vmem:[#allocation2 + $0x39] sm:$0xff] %v1796_v18  ;;  %v1635_v55 = vadd.f32 %v1634_v25, %v1578_v13  ;;  %v1849_v12 = vrot.slane %v1821_v56, 1  ;;  %v1885_v52 = vrot.slane %v1821_v56, 2 }
 0x1f2   : > { %v1692_v0 = vadd.f32 %v1691_v46, %v1635_v55  ;;  %v1639_v45 = vpop.f32.mrf.mxu2 }
 0x1f3   : > { %v1750_v59 = vpop.f32.mrf.mxu0 }
 0x1f4   : > { %v1749_v57 = vadd.f32 %v1748_v15, %v1692_v0  ;;  %v1696_v29 = vpop.f32.mrf.mxu3 }
 0x1f5   : > { %v1579_v10 = vpop.f32.mrf.mxu1 }
 0x1f6   : > { %v1789_v40 = vmax.f32 %v1744_v38, %v1749_v57  ;;  %v1580_v43 = vadd.f32 %v1579_v10, %v3506_v34 }
 0x1f7   : > { %v1822_v6 = vld [vmem:[#allocation2 + $0x38] sm:$0xff]  ;;  %v1823_v36 = vld [vmem:[#allocation2 + $0x40] sm:$0x3] }
 0x1f8   : > { %v1850_v60 = vrot.slane %v1822_v6, 1  ;;  %v1852_v51 = vrot.slane %v1823_v36, 1  ;;  %v1886_v44 = vrot.slane %v1822_v6, 2  ;;  %v1888_v3 = vrot.slane %v1823_v36, 2 }
 0x1f9   : > { %v1637_v17 = vadd.f32 %v1636_v19, %v1580_v43 }
 0x1fa   : > { %v1851_v33 = vsel %vm312_vm0, %v1849_v12, %v1850_v60  ;;  %v1853_v11 = vsel %vm312_vm0, %v1850_v60, %v1852_v51  ;;  %v1887_v34 = vsel %vm363_vm1, %v1885_v52, %v1886_v44  ;;  %v1889_v47 = vsel %vm363_vm1, %v1886_v44, %v1888_v3  ;;  %v1641_v22 = vpop.f32.mrf.mxu2 }
 0x1fb   : > { %v1871_v23 = vmax.f32 %v1821_v56, %v1851_v33  ;;  %v1872_v30 = vmax.f32 %v1822_v6, %v1853_v11  ;;  %v1694_v7 = vadd.f32 %v1693_v5, %v1637_v17  ;;  %v1753_v42 = vpop.f32.mrf.mxu0 }
 0x1fc   : > { %v1698_v49 = vpop.f32.mrf.mxu3 }
 0x1fd   : > { %v1907_v4 = vmax.f32 %v1871_v23, %v1887_v34  ;;  %v1908_v14 = vmax.f32 %v1872_v30, %v1889_v47  ;;  %v1751_v39 = vadd.f32 %v1750_v59, %v1694_v7  ;;  %v1582_v61 = vpop.f32.mrf.mxu1 }
 0x1fe   : > { %v1583_v8 = vadd.f32 %v1582_v61, %v3517_v35 }
 0x1ff   : > { %v2435_v9 = vpack.c.bf16 %v1908_v14, %v1907_v4  ;;  %v1790_v21 = vmax.f32 %v1746_v24, %v1751_v39 }
 0x200   : > { %v1640_v31 = vadd.f32 %v1639_v45, %v1583_v8 }
 0x201   : > { %2448 = vst [vmem:[%s3572_s25 + $0x10] sm:$0xff] %v2435_v9  }
 0x202   : > { %v1697_v26 = vadd.f32 %v1696_v29, %v1640_v31  ;;  %v1644_v50 = vpop.f32.mrf.mxu2 }
 0x203   : > { %v1755_v32 = vpop.f32.mrf.mxu0 }
 0x204   : > { %v1754_v54 = vadd.f32 %v1753_v42, %v1697_v26  ;;  %v1701_v37 = vpop.f32.mrf.mxu3 }
 0x205   : > { %v1584_v63 = vpop.f32.mrf.mxu1 }
 0x206   : > { %v1797_v48 = vmax.f32 %v1789_v40, %v1754_v54  ;;  %v1585_v28 = vadd.f32 %v1584_v63, %v3522_v1 }
 0x208   : > { %1813 = vst [vmem:[#allocation2 + $0x49] sm:$0xff] %v1797_v48  ;;  %v1642_v62 = vadd.f32 %v1641_v22, %v1585_v28 }
 0x20a   : > { %v1699_v38 = vadd.f32 %v1698_v49, %v1642_v62  ;;  %v1645_v53 = vpop.f32.mrf.mxu2 }
 0x20b   : > { %v1758_v27 = vpop.f32.mrf.mxu0 }
 0x20c   : > { %v1756_v25 = vadd.f32 %v1755_v32, %v1699_v38  ;;  %v1702_v16 = vpop.f32.mrf.mxu3 }
 0x20d   : > { %v1587_v35 = vpop.f32.mrf.mxu1 }
 0x20e   : > { %v1798_v20 = vmax.f32 %v1790_v21, %v1756_v25 }
 0x20f   : > { %v1824_v46 = vld [vmem:[#allocation2 + $0x48] sm:$0xff] }
 0x210   : > { %1814 = vst [vmem:[#allocation2 + $0x51] sm:$0xff] %v1798_v20  ;;  %v1854_v24 = vrot.slane %v1824_v46, 1  ;;  %v1890_v5 = vrot.slane %v1824_v46, 2 }
 0x213   : > { %v1759_v2 = vpop.f32.mrf.mxu0 }
 0x215   : > { %v1588_v41 = vpop.f32.mrf.mxu1 }
 0x217   : > { %v1825_v19 = vld [vmem:[#allocation2 + $0x50] sm:$0xff]  ;;  %v1826_v58 = vld [vmem:[#allocation2 + $0x58] sm:$0x3] }
 0x218   : > { %v1855_v15 = vrot.slane %v1825_v19, 1  ;;  %v1857_v1 = vrot.slane %v1826_v58, 1  ;;  %v1891_v18 = vrot.slane %v1825_v19, 2  ;;  %v1893_v13 = vrot.slane %v1826_v58, 2 }
 0x21a   : > { %v1856_v55 = vsel %vm312_vm0, %v1854_v24, %v1855_v15  ;;  %v1858_v0 = vsel %vm312_vm0, %v1855_v15, %v1857_v1  ;;  %v1892_v45 = vsel %vm363_vm1, %v1890_v5, %v1891_v18  ;;  %v1894_v10 = vsel %vm363_vm1, %v1891_v18, %v1893_v13 }
 0x21b   : > { %v1873_v56 = vmax.f32 %v1824_v46, %v1856_v55  ;;  %v1874_v57 = vmax.f32 %v1825_v19, %v1858_v0 }
 0x21d   : > { %v1909_v59 = vmax.f32 %v1873_v56, %v1892_v45  ;;  %v1910_v40 = vmax.f32 %v1874_v57, %v1894_v10 }
 0x21f   : > { %v2440_v43 = vpack.c.bf16 %v1910_v40, %v1909_v59 }
 0x221   : > { %2449 = vst [vmem:[%s3572_s25 + $0x18] sm:$0xff] %v2440_v43  }
 0x222 PF: > { %s13_s16 = sadd.s32 1, %s2556_s16   ;;  %s3722_s12 = smov %s2548_s14 }
 0x223   : > { %p10_p9 = scmp.ge.s32.totalorder %s13_s16, 6   ;;  %s3723_s13 = smov %s2552_s15 }
 0x224   : > { %s3724_s14 = smov %s3727_s17  ;;  %s3725_s15 = smov %s3731_s18 }
 0x225   :  { %12 = sbr.rel (!%p10_p9) target bundleno = 3 (0x3), region = 62 }

// kernel: impala_down_stack.4
= control target key start
LH: loop header
LB: loop body
LE: loop exit
PB: predicated region body
PF: predicated region fallthrough
CT: control target
= control target key end

     0   :  { %s3526_s18 = smov 0   ;;  %s3528_s19 = smov 0   ;;  %s4761_s0 = inlined_call_operand.vmem [shape: bf16[2,1,12,12,128], index: 0, kind: input, shape index: {}]   ;;  %s4762_s1 = inlined_call_operand.vmem [shape: bf16[1152,128], index: 1, kind: input, shape index: {}]   ;;  %s4763_s2 = inlined_call_operand.vmem [shape: bf16[1152,128], index: 2, kind: input, shape index: {}]   ;;  %s4764_s3 = inlined_call_operand.vmem [shape: f32[1,128], index: 3, kind: input, shape index: {}]   ;;  %s4765_s4 = inlined_call_operand.vmem [shape: f32[1,128], index: 4, kind: input, shape index: {}]   ;;  %s4766_s5 = inlined_call_operand.vmem [shape: bf16[2,8,8,128], index: 5, kind: output, shape index: {}]  }
   0x1   :  { %s3530_s20 = smov 0  }
   0x2 LB: > { %s27_s21 = sadd.s32 1, %s3489_s19  ;;  %p2677_p0 = scmp.ge.s32.totalorder %s3493_s20, 1  ;;  %s3493_s20 = sphi %s3530_s20, %s15_s20   ;;  %s3489_s19 = sphi %s3528_s19, %s4801_s19   ;;  %s3485_s18 = sphi %s3526_s18, %s4800_s18  }
   0x3   : > { %p29_p1 = scmp.ge.s32.totalorder %s27_s21, 2  ;;  %p207_p2 = scmp.lt.s32.totalorder %s3493_s20, 3 }
   0x5   : > { %s4803_s21 = smov (%p29_p1, %s27_s21), 0  ;;  %p208_p3 = pnand %p2677_p0, %p207_p2 }
   0x6   : > { %p243_p4 = scmp.lt.s32.totalorder (!%p208_p3), %s3485_s18, 1 }
   0x7   : > { %211 = sbr.rel (%p208_p3) target bundleno = 681 (0x2a9), region = 40 }
   0xc   : > { %v3267_v0 = vld [vmem:[%s4762_s1 + $0x38] sm:$0xff]  ;;  %v3266_v4 = vld [vmem:[%s4762_s1 + $0x30] sm:$0xff]  ;;  %s4805_s18 = smov (!%p243_p4, %s3485_s18), 1  ;;  %v3265_v8 = vld [vmem:[%s4762_s1 + $0x28] sm:$0xff]  ;;  %vm354_vm0 = vcmask 1046528   ;;  %vm385_vm1 = vcmask 1045504  }
   0xd   : > { %v3283_v1 = vld [vmem:[%s4762_s1 + $0xb8] sm:$0xff]  ;;  %1153 = vmatpush.bf16.msra.mxu0 %v3267_v0  ;;  %v3282_v5 = vld [vmem:[%s4762_s1 + $0xb0] sm:$0xff]  ;;  %s3443_s13 = smul.u32 96, %s4805_s18  ;;  %v3281_v9 = vld [vmem:[%s4762_s1 + $0xa8] sm:$0xff]  ;;  %s3259_s29 = sshll.u32 %s4805_s18, 5 }
   0xe   : > { %v3275_v2 = vld [vmem:[%s4762_s1 + $0x78] sm:$0xff]  ;;  %1221 = vmatpush.bf16.msra.mxu2 %v3283_v1  ;;  %v3274_v6 = vld [vmem:[%s4762_s1 + $0x70] sm:$0xff]  ;;  %v3273_v10 = vld [vmem:[%s4762_s1 + $0x68] sm:$0xff]  ;;  %s4704_s7 = scalar_lea.vmem %s4766_s5, %s3259_s29 }
   0xf   : > { %v3291_v3 = vld [vmem:[%s4762_s1 + $0xf8] sm:$0xff]  ;;  %1187 = vmatpush.bf16.msra.mxu1 %v3275_v2  ;;  %v3290_v7 = vld [vmem:[%s4762_s1 + $0xf0] sm:$0xff]  ;;  %v3289_v11 = vld [vmem:[%s4762_s1 + $0xe8] sm:$0xff]  ;;  %s3586_s28 = scalar_lea.vmem %s4761_s0, %s3443_s13 }
  0x10   : > { %1255 = vmatpush.bf16.msra.mxu3 %v3291_v3  ;;  %v3264_v12 = vld [vmem:[%s4762_s1 + $0x20] sm:$0xff]  ;;  %v264_v18 = vld [vmem:[%s3586_s28 + $0x8] sm:$0xf]  ;;  %v265_v19 = vld [vmem:[%s3586_s28 + $0xc] sm:$0x3] }
  0x11   : > { %1154 = vmatpush.bf16.msra.mxu0 %v3266_v4  ;;  %v3280_v13 = vld [vmem:[%s4762_s1 + $0xa0] sm:$0xff]  ;;  %v288_v22 = vunpack.c.l.bf16 %v264_v18  ;;  %v289_v23 = vunpack.c.l.bf16 %v265_v19  ;;  %v3605_v24 = vld [vmem:[%s3586_s28 + $0x10] sm:$0xf]  ;;  %v3608_v25 = vld [vmem:[%s3586_s28 + $0x14] sm:$0x3] }
  0x12   : > { %1222 = vmatpush.bf16.msra.mxu2 %v3282_v5  ;;  %v3272_v14 = vld [vmem:[%s4762_s1 + $0x60] sm:$0xff]  ;;  %v4782_v27 = vunpack.c.l.bf16 %v3605_v24  ;;  %v4781_v28 = vunpack.c.l.bf16 %v3608_v25  ;;  %v3263_v29 = vld [vmem:[%s4762_s1 + $0x18] sm:$0xff]  ;;  %v3262_v46 = vld [vmem:[%s4762_s1 + $0x10] sm:$0xff] }
  0x13   : > { %1188 = vmatpush.bf16.msra.mxu1 %v3274_v6  ;;  %v3288_v15 = vld [vmem:[%s4762_s1 + $0xe0] sm:$0xff]  ;;  %v3279_v30 = vld [vmem:[%s4762_s1 + $0x98] sm:$0xff]  ;;  %v312_v32 = vmax.f32 %v288_v22, 0.0  ;;  %v313_v33 = vmax.f32 %v289_v23, 0.0  ;;  %v3278_v47 = vld [vmem:[%s4762_s1 + $0x90] sm:$0xff] }
  0x14   : > { %1256 = vmatpush.bf16.msra.mxu3 %v3290_v7  ;;  %v262_v16 = vld [vmem:[%s3586_s28] sm:$0xf]  ;;  %v263_v17 = vld [vmem:[%s3586_s28 + $0x4] sm:$0x3]  ;;  %v3271_v34 = vld [vmem:[%s4762_s1 + $0x58] sm:$0xff]  ;;  %v314_v44 = vmax.f32 %v4782_v27, 0.0 }
  0x15   : > { %1155 = vmatpush.bf16.msra.mxu0 %v3265_v8  ;;  %v286_v20 = vunpack.c.l.bf16 %v262_v16  ;;  %v287_v21 = vunpack.c.l.bf16 %v263_v17  ;;  %v3287_v35 = vld [vmem:[%s4762_s1 + $0xd8] sm:$0xff]  ;;  %v358_v39 = vrot.slane %v312_v32, 1  ;;  %v359_v40 = vrot.slane %v313_v33, 1  ;;  %v3270_v49 = vld [vmem:[%s4762_s1 + $0x50] sm:$0xff]  ;;  %v3261_v60 = vld [vmem:[%s4762_s1 + $0x8] sm:$0xff] }
  0x16   : > { %1223 = vmatpush.bf16.msra.mxu2 %v3281_v9  ;;  %v389_v42 = vrot.slane %v312_v32, 2  ;;  %v390_v43 = vrot.slane %v313_v33, 2  ;;  %v3628_v45 = vmax.f32 %v4781_v28, 0.0  ;;  %v3637_v48 = vld [vmem:[%s3586_s28 + $0x18] sm:$0xf]  ;;  %v3286_v50 = vld [vmem:[%s4762_s1 + $0xd0] sm:$0xff] }
  0x17   : > { %1189 = vmatpush.bf16.msra.mxu1 %v3273_v10  ;;  %v310_v26 = vmax.f32 %v286_v20, 0.0  ;;  %v311_v31 = vmax.f32 %v287_v21, 0.0  ;;  %v3651_v54 = vsel %vm354_vm0, %v358_v39, %v359_v40  ;;  %v3654_v55 = vld [vmem:[%s3586_s28 + $0x1c] sm:$0x3]  ;;  %v361_v57 = vrot.slane %v314_v44, 1  ;;  %v3277_v61 = vld [vmem:[%s4762_s1 + $0x88] sm:$0xff] }
  0x18   : > { %1257 = vmatpush.bf16.msra.mxu3 %v3289_v11  ;;  %v391_v53 = vsel %vm385_vm1, %v389_v42, %v390_v43  ;;  %v362_v58 = vrot.slane %v3628_v45, 1  ;;  %v4780_v59 = vunpack.c.l.bf16 %v3637_v48  ;;  %v442_v1 = vrot.slane %v390_v43, 1  ;;  %v3269_v2 = vld [vmem:[%s4762_s1 + $0x48] sm:$0xff]  ;;  %v3268_v18 = vld [vmem:[%s4762_s1 + $0x40] sm:$0xff]  ;;  %v3298_v43 = vld [vmem:[%s4762_s1 + $0x130] sm:$0xff] }
  0x19   : > { %1156 = vmatpush.bf16.msra.mxu0 %v3264_v12  ;;  %v355_v36 = vrot.slane %v310_v26, 1  ;;  %v386_v37 = vrot.slane %v310_v26, 2  ;;  %v356_v38 = vrot.slane %v311_v31, 1  ;;  %v387_v41 = vrot.slane %v311_v31, 2  ;;  %v3285_v3 = vld [vmem:[%s4762_s1 + $0xc8] sm:$0xff]  ;;  %v3260_v12 = vld [vmem:[%s4762_s1] sm:$0xff] }
  0x1a   : > { %1224 = vmatpush.bf16.msra.mxu2 %v3280_v13  ;;  %v441_v0 = vrot.slane %v391_v53, 1  ;;  %v438_v4 = vrot.slane %v3651_v54, 1  ;;  %v439_v6 = vrot.slane %v359_v40, 1  ;;  %v4779_v7 = vunpack.c.l.bf16 %v3654_v55  ;;  %v3276_v13 = vld [vmem:[%s4762_s1 + $0x80] sm:$0xff]  ;;  %v3299_v26 = vld [vmem:[%s4762_s1 + $0x138] sm:$0xff] }
  0x1b   : > { %1190 = vmatpush.bf16.msra.mxu1 %v3272_v14  ;;  %v3646_v51 = vsel %vm354_vm0, %v355_v36, %v356_v38  ;;  %v388_v52 = vsel %vm385_vm1, %v386_v37, %v387_v41  ;;  %v436_v56 = vrot.slane %v387_v41, 1  ;;  %v433_v5 = vrot.slane %v356_v38, 1  ;;  %v3284_v19 = vld [vmem:[%s4762_s1 + $0xc0] sm:$0xff] }
  0x1c   : > { %1258 = vmatpush.bf16.msra.mxu3 %v3288_v15  ;;  %v432_v62 = vrot.slane %v3646_v51, 1  ;;  %v435_v63 = vrot.slane %v388_v52, 1  ;;  %v392_v8 = vrot.slane %v314_v44, 2  ;;  %v393_v9 = vrot.slane %v3628_v45, 2  ;;  %v3744_v52 = vld [vmem:[%s3586_s28 + $0x2c] sm:$0x3] }
  0x1d   : > { %1157 = vmatpush.bf16.msra.mxu0 %v3263_v29  ;;  %v3677_v10 = vsel %vm354_vm0, %v361_v57, %v362_v58  ;;  %v316_v11 = vmax.f32 %v4780_v59, 0.0  ;;  %v3689_v15 = vsel %vm354_vm0, %v441_v0, %v442_v1  ;;  %v3700_v21 = vsel %vm354_vm0, %v438_v4, %v439_v6  ;;  %v3708_v29 = vld [vmem:[%s3586_s28 + $0x20] sm:$0xf] }
  0x1e   : > { %1225 = vmatpush.bf16.msra.mxu2 %v3279_v30  ;;  %v437_v14 = vsel %vm354_vm0, %v435_v63, %v436_v56  ;;  %v394_v16 = vsel %vm385_vm1, %v392_v8, %v393_v9  ;;  %v448_v17 = vrot.slane %v393_v9, 1  ;;  %v434_v20 = vsel %vm354_vm0, %v432_v62, %v433_v5  ;;  %v3711_v30 = vld [vmem:[%s3586_s28 + $0x24] sm:$0x3]  ;;  %v3772_v8 = vld [vmem:[%s3586_s28 + $0x30] sm:$0xf] }
  0x1f   : > { %1191 = vmatpush.bf16.msra.mxu1 %v3271_v34  ;;  %v317_v22 = vmax.f32 %v4779_v7, 0.0  ;;  %v447_v23 = vrot.slane %v394_v16, 1  ;;  %v540_v31 = vpack.c.bf16 %v3651_v54, %v3646_v51  ;;  %v542_v32 = vpack.c.bf16 %v3689_v15, %v437_v14  ;;  %v3741_v51 = vld [vmem:[%s3586_s28 + $0x28] sm:$0xf]  ;;  %v3775_v9 = vld [vmem:[%s3586_s28 + $0x34] sm:$0x3] }
  0x20   : > { %1259 = vmatpush.bf16.msra.mxu3 %v3287_v35  ;;  %v543_v33 = vpack.c.bf16 %v3677_v10, %v3651_v54  ;;  %v541_v35 = vpack.c.bf16 %v3700_v21, %v434_v20  ;;  %v364_v36 = vrot.slane %v316_v11, 1  ;;  %v395_v39 = vrot.slane %v316_v11, 2  ;;  %v3295_v11 = vld [vmem:[%s4762_s1 + $0x118] sm:$0xff]  ;;  %v3316_v59 = vld [vmem:[%s4762_s1 + $0x1c0] sm:$0xff] }
  0x21   : > { %1158 = vmatpush.bf16.msra.mxu0 %v3262_v46  ;;  %v3719_v34 = vsel %vm354_vm0, %v447_v23, %v448_v17  ;;  %v365_v37 = vrot.slane %v317_v22, 1  ;;  %v396_v40 = vrot.slane %v317_v22, 2  ;;  %v4776_v41 = vunpack.c.l.bf16 %v3708_v29 }
  0x22   : > { %1226 = vmatpush.bf16.msra.mxu2 %v3278_v47  ;;  %v4775_v42 = vunpack.c.l.bf16 %v3711_v30  ;;  %v444_v53 = vrot.slane %v3677_v10, 1  ;;  %v445_v54 = vrot.slane %v362_v58, 1  ;;  %v4774_v0 = vunpack.c.l.bf16 %v3741_v51 }
  0x23   : > { %1192 = vmatpush.bf16.msra.mxu1 %v3270_v49  ;;  %v366_v44 = vsel %vm354_vm0, %v364_v36, %v365_v37  ;;  %v397_v46 = vsel %vm385_vm1, %v395_v39, %v396_v40  ;;  %v318_v47 = vmax.f32 %v4776_v41, 0.0  ;;  %v4773_v1 = vunpack.c.l.bf16 %v3744_v52  ;;  %v3323_v36 = vld [vmem:[%s4762_s1 + $0x1f8] sm:$0xff]  ;;  %v282_v41 = vld [vmem:[%s3586_s28 + $0x50] sm:$0xf] }
  0x24   : > { %1260 = vmatpush.bf16.msra.mxu3 %v3286_v50  ;;  %v3735_v49 = vmax.f32 %v4775_v42, 0.0  ;;  %v3297_v50 = vld [vmem:[%s4762_s1 + $0x128] sm:$0xff]  ;;  %v450_v56 = vrot.slane %v366_v44, 1  ;;  %v453_v57 = vrot.slane %v397_v46, 1  ;;  %v3759_v58 = vsel %vm354_vm0, %v444_v53, %v445_v54  ;;  %v3827_v46 = vld [vmem:[%s3586_s28 + $0x38] sm:$0xf] }
  0x25   : > { %1159 = vmatpush.bf16.msra.mxu0 %v3261_v60  ;;  %v454_v60 = vrot.slane %v396_v40, 1  ;;  %v367_v62 = vrot.slane %v318_v47, 1  ;;  %v320_v5 = vmax.f32 %v4774_v0, 0.0  ;;  %v321_v6 = vmax.f32 %v4773_v1, 0.0 }
  0x26   : > { %1227 = vmatpush.bf16.msra.mxu2 %v3277_v61  ;;  %v451_v61 = vrot.slane %v365_v37, 1  ;;  %v368_v63 = vrot.slane %v3735_v49, 1  ;;  %v398_v16 = vrot.slane %v318_v47, 2  ;;  %v4771_v20 = vunpack.c.l.bf16 %v3775_v9  ;;  %v3830_v47 = vld [vmem:[%s3586_s28 + $0x3c] sm:$0x3] }
  0x27   : > { %1193 = vmatpush.bf16.msra.mxu1 %v3269_v2  ;;  %v3296_v2 = vld [vmem:[%s4762_s1 + $0x120] sm:$0xff]  ;;  %v3756_v45 = vsel %vm354_vm0, %v453_v57, %v454_v60  ;;  %v370_v22 = vrot.slane %v320_v5, 1  ;;  %v401_v23 = vrot.slane %v320_v5, 2  ;;  %v3322_v57 = vld [vmem:[%s4762_s1 + $0x1f0] sm:$0xff]  ;;  %v3293_v60 = vld [vmem:[%s4762_s1 + $0x108] sm:$0xff] }
  0x28   : > { %1261 = vmatpush.bf16.msra.mxu3 %v3285_v3  ;;  %v3762_v3 = vsel %vm354_vm0, %v450_v56, %v451_v61  ;;  %v3765_v4 = vsel %vm354_vm0, %v367_v62, %v368_v63  ;;  %v457_v56 = vrot.slane %v368_v63, 1  ;;  %v4770_v63 = vunpack.c.l.bf16 %v3827_v46 }
  0x29   : > { %1160 = vmatpush.bf16.msra.mxu0 %v3260_v12  ;;  %v3781_v12 = vpack.c.bf16 %v366_v44, %v3677_v10  ;;  %v3789_v14 = vpack.c.bf16 %v3762_v3, %v3759_v58  ;;  %v549_v17 = vpack.c.bf16 %v3765_v4, %v366_v44  ;;  %v371_v10 = vrot.slane %v321_v6, 1  ;;  %v3314_v44 = vld [vmem:[%s4762_s1 + $0x1b0] sm:$0xff] }
  0x2a   : > { %1228 = vmatpush.bf16.msra.mxu2 %v3276_v13  ;;  %v3785_v13 = vpack.c.bf16 %v3756_v45, %v3719_v34 }
  0x2b   : > { %1194 = vmatpush.bf16.msra.mxu1 %v3268_v18  ;;  %v399_v18 = vrot.slane %v3735_v49, 2  ;;  %v3812_v37 = vsel %vm354_vm0, %v370_v22, %v371_v10  ;;  %v3306_v49 = vld [vmem:[%s4762_s1 + $0x170] sm:$0xff]  ;;  %v463_v5 = vrot.slane %v371_v10, 1  ;;  %v3321_v22 = vld [vmem:[%s4762_s1 + $0x1e8] sm:$0xff] }
  0x2c   : > { %1262 = vmatpush.bf16.msra.mxu3 %v3284_v19  ;;  %1161 = vmatmul.bf16.vlgmr.msra.gmra.mxu0 %v540_v31  ;;  %v4772_v19 = vunpack.c.l.bf16 %v3772_v8  ;;  %v3315_v31 = vld [vmem:[%s4762_s1 + $0x1b8] sm:$0xff]  ;;  %v462_v61 = vrot.slane %v3812_v37, 1 }
  0x2d   : > { %1289 = vmatpush.bf16.msrb.mxu0 %v3299_v26  ;;  %1229 = vmatmul.bf16.vlgmr.msra.gmra.mxu2 %v542_v32  ;;  %v402_v26 = vrot.slane %v321_v6, 2  ;;  %v400_v32 = vsel %vm385_vm1, %v398_v16, %v399_v18  ;;  %v460_v54 = vrot.slane %v399_v18, 1  ;;  %v4769_v16 = vunpack.c.l.bf16 %v3830_v47  ;;  %v3305_v18 = vld [vmem:[%s4762_s1 + $0x168] sm:$0xff] }
  0x2e   : > { %1195 = vmatmul.bf16.vlgmr.msra.gmra.mxu1 %v541_v35  ;;  %v3307_v35 = vld [vmem:[%s4762_s1 + $0x178] sm:$0xff]  ;;  %v3817_v40 = vmax.f32 %v4772_v19, 0.0  ;;  %1357 = vmatpush.bf16.msrb.mxu2 %v3315_v31  ;;  %v459_v53 = vrot.slane %v400_v32, 1  ;;  %v3866_v31 = vsel %vm354_vm0, %v462_v61, %v463_v5  ;;  %v3869_v32 = vld [vmem:[%s3586_s28 + $0x40] sm:$0xf] }
  0x2f   : > { %1263 = vmatmul.bf16.vlgmr.msra.gmra.mxu3 %v543_v33  ;;  %v3294_v33 = vld [vmem:[%s4762_s1 + $0x110] sm:$0xff]  ;;  %v403_v39 = vsel %vm385_vm1, %v401_v23, %v402_v26  ;;  %1323 = vmatpush.bf16.msrb.mxu1 %v3307_v35  ;;  %v324_v35 = vmax.f32 %v4770_v63, 0.0  ;;  %v4768_v61 = vunpack.c.l.bf16 %v3869_v32 }
  0x30   : > { %1391 = vmatpush.bf16.msrb.mxu3 %v3323_v36  ;;  %v465_v62 = vrot.slane %v403_v39, 1  ;;  %v373_v6 = vrot.slane %v3817_v40, 1  ;;  %v3857_v10 = vsel %vm354_vm0, %v459_v53, %v460_v54  ;;  %v325_v36 = vmax.f32 %v4769_v16, 0.0  ;;  %v3879_v39 = vld [vmem:[%s3586_s28 + $0x44] sm:$0x3] }
  0x31   : > { %1290 = vmatpush.bf16.msrb.mxu0 %v3298_v43  ;;  %v3821_v43 = vmax.f32 %v4771_v20, 0.0  ;;  %v407_v5 = vrot.slane %v324_v35, 2 }
  0x32   : > { %1358 = vmatpush.bf16.msrb.mxu2 %v3314_v44  ;;  %v3312_v44 = vld [vmem:[%s4762_s1 + $0x1a0] sm:$0xff] }
  0x33   : > { %1324 = vmatpush.bf16.msrb.mxu1 %v3306_v49  ;;  %v3304_v49 = vld [vmem:[%s4762_s1 + $0x160] sm:$0xff] }
  0x34   : > { %1392 = vmatpush.bf16.msrb.mxu3 %v3322_v57 }
  0x35   : > { %1291 = vmatpush.bf16.msrb.mxu0 %v3297_v50  ;;  %v456_v50 = vrot.slane %v3765_v4, 1 }
  0x37   : > { %1325 = vmatpush.bf16.msrb.mxu1 %v3305_v18 }
  0x38   : > { %1393 = vmatpush.bf16.msrb.mxu3 %v3321_v22  ;;  %v3303_v22 = vld [vmem:[%s4762_s1 + $0x158] sm:$0xff] }
  0x39   : > { %1292 = vmatpush.bf16.msrb.mxu0 %v3296_v2  ;;  %v466_v2 = vrot.slane %v402_v26, 1  ;;  %v3863_v26 = vsel %vm354_vm0, %v456_v50, %v457_v56  ;;  %v3889_v50 = vpack.c.bf16 %v3812_v37, %v3765_v4  ;;  %v404_v56 = vrot.slane %v3817_v40, 2 }
  0x3a   : > { %v3897_v54 = vpack.c.bf16 %v3866_v31, %v3863_v26  ;;  %v4767_v4 = vunpack.c.l.bf16 %v3879_v39 }
  0x3b   : > { %v3860_v23 = vsel %vm354_vm0, %v465_v62, %v466_v2  ;;  %v376_v62 = vrot.slane %v324_v35, 1  ;;  %v377_v2 = vrot.slane %v325_v36, 1  ;;  %1326 = vmatpush.bf16.msrb.mxu1 %v3304_v49  ;;  %v3319_v49 = vld [vmem:[%s4762_s1 + $0x1d8] sm:$0xff] }
  0x3c   : > { %1166 = vmatmul.bf16.gmra.mxu0 %v3781_v12  ;;  %v3893_v53 = vpack.c.bf16 %v3860_v23, %v3857_v10  ;;  %v3921_v18 = vmax.f32 %v4767_v4, 0.0 }
  0x3d   : > { %1293 = vmatpush.bf16.msrb.mxu0 %v3295_v11  ;;  %1234 = vmatmul.bf16.gmra.mxu2 %v3785_v13  ;;  %v374_v11 = vrot.slane %v3821_v43, 1  ;;  %v475_v63 = vrot.slane %v377_v2, 1 }
  0x3e   : > { %1200 = vmatmul.bf16.gmra.mxu1 %v3789_v14 }
  0x3f   : > { %1268 = vmatmul.bf16.gmra.mxu3 %v549_v17  ;;  %v3313_v17 = vld [vmem:[%s4762_s1 + $0x1a8] sm:$0xff]  ;;  %1327 = vmatpush.bf16.msrb.mxu1 %v3303_v22  ;;  %v469_v16 = vrot.slane %v374_v11, 1 }
  0x40   : > { %1359 = vmatpush.bf16.msrb.mxu2 %v3313_v17  ;;  %v3320_v17 = vld [vmem:[%s4762_s1 + $0x1e0] sm:$0xff] }
  0x41   : > { %1294 = vmatpush.bf16.msrb.mxu0 %v3294_v33  ;;  %v3872_v33 = vsel %vm354_vm0, %v373_v6, %v374_v11  ;;  %v408_v6 = vrot.slane %v325_v36, 2  ;;  %v3928_v36 = vsel %vm354_vm0, %v376_v62, %v377_v2  ;;  %1394 = vmatpush.bf16.msrb.mxu3 %v3320_v17  ;;  %v3944_v62 = vld [vmem:[%s3586_s28 + $0x4c] sm:$0x3]  ;;  %v3318_v11 = vld [vmem:[%s4762_s1 + $0x1d0] sm:$0xff] }
  0x42   : > { %v555_v57 = vpack.c.bf16 %v3872_v33, %v3812_v37  ;;  %v3311_v37 = vld [vmem:[%s4762_s1 + $0x198] sm:$0xff]  ;;  %v468_v35 = vrot.slane %v3872_v33, 1  ;;  %v474_v20 = vrot.slane %v3928_v36, 1  ;;  %v4777_v22 = vunpack.c.l.bf16 %v3944_v62  ;;  %v3309_v2 = vld [vmem:[%s4762_s1 + $0x188] sm:$0xff] }
  0x44   : > { %1360 = vmatpush.bf16.msrb.mxu2 %v3312_v44  ;;  %v409_v44 = vsel %vm385_vm1, %v407_v5, %v408_v6  ;;  %v3302_v5 = vld [vmem:[%s4762_s1 + $0x150] sm:$0xff]  ;;  %v329_v42 = vmax.f32 %v4777_v22, 0.0 }
  0x45   : > { %1295 = vmatpush.bf16.msrb.mxu0 %v3293_v60  ;;  %v405_v60 = vrot.slane %v3821_v43, 2  ;;  %v3917_v43 = vmax.f32 %v4768_v61, 0.0  ;;  %v3941_v61 = vld [vmem:[%s3586_s28 + $0x48] sm:$0xf]  ;;  %v477_v19 = vrot.slane %v409_v44, 1  ;;  %1395 = vmatpush.bf16.msrb.mxu3 %v3319_v49  ;;  %v3970_v49 = vsel %vm354_vm0, %v468_v35, %v469_v16 }
  0x46   : > { %v4778_v0 = vunpack.c.l.bf16 %v3941_v61  ;;  %1328 = vmatpush.bf16.msrb.mxu1 %v3302_v5  ;;  %v3993_v16 = vpack.c.bf16 %v3928_v36, %v3872_v33  ;;  %v383_v22 = vrot.slane %v329_v42, 1  ;;  %v414_v33 = vrot.slane %v329_v42, 2 }
  0x47   : > { %v406_v40 = vsel %vm385_vm1, %v404_v56, %v405_v60  ;;  %v3310_v56 = vld [vmem:[%s4762_s1 + $0x190] sm:$0xff]  ;;  %v472_v4 = vrot.slane %v405_v60, 1  ;;  %v379_v1 = vrot.slane %v3917_v43, 1  ;;  %v380_v60 = vrot.slane %v3921_v18, 1 }
  0x48   : > { %1361 = vmatpush.bf16.msrb.mxu2 %v3311_v37  ;;  %v471_v17 = vrot.slane %v406_v40, 1  ;;  %v478_v37 = vrot.slane %v408_v6, 1  ;;  %v3301_v6 = vld [vmem:[%s4762_s1 + $0x148] sm:$0xff]  ;;  %v328_v5 = vmax.f32 %v4778_v0, 0.0  ;;  %v490_v27 = vrot.slane %v414_v33, 1 }
  0x49   : > { %1396 = vmatpush.bf16.msrb.mxu3 %v3318_v11  ;;  %v410_v11 = vrot.slane %v3917_v43, 2  ;;  %v3331_v43 = vld [vmem:[%s4762_s1 + $0x238] sm:$0xff]  ;;  %v487_v38 = vrot.slane %v383_v22, 1 }
  0x4a   : > { %v3964_v40 = vsel %vm354_vm0, %v471_v17, %v472_v4  ;;  %v3967_v44 = vsel %vm354_vm0, %v477_v19, %v478_v37  ;;  %v3317_v19 = vld [vmem:[%s4762_s1 + $0x1c8] sm:$0xff]  ;;  %1329 = vmatpush.bf16.msrb.mxu1 %v3301_v6  ;;  %v382_v37 = vrot.slane %v328_v5, 1  ;;  %v306_v6 = vunpack.c.l.bf16 %v282_v41 }
  0x4b   : > { %v3997_v4 = vpack.c.bf16 %v3967_v44, %v3964_v40  ;;  %v413_v0 = vrot.slane %v328_v5, 2 }
  0x4c   : > { %1171 = vmatmul.bf16.gmra.mxu0 %v3889_v50  ;;  %1362 = vmatpush.bf16.msrb.mxu2 %v3310_v56  ;;  %v3973_v56 = vsel %vm354_vm0, %v474_v20, %v475_v63  ;;  %v3308_v20 = vld [vmem:[%s4762_s1 + $0x180] sm:$0xff]  ;;  %v283_v63 = vld [vmem:[%s3586_s28 + $0x54] sm:$0x3]  ;;  %v384_v42 = vsel %vm354_vm0, %v382_v37, %v383_v22 }
  0x4d   : > { %1239 = vmatmul.bf16.gmra.mxu2 %v3893_v53  ;;  %v4001_v35 = vpack.c.bf16 %v3973_v56, %v3970_v49  ;;  %v307_v7 = vunpack.c.l.bf16 %v283_v63  ;;  %1397 = vmatpush.bf16.msrb.mxu3 %v3317_v19  ;;  %v3330_v19 = vld [vmem:[%s4762_s1 + $0x230] sm:$0xff] }
  0x4e   : > { %1205 = vmatmul.bf16.gmra.mxu1 %v3897_v54 }
  0x4f   : > { %1273 = vmatmul.bf16.gmra.mxu3 %v555_v57  ;;  %v3292_v57 = vld [vmem:[%s4762_s1 + $0x100] sm:$0xff]  ;;  %v4018_v5 = vmax.f32 %v307_v7, 0.0 }
  0x50   : > { %1296 = vmatpush.bf16.msrb.mxu0 %v3292_v57  ;;  %v381_v57 = vsel %vm354_vm0, %v379_v1, %v380_v60  ;;  %1363 = vmatpush.bf16.msrb.mxu2 %v3309_v2  ;;  %v3300_v1 = vld [vmem:[%s4762_s1 + $0x140] sm:$0xff]  ;;  %v411_v2 = vrot.slane %v3921_v18, 2  ;;  %v415_v18 = vsel %vm385_vm1, %v413_v0, %v414_v33  ;;  %v544_v33 = vpack.c.bf16 %v3759_v58, %v3700_v21  ;;  %v285_v58 = vld [vmem:[%s3586_s28 + $0x5c] sm:$0x3] }
  0x51   : > { %v561_v17 = vpack.c.bf16 %v381_v57, %v3928_v36  ;;  %1330 = vmatpush.bf16.msrb.mxu1 %v3300_v1  ;;  %v330_v36 = vmax.f32 %v306_v6, 0.0  ;;  %1398 = vmatpush.bf16.msrb.mxu3 %v3316_v59  ;;  %v486_v1 = vrot.slane %v384_v42, 1  ;;  %v419_v0 = vrot.slane %v4018_v5, 1 }
  0x52   : > { %v412_v41 = vsel %vm385_vm1, %v410_v11, %v411_v2  ;;  %v484_v28 = vrot.slane %v411_v2, 1  ;;  %v481_v11 = vrot.slane %v380_v60, 1  ;;  %v564_v22 = vpack.c.bf16 %v384_v42, %v381_v57 }
  0x53   : > { %v483_v63 = vrot.slane %v412_v41, 1  ;;  %v418_v37 = vrot.slane %v330_v36, 1  ;;  %v4783_v41 = vpack.c.bf16 %v3719_v34, %v3689_v15  ;;  %v551_v21 = vpack.c.bf16 %v3857_v10, %v3756_v45  ;;  %v3326_v15 = vld [vmem:[%s4762_s1 + $0x210] sm:$0xff]  ;;  %v284_v34 = vld [vmem:[%s3586_s28 + $0x58] sm:$0xf]  ;;  %v3325_v10 = vld [vmem:[%s4762_s1 + $0x208] sm:$0xff] }
  0x54   : > { %1364 = vmatpush.bf16.msrb.mxu2 %v3308_v20  ;;  %1425 = vmatpush.bf16.msra.mxu0 %v3331_v43  ;;  %v480_v20 = vrot.slane %v381_v57, 1  ;;  %v4034_v43 = vsel %vm354_vm0, %v486_v1, %v487_v38  ;;  %v3329_v38 = vld [vmem:[%s4762_s1 + $0x228] sm:$0xff]  ;;  %v3328_v57 = vld [vmem:[%s4762_s1 + $0x220] sm:$0xff]  ;;  %v556_v45 = vpack.c.bf16 %v3970_v49, %v3866_v31 }
  0x55   : > { %v4025_v7 = vsel %vm354_vm0, %v483_v63, %v484_v28  ;;  %v4039_v60 = vsel %vm354_vm0, %v418_v37, %v419_v0  ;;  %v3324_v37 = vld [vmem:[%s4762_s1 + $0x200] sm:$0xff] }
  0x56   : > { %v4031_v6 = vsel %vm354_vm0, %v480_v20, %v481_v11  ;;  %v567_v28 = vpack.c.bf16 %v4039_v60, %v384_v42  ;;  %v3327_v42 = vld [vmem:[%s4762_s1 + $0x218] sm:$0xff] }
  0x58   : > { %1426 = vmatpush.bf16.msra.mxu0 %v3330_v19  ;;  %v421_v19 = vrot.slane %v330_v36, 2 }
  0x5c   : > { %1176 = vmatmul.bf16.gmra.mxu0 %v3993_v16 }
  0x5d   : > { %1244 = vmatmul.bf16.gmra.mxu2 %v3997_v4  ;;  %1427 = vmatpush.bf16.msra.mxu0 %v3329_v38  ;;  %v563_v38 = vpack.c.bf16 %v4025_v7, %v3967_v44 }
  0x5e   : > { %1210 = vmatmul.bf16.gmra.mxu1 %v4001_v35 }
  0x5f   : > { %1278 = vmatmul.bf16.gmra.mxu3 %v561_v17  ;;  %v489_v17 = vrot.slane %v415_v18, 1  ;;  %v550_v18 = vpack.c.bf16 %v3863_v26, %v3762_v3  ;;  %v422_v3 = vrot.slane %v4018_v5, 2  ;;  %v557_v26 = vpack.c.bf16 %v3964_v40, %v3860_v23 }
  0x61   : > { %v4028_v59 = vsel %vm354_vm0, %v489_v17, %v490_v27  ;;  %v565_v27 = vpack.c.bf16 %v4034_v43, %v4031_v6  ;;  %1428 = vmatpush.bf16.msra.mxu0 %v3328_v57  ;;  %v423_v20 = vsel %vm385_vm1, %v421_v19, %v422_v3  ;;  %v496_v49 = vrot.slane %v422_v3, 1 }
  0x62   : > { %v4043_v2 = vpack.c.bf16 %v4028_v59, %v4025_v7  ;;  %v495_v31 = vrot.slane %v423_v20, 1 }
  0x64   : > { %v4089_v23 = vsel %vm354_vm0, %v495_v31, %v496_v49 }
  0x65   : > { %1429 = vmatpush.bf16.msra.mxu0 %v3327_v42  ;;  %v569_v3 = vpack.c.bf16 %v4089_v23, %v4028_v59 }
  0x69   : > { %1430 = vmatpush.bf16.msra.mxu0 %v3326_v15  ;;  %v492_v15 = vrot.slane %v4039_v60, 1 }
  0x6c   : > { %1181 = vmatmul.bf16.gmra.mxu0 %v564_v22 }
  0x6d   : > { %1249 = vmatmul.bf16.gmra.mxu2 %v4043_v2  ;;  %1431 = vmatpush.bf16.msra.mxu0 %v3325_v10 }
  0x6e   : > { %1215 = vmatmul.bf16.gmra.mxu1 %v565_v27 }
  0x6f   : > { %1283 = vmatmul.bf16.gmra.mxu3 %v567_v28 }
  0x71   : > { %1432 = vmatpush.bf16.msra.mxu0 %v3324_v37 }
  0x7c   : > { %1297 = vmatmul.bf16.vlgmr.msrb.gmra.mxu0 %v544_v33 }
  0x7d   : > { %1365 = vmatmul.bf16.vlgmr.msrb.gmra.mxu2 %v3781_v12  ;;  %v308_v12 = vunpack.c.l.bf16 %v284_v34 }
  0x7e   : > { %1331 = vmatmul.bf16.vlgmr.msrb.gmra.mxu1 %v4783_v41 }
  0x7f   : > { %1399 = vmatmul.bf16.vlgmr.msrb.gmra.mxu3 %v3789_v14  ;;  %v309_v14 = vunpack.c.l.bf16 %v285_v58 }
  0x8c   : > { %1302 = vmatmul.bf16.gmra.mxu0 %v550_v18 }
  0x8d   : > { %1370 = vmatmul.bf16.gmra.mxu2 %v3889_v50  ;;  %v332_v50 = vmax.f32 %v308_v12, 0.0  ;;  %v4118_v12 = vld [vmem:[%s4764_s3] ss:$0 sm:$0xff] }
  0x8e   : > { %1336 = vmatmul.bf16.gmra.mxu1 %v551_v21 }
  0x8f   : > { %1404 = vmatmul.bf16.gmra.mxu3 %v3897_v54  ;;  %v333_v54 = vmax.f32 %v309_v14, 0.0  ;;  %v429_v36 = vrot.slane %v332_v50, 2  ;;  %v426_v33 = vrot.slane %v332_v50, 1 }
  0x91   : > { %v430_v63 = vrot.slane %v333_v54, 2  ;;  %v427_v41 = vrot.slane %v333_v54, 1 }
  0x93   : > { %v431_v1 = vsel %vm385_vm1, %v429_v36, %v430_v63  ;;  %v502_v17 = vrot.slane %v430_v63, 1  ;;  %v428_v18 = vsel %vm354_vm0, %v426_v33, %v427_v41  ;;  %v499_v7 = vrot.slane %v427_v41, 1 }
  0x94   : > { %v501_v11 = vrot.slane %v431_v1, 1  ;;  %v498_v44 = vrot.slane %v428_v18, 1 }
  0x96   : > { %v4092_v40 = vsel %vm354_vm0, %v501_v11, %v502_v17 }
  0x9c   : > { %1307 = vmatmul.bf16.gmra.mxu0 %v556_v45 }
  0x9d   : > { %1375 = vmatmul.bf16.gmra.mxu2 %v3993_v16  ;;  %v572_v16 = vpack.c.bf16 %v4092_v40, %v4089_v23  ;;  %v3347_v23 = vld [vmem:[%s4763_s2 + $0x78] sm:$0xff] }
  0x9e   : > { %1341 = vmatmul.bf16.gmra.mxu1 %v557_v26  ;;  %3435 = vmatpush.bf16.msra.mxu2 %v3347_v23 }
  0x9f   : > { %1409 = vmatmul.bf16.gmra.mxu3 %v4001_v35  ;;  %v562_v35 = vpack.c.bf16 %v4031_v6, %v3973_v56  ;;  %v493_v56 = vrot.slane %v419_v0, 1  ;;  %v570_v0 = vpack.c.bf16 %v428_v18, %v4039_v60  ;;  %2279 = vmatpush.bf16.msrb.mxu0 %v3347_v23 }
  0xa1   : > { %v494_v58 = vsel %vm354_vm0, %v492_v15, %v493_v56 }
  0xa2   : > { %v568_v5 = vpack.c.bf16 %v494_v58, %v4034_v43 }
  0xa9   : > { %v1162_v28 = vpop.f32.mrf.mxu0 }
  0xab   : > { %v1196_v57 = vpop.f32.mrf.mxu1 }
  0xac   : > { %1312 = vmatmul.bf16.gmra.mxu0 %v562_v35 }
  0xad   : > { %1380 = vmatmul.bf16.gmra.mxu2 %v564_v22  ;;  %v500_v22 = vsel %vm354_vm0, %v498_v44, %v499_v7 }
  0xae   : > { %1346 = vmatmul.bf16.gmra.mxu1 %v563_v38  ;;  %v571_v45 = vpack.c.bf16 %v500_v22, %v494_v58 }
  0xaf   : > { %1414 = vmatmul.bf16.gmra.mxu3 %v565_v27 }
  0xb0   : > { %v1230_v42 = vpop.f32.mrf.mxu2 }
  0xb1   : > { %v4105_v34 = vpop.f32.mrf.mxu0 }
  0xb2   : > { %v1264_v21 = vpop.f32.mrf.mxu3 }
  0xb3   : > { %v4109_v6 = vpop.f32.mrf.mxu1 }
  0xb8   : > { %v4113_v27 = vpop.f32.mrf.mxu2 }
  0xb9   : > { %v1167_v19 = vpop.f32.mrf.mxu0 }
  0xba   : > { %v4120_v14 = vpop.f32.mrf.mxu3  ;;  %v1168_v10 = vadd.f32 %v4118_v12, %v1167_v19 }
  0xbb   : > { %v1201_v26 = vpop.f32.mrf.mxu1 }
  0xbc   : > { %v1202_v50 = vadd.f32 %v1201_v26, %v1168_v10  ;;  %1317 = vmatmul.bf16.gmra.mxu0 %v568_v5 }
  0xbd   : > { %1385 = vmatmul.bf16.gmra.mxu2 %v570_v0 }
  0xbe   : > { %1351 = vmatmul.bf16.gmra.mxu1 %v569_v3 }
  0xbf   : > { %1419 = vmatmul.bf16.gmra.mxu3 %v571_v45 }
  0xc0   : > { %v1235_v54 = vpop.f32.mrf.mxu2 }
  0xc1   : > { %v1236_v20 = vadd.f32 %v1235_v54, %v1202_v50  ;;  %v4127_v63 = vpop.f32.mrf.mxu0 }
  0xc2   : > { %v1269_v36 = vpop.f32.mrf.mxu3 }
  0xc3   : > { %v1270_v43 = vadd.f32 %v1269_v36, %v1236_v20  ;;  %v4129_v60 = vpop.f32.mrf.mxu1 }
  0xc8   : > { %v4131_v31 = vpop.f32.mrf.mxu2 }
  0xc9   : > { %v1172_v49 = vpop.f32.mrf.mxu0 }
  0xca   : > { %v4133_v59 = vpop.f32.mrf.mxu3  ;;  %v1173_v1 = vadd.f32 %v4118_v12, %v1172_v49 }
  0xcb   : > { %v1206_v17 = vpop.f32.mrf.mxu1 }
  0xcc   : > { %v1207_v11 = vadd.f32 %v1206_v17, %v1173_v1  ;;  %1433 = vmatmul.bf16.vlgmr.msra.gmra.mxu0 %v3785_v13 }
  0xd0   : > { %v1240_v37 = vpop.f32.mrf.mxu2 }
  0xd1   : > { %v1241_v35 = vadd.f32 %v1240_v37, %v1207_v11  ;;  %v4137_v38 = vpop.f32.mrf.mxu0 }
  0xd2   : > { %v1274_v28 = vpop.f32.mrf.mxu3 }
  0xd3   : > { %v1275_v57 = vadd.f32 %v1274_v28, %v1241_v35  ;;  %v4139_v33 = vpop.f32.mrf.mxu1 }
  0xd8   : > { %v4141_v41 = vpop.f32.mrf.mxu2 }
  0xd9   : > { %v1177_v18 = vpop.f32.mrf.mxu0 }
  0xda   : > { %v4143_v42 = vpop.f32.mrf.mxu3  ;;  %v1178_v21 = vadd.f32 %v4118_v12, %v1177_v18 }
  0xdb   : > { %v1211_v15 = vpop.f32.mrf.mxu1 }
  0xdc   : > { %v1212_v56 = vadd.f32 %v1211_v15, %v1178_v21  ;;  %1438 = vmatmul.bf16.gmra.mxu0 %v3893_v53 }
  0xe0   : > { %v1245_v13 = vpop.f32.mrf.mxu2 }
  0xe1   : > { %v1246_v44 = vadd.f32 %v1245_v13, %v1212_v56  ;;  %v4147_v58 = vpop.f32.mrf.mxu0 }
  0xe2   : > { %v1279_v7 = vpop.f32.mrf.mxu3 }
  0xe3   : > { %v4149_v22 = vadd.f32 %v1279_v7, %v1246_v44  ;;  %v4151_v5 = vpop.f32.mrf.mxu1 }
  0xe8   : > { %v4153_v0 = vpop.f32.mrf.mxu2 }
  0xe9   : > { %v1182_v3 = vpop.f32.mrf.mxu0 }
  0xea   : > { %v4155_v19 = vpop.f32.mrf.mxu3  ;;  %v1183_v45 = vadd.f32 %v4118_v12, %v1182_v3 }
  0xeb   : > { %v1216_v10 = vpop.f32.mrf.mxu1 }
  0xec   : > { %v1217_v26 = vadd.f32 %v1216_v10, %v1183_v45  ;;  %1443 = vmatmul.bf16.gmra.mxu0 %v3997_v4  ;;  %v3339_v10 = vld [vmem:[%s4763_s2 + $0x38] sm:$0xff] }
  0xed   : > { %3427 = vmatpush.bf16.msra.mxu3 %v3339_v10  ;;  %2250 = vmatpush.bf16.msra.mxu1 %v3339_v10  ;;  %v3336_v10 = vld [vmem:[%s4763_s2 + $0x20] sm:$0xff] }
  0xf0   : > { %v1250_v53 = vpop.f32.mrf.mxu2 }
  0xf1   : > { %v1251_v50 = vadd.f32 %v1250_v53, %v1217_v26  ;;  %v1184_v20 = vpop.f32.mrf.mxu0 }
  0xf2   : > { %v1284_v54 = vpop.f32.mrf.mxu3 }
  0xf3   : > { %v4159_v36 = vadd.f32 %v1284_v54, %v1251_v50  ;;  %v1218_v49 = vpop.f32.mrf.mxu1 }
  0xf4   : > { %v3338_v49 = vld [vmem:[%s4763_s2 + $0x30] sm:$0xff] }
  0xf5   : > { %3428 = vmatpush.bf16.msra.mxu3 %v3338_v49  ;;  %2251 = vmatpush.bf16.msra.mxu1 %v3338_v49 }
  0xf8   : > { %v1252_v1 = vpop.f32.mrf.mxu2 }
  0xf9   : > { %v1298_v11 = vpop.f32.mrf.mxu0 }
  0xfa   : > { %v1286_v17 = vpop.f32.mrf.mxu3 }
  0xfb   : > { %v1332_v37 = vpop.f32.mrf.mxu1 }
  0xfc   : > { %1448 = vmatmul.bf16.gmra.mxu0 %v4043_v2 }
 0x100   : > { %v1366_v35 = vpop.f32.mrf.mxu2 }
 0x101   : > { %v4162_v18 = vpop.f32.mrf.mxu0  ;;  %v3346_v35 = vld [vmem:[%s4763_s2 + $0x70] sm:$0xff] }
 0x102   : > { %v1400_v28 = vpop.f32.mrf.mxu3  ;;  %3436 = vmatpush.bf16.msra.mxu2 %v3346_v35  ;;  %2280 = vmatpush.bf16.msrb.mxu0 %v3346_v35 }
 0x103   : > { %v4164_v21 = vpop.f32.mrf.mxu1 }
 0x108   : > { %v4166_v4 = vpop.f32.mrf.mxu2 }
 0x109   : > { %v1303_v56 = vpop.f32.mrf.mxu0 }
 0x10a   : > { %v4168_v15 = vpop.f32.mrf.mxu3  ;;  %v1304_v13 = vadd.f32 %v1303_v56, %v1270_v43 }
 0x10b   : > { %v1337_v44 = vpop.f32.mrf.mxu1 }
 0x10c   : > { %v1338_v7 = vadd.f32 %v1337_v44, %v1304_v13  ;;  %1453 = vmatmul.bf16.gmra.mxu0 %v572_v16  ;;  %v3337_v13 = vld [vmem:[%s4763_s2 + $0x28] sm:$0xff]  ;;  %v1180_v44 = vadd.f32 %v4118_v12, %v4147_v58  ;;  %v3344_v58 = vld [vmem:[%s4763_s2 + $0x60] sm:$0xff] }
 0x10d   : > { %3429 = vmatpush.bf16.msra.mxu3 %v3337_v13  ;;  %2252 = vmatpush.bf16.msra.mxu1 %v3337_v13 }
 0x10e   : > { %v1214_v23 = vadd.f32 %v4151_v5, %v1180_v44  ;;  %v3335_v5 = vld [vmem:[%s4763_s2 + $0x18] sm:$0xff] }
 0x10f   : > { %v3343_v44 = vld [vmem:[%s4763_s2 + $0x58] sm:$0xff] }
 0x110   : > { %v1371_v3 = vpop.f32.mrf.mxu2 }
 0x111   : > { %v1372_v2 = vadd.f32 %v1371_v3, %v1338_v7  ;;  %v4176_v26 = vpop.f32.mrf.mxu0  ;;  %2253 = vmatpush.bf16.msra.mxu1 %v3336_v10  ;;  %3430 = vmatpush.bf16.msra.mxu3 %v3336_v10  ;;  %v3495_v10 = vmov 0.0  }
 0x112   : > { %v1405_v45 = vpop.f32.mrf.mxu3  ;;  %1493 = vst [vmem:[#allocation2] sm:$0x1] %v3495_v10 }
 0x113   : > { %v4178_v53 = vadd.f32 %v1405_v45, %v1372_v2  ;;  %v4180_v50 = vpop.f32.mrf.mxu1  ;;  %v3345_v45 = vld [vmem:[%s4763_s2 + $0x68] sm:$0xff]  ;;  %1494 = vst [vmem:[#allocation2 + $0x10] sm:$0x1] %v3495_v10 }
 0x114   : > { %3437 = vmatpush.bf16.msra.mxu2 %v3345_v45  ;;  %2281 = vmatpush.bf16.msrb.mxu0 %v3345_v45  ;;  %v3342_v45 = vld [vmem:[%s4763_s2 + $0x50] sm:$0xff]  ;;  %1513 = vst [vmem:[#allocation2 + $0x1] sm:$0xff] %v3495_v10 }
 0x115   : > { %2254 = vmatpush.bf16.msra.mxu1 %v3335_v5  ;;  %3431 = vmatpush.bf16.msra.mxu3 %v3335_v5  ;;  %1495 = vst [vmem:[#allocation2 + $0x20] sm:$0x1] %v3495_v10 }
 0x116   : > { %1496 = vst [vmem:[#allocation2 + $0x30] sm:$0x1] %v3495_v10 }
 0x117   : > { %1497 = vst [vmem:[#allocation2 + $0x40] sm:$0x1] %v3495_v10 }
 0x118   : > { %v4185_v40 = vpop.f32.mrf.mxu2  ;;  %2282 = vmatpush.bf16.msrb.mxu0 %v3344_v58  ;;  %3438 = vmatpush.bf16.msra.mxu2 %v3344_v58  ;;  %1498 = vst [vmem:[#allocation2 + $0x50] sm:$0x1] %v3495_v10 }
 0x119   : > { %v1308_v43 = vpop.f32.mrf.mxu0  ;;  %1499 = vst [vmem:[#allocation2 + $0x60] sm:$0x1] %v3495_v10 }
 0x11a   : > { %v4187_v16 = vpop.f32.mrf.mxu3  ;;  %v1309_v54 = vadd.f32 %v1308_v43, %v1275_v57  ;;  %1500 = vst [vmem:[#allocation2 + $0x70] sm:$0x1] %v3495_v10 }
 0x11b   : > { %v1342_v20 = vpop.f32.mrf.mxu1  ;;  %1501 = vst [vmem:[#allocation2 + $0x80] sm:$0x1] %v3495_v10 }
 0x11c   : > { %v1343_v1 = vadd.f32 %v1342_v20, %v1309_v54  ;;  %v1248_v20 = vadd.f32 %v4153_v0, %v1214_v23  ;;  %2283 = vmatpush.bf16.msrb.mxu0 %v3343_v44  ;;  %3439 = vmatpush.bf16.msra.mxu2 %v3343_v44  ;;  %1502 = vst [vmem:[#allocation2 + $0x90] sm:$0x1] %v3495_v10 }
 0x11d   : > { %1503 = vst [vmem:[#allocation2 + $0x9] sm:$0x1] %v3495_v10 }
 0x11e   : > { %1504 = vst [vmem:[#allocation2 + $0x19] sm:$0x1] %v3495_v10 }
 0x11f   : > { %1505 = vst [vmem:[#allocation2 + $0x29] sm:$0x1] %v3495_v10 }
 0x120   : > { %v1376_v17 = vpop.f32.mrf.mxu2  ;;  %2284 = vmatpush.bf16.msrb.mxu0 %v3342_v45  ;;  %3440 = vmatpush.bf16.msra.mxu2 %v3342_v45  ;;  %1506 = vst [vmem:[#allocation2 + $0x39] sm:$0x1] %v3495_v10 }
 0x121   : > { %v1377_v11 = vadd.f32 %v1376_v17, %v1343_v1  ;;  %v4195_v28 = vpop.f32.mrf.mxu0  ;;  %1507 = vst [vmem:[#allocation2 + $0x49] sm:$0x1] %v3495_v10 }
 0x122   : > { %v1410_v37 = vpop.f32.mrf.mxu3  ;;  %1508 = vst [vmem:[#allocation2 + $0x59] sm:$0x1] %v3495_v10 }
 0x123   : > { %v4197_v56 = vadd.f32 %v1410_v37, %v1377_v11  ;;  %v4199_v57 = vpop.f32.mrf.mxu1  ;;  %1509 = vst [vmem:[#allocation2 + $0x69] sm:$0x1] %v3495_v10 }
 0x124   : > { %1510 = vst [vmem:[#allocation2 + $0x79] sm:$0x1] %v3495_v10 }
 0x125   : > { %1511 = vst [vmem:[#allocation2 + $0x89] sm:$0x1] %v3495_v10 }
 0x126   : > { %1512 = vst [vmem:[#allocation2 + $0x99] sm:$0x1] %v3495_v10 }
 0x127   : > { %1522 = vst [vmem:[#allocation2 + $0x91] sm:$0xff] %v3495_v10 }
 0x128   : > { %v4206_v7 = vpop.f32.mrf.mxu2 }
 0x129   : > { %v1313_v2 = vpop.f32.mrf.mxu0 }
 0x12a   : > { %v4208_v3 = vpop.f32.mrf.mxu3  ;;  %v1314_v43 = vadd.f32 %v1313_v2, %v4149_v22  ;;  %v1282_v22 = vadd.f32 %v4155_v19, %v1248_v20  ;;  %v3334_v2 = vld [vmem:[%s4763_s2 + $0x10] sm:$0xff] }
 0x12b   : > { %v1347_v54 = vpop.f32.mrf.mxu1  ;;  %2255 = vmatpush.bf16.msra.mxu1 %v3334_v2  ;;  %3432 = vmatpush.bf16.msra.mxu3 %v3334_v2 }
 0x12c   : > { %v1348_v49 = vadd.f32 %v1347_v54, %v1314_v43  ;;  %v3333_v43 = vld [vmem:[%s4763_s2 + $0x8] sm:$0xff] }
 0x12f   : > { %2256 = vmatpush.bf16.msra.mxu1 %v3333_v43  ;;  %3433 = vmatpush.bf16.msra.mxu3 %v3333_v43 }
 0x130   : > { %v1381_v1 = vpop.f32.mrf.mxu2 }
 0x131   : > { %v1382_v17 = vadd.f32 %v1381_v1, %v1348_v49  ;;  %v1315_v37 = vpop.f32.mrf.mxu0  ;;  %v1165_v49 = vadd.f32 %v4118_v12, %v4105_v34 }
 0x132   : > { %v1415_v11 = vpop.f32.mrf.mxu3  ;;  %v1316_v35 = vadd.f32 %v1315_v37, %v1282_v22 }
 0x133   : > { %v4226_v13 = vadd.f32 %v1415_v11, %v1382_v17  ;;  %v1349_v0 = vpop.f32.mrf.mxu1  ;;  %v3341_v17 = vld [vmem:[%s4763_s2 + $0x48] sm:$0xff]  ;;  %v3332_v11 = vld [vmem:[%s4763_s2] sm:$0xff]  ;;  %v1199_v34 = vadd.f32 %v4109_v6, %v1165_v49 }
 0x134   : > { %v1350_v19 = vadd.f32 %v1349_v0, %v1316_v35  ;;  %2285 = vmatpush.bf16.msrb.mxu0 %v3341_v17  ;;  %3441 = vmatpush.bf16.msra.mxu2 %v3341_v17  ;;  %v3363_v0 = vld [vmem:[%s4763_s2 + $0xf8] sm:$0xff] }
 0x135   : > { %2257 = vmatpush.bf16.msra.mxu1 %v3332_v11  ;;  %3434 = vmatpush.bf16.msra.mxu3 %v3332_v11  ;;  %v1233_v44 = vadd.f32 %v4113_v27, %v1199_v34  ;;  %v3362_v27 = vld [vmem:[%s4763_s2 + $0xf0] sm:$0xff]  ;;  %v3385_v11 = vld [vmem:[%s4763_s2 + $0x1a8] sm:$0xff] }
 0x138   : > { %v1383_v23 = vpop.f32.mrf.mxu2 }
 0x139   : > { %v1384_v54 = vadd.f32 %v1383_v23, %v1350_v19  ;;  %v1318_v20 = vpop.f32.mrf.mxu0  ;;  %2337 = vmatpush.bf16.msrb.mxu1 %v3363_v0  ;;  %v3387_v23 = vld [vmem:[%s4763_s2 + $0x1b8] sm:$0xff] }
 0x13a   : > { %v1417_v58 = vpop.f32.mrf.mxu3  ;;  %v1319_v1 = vadd.f32 %v1318_v20, %v4159_v36  ;;  %v3340_v36 = vld [vmem:[%s4763_s2 + $0x40] sm:$0xff]  ;;  %v3386_v20 = vld [vmem:[%s4763_s2 + $0x1b0] sm:$0xff] }
 0x13b   : > { %v4247_v5 = vadd.f32 %v1417_v58, %v1384_v54  ;;  %v1352_v22 = vpop.f32.mrf.mxu1  ;;  %2286 = vmatpush.bf16.msrb.mxu0 %v3340_v36  ;;  %3442 = vmatpush.bf16.msra.mxu2 %v3340_v36  ;;  %v1267_v54 = vadd.f32 %v4120_v14, %v1233_v44  ;;  %v3361_v14 = vld [vmem:[%s4763_s2 + $0xe8] sm:$0xff]  ;;  %v3359_v36 = vld [vmem:[%s4763_s2 + $0xd8] sm:$0xff]  ;;  %v3358_v44 = vld [vmem:[%s4763_s2 + $0xd0] sm:$0xff] }
 0x13c   : > { %v1353_v37 = vadd.f32 %v1352_v22, %v1319_v1 }
 0x13d   : > { %2338 = vmatpush.bf16.msrb.mxu1 %v3362_v27  ;;  %v1301_v58 = vadd.f32 %v4162_v18, %v1267_v54  ;;  %v1170_v18 = vadd.f32 %v4118_v12, %v4127_v63 }
 0x13f   : > { %2424 = vmatpush.bf16.msra.mxu0 %v3387_v23  ;;  %v1335_v17 = vadd.f32 %v4164_v21, %v1301_v58  ;;  %v1204_v63 = vadd.f32 %v4129_v60, %v1170_v18  ;;  %v3384_v21 = vld [vmem:[%s4763_s2 + $0x1a0] sm:$0xff]  ;;  %v3383_v60 = vld [vmem:[%s4763_s2 + $0x198] sm:$0xff]  ;;  %v4329_v23 = vld [vmem:[#allocation2 + $0x8] sm:$0x3] }
 0x140   : > { %v1386_v35 = vpop.f32.mrf.mxu2 }
 0x141   : > { %v1387_v2 = vadd.f32 %v1386_v35, %v1353_v37  ;;  %v1320_v6 = vpop.f32.mrf.mxu0  ;;  %2339 = vmatpush.bf16.msrb.mxu1 %v3361_v14  ;;  %v3360_v37 = vld [vmem:[%s4763_s2 + $0xe0] sm:$0xff]  ;;  %v1369_v34 = vadd.f32 %v4166_v4, %v1335_v17  ;;  %v1238_v10 = vadd.f32 %v4131_v31, %v1204_v63  ;;  %v3381_v14 = vld [vmem:[%s4763_s2 + $0x188] sm:$0xff] }
 0x142   : > { %v1420_v19 = vpop.f32.mrf.mxu3  ;;  %v4327_v6 = vld [vmem:[#allocation2] sm:$0xff] }
 0x143   : > { %v4271_v45 = vadd.f32 %v1420_v19, %v1387_v2  ;;  %v1354_v43 = vpop.f32.mrf.mxu1  ;;  %2425 = vmatpush.bf16.msra.mxu0 %v3386_v20  ;;  %v1403_v35 = vadd.f32 %v4168_v15, %v1369_v34  ;;  %v1272_v2 = vadd.f32 %v4133_v59, %v1238_v10  ;;  %v3382_v15 = vld [vmem:[%s4763_s2 + $0x190] sm:$0xff]  ;;  %v1175_v59 = vadd.f32 %v4118_v12, %v4137_v38 }
 0x144   : > { %v3357_v43 = vld [vmem:[%s4763_s2 + $0xc8] sm:$0xff]  ;;  %v1559_v58 = vrot.slane %v4327_v6, 1  ;;  %v1560_v20 = vrot.slane %v4329_v23, 1 }
 0x145   : > { %2340 = vmatpush.bf16.msrb.mxu1 %v3360_v37  ;;  %v1306_v31 = vadd.f32 %v4176_v26, %v1272_v2 }
 0x146   : > { %v1561_v17 = vsel %vm354_vm0, %v1559_v58, %v1560_v20 }
 0x147   : > { %2426 = vmatpush.bf16.msra.mxu0 %v3385_v11  ;;  %v1340_v26 = vadd.f32 %v4180_v50, %v1306_v31  ;;  %v1209_v50 = vadd.f32 %v4139_v33, %v1175_v59  ;;  %v3355_v33 = vld [vmem:[%s4763_s2 + $0xb8] sm:$0xff] }
 0x148   : > { %v1388_v49 = vpop.f32.mrf.mxu2  ;;  %2308 = vmatpush.bf16.msrb.mxu3 %v3355_v33  ;;  %v3366_v33 = vld [vmem:[%s4763_s2 + $0x110] sm:$0xff] }
 0x149   : > { %v1434_v22 = vpop.f32.mrf.mxu0  ;;  %2341 = vmatpush.bf16.msrb.mxu1 %v3359_v36  ;;  %v3356_v49 = vld [vmem:[%s4763_s2 + $0xc0] sm:$0xff]  ;;  %v1374_v12 = vadd.f32 %v4185_v40, %v1340_v26  ;;  %v1243_v37 = vadd.f32 %v4141_v41, %v1209_v50  ;;  %v3354_v41 = vld [vmem:[%s4763_s2 + $0xb0] sm:$0xff] }
 0x14a   : > { %v1422_v1 = vpop.f32.mrf.mxu3  ;;  %v3380_v40 = vld [vmem:[%s4763_s2 + $0x180] sm:$0xff] }
 0x14b   : > { %2427 = vmatpush.bf16.msra.mxu0 %v3384_v21  ;;  %v1408_v34 = vadd.f32 %v4187_v16, %v1374_v12  ;;  %v1277_v16 = vadd.f32 %v4143_v42, %v1243_v37  ;;  %v3349_v37 = vld [vmem:[%s4763_s2 + $0x88] sm:$0xff] }
 0x14c   : > { %2309 = vmatpush.bf16.msrb.mxu3 %v3354_v41 }
 0x14d   : > { %2342 = vmatpush.bf16.msrb.mxu1 %v3358_v44  ;;  %v3370_v44 = vld [vmem:[%s4763_s2 + $0x130] sm:$0xff] }
 0x14f   : > { %2428 = vmatpush.bf16.msra.mxu0 %v3383_v60  ;;  %v3353_v60 = vld [vmem:[%s4763_s2 + $0xa8] sm:$0xff] }
 0x150   : > { %2310 = vmatpush.bf16.msrb.mxu3 %v3353_v60 }
 0x151   : > { %v1436_v0 = vpop.f32.mrf.mxu0  ;;  %2343 = vmatpush.bf16.msrb.mxu1 %v3357_v43  ;;  %v3352_v43 = vld [vmem:[%s4763_s2 + $0xa0] sm:$0xff] }
 0x152   : > { %v1437_v4 = vadd.f32 %v1436_v0, %v1403_v35  ;;  %v3371_v35 = vld [vmem:[%s4763_s2 + $0x138] sm:$0xff] }
 0x153   : > { %2429 = vmatpush.bf16.msra.mxu0 %v3382_v15  ;;  %2366 = vmatpush.bf16.msrb.mxu2 %v3371_v35  ;;  %v3369_v15 = vld [vmem:[%s4763_s2 + $0x128] sm:$0xff] }
 0x154   : > { %v1460_v19 = vmax.f32 %v1437_v4, 0.0  ;;  %v1311_v4 = vadd.f32 %v4195_v28, %v1277_v16  ;;  %2311 = vmatpush.bf16.msrb.mxu3 %v3352_v43  ;;  %v3365_v35 = vld [vmem:[%s4763_s2 + $0x108] sm:$0xff] }
 0x155   : > { %2344 = vmatpush.bf16.msrb.mxu1 %v3356_v49  ;;  %v3351_v49 = vld [vmem:[%s4763_s2 + $0x98] sm:$0xff] }
 0x156   : > { %1514 = vst [vmem:[#allocation2 + $0x11] sm:$0xff] %v1460_v19  ;;  %v1345_v42 = vadd.f32 %v4199_v57, %v1311_v4 }
 0x157   : > { %2430 = vmatpush.bf16.msra.mxu0 %v3381_v14  ;;  %2367 = vmatpush.bf16.msrb.mxu2 %v3370_v44 }
 0x158   : > { %v1379_v59 = vadd.f32 %v4206_v7, %v1345_v42  ;;  %v3368_v7 = vld [vmem:[%s4763_s2 + $0x120] sm:$0xff]  ;;  %2312 = vmatpush.bf16.msrb.mxu3 %v3351_v49  ;;  %v3403_v49 = vld [vmem:[%s4763_s2 + $0x238] sm:$0xff] }
 0x159   : > { %v1439_v27 = vpop.f32.mrf.mxu0 }
 0x15a   : > { %v1440_v54 = vadd.f32 %v1439_v27, %v4178_v53  ;;  %v1413_v12 = vadd.f32 %v4208_v3, %v1379_v59  ;;  %v3350_v3 = vld [vmem:[%s4763_s2 + $0x90] sm:$0xff] }
 0x15b   : > { %2431 = vmatpush.bf16.msra.mxu0 %v3380_v40  ;;  %2368 = vmatpush.bf16.msrb.mxu2 %v3369_v15  ;;  %v3364_v15 = vld [vmem:[%s4763_s2 + $0x100] sm:$0xff] }
 0x15c   : > { %v1461_v38 = vmax.f32 %v1440_v54, 0.0  ;;  %2313 = vmatpush.bf16.msrb.mxu3 %v3350_v3 }
 0x15d   : > { %v4348_v1 = vld [vmem:[#allocation2 + $0x10] sm:$0xff]  ;;  %v4350_v53 = vld [vmem:[#allocation2 + $0x18] sm:$0x3] }
 0x15e   : > { %1515 = vst [vmem:[#allocation2 + $0x21] sm:$0xff] %v1461_v38  ;;  %v1562_v22 = vrot.slane %v4348_v1, 1  ;;  %v1643_v18 = vpack.c.bf16 %v4348_v1, %v4327_v6  ;;  %v1563_v11 = vrot.slane %v4350_v53, 1 }
 0x15f   : > { %2369 = vmatpush.bf16.msrb.mxu2 %v3368_v7  ;;  %v3394_v7 = vld [vmem:[%s4763_s2 + $0x1f0] sm:$0xff] }
 0x160   : > { %2258 = vmatmul.bf16.vlgmr.msra.gmra.mxu1 %v1643_v18  ;;  %v4366_v63 = vsel %vm354_vm0, %v1562_v22, %v1563_v11  ;;  %v3367_v11 = vld [vmem:[%s4763_s2 + $0x118] sm:$0xff]  ;;  %2314 = vmatpush.bf16.msrb.mxu3 %v3349_v37 }
 0x161   : > { %v1441_v21 = vpop.f32.mrf.mxu0  ;;  %v1644_v36 = vpack.c.bf16 %v4366_v63, %v1561_v17 }
 0x162   : > { %v1442_v10 = vadd.f32 %v1441_v21, %v1408_v34 }
 0x163   : > { %2287 = vmatmul.bf16.vlgmr.msrb.gmra.mxu0 %v1644_v36  ;;  %2370 = vmatpush.bf16.msrb.mxu2 %v3367_v11 }
 0x164   : > { %v1462_v0 = vmax.f32 %v1442_v10, 0.0  ;;  %v3348_v10 = vld [vmem:[%s4763_s2 + $0x80] sm:$0xff] }
 0x165   : > { %v4383_v19 = vld [vmem:[#allocation2 + $0x20] sm:$0xff]  ;;  %v4385_v31 = vld [vmem:[#allocation2 + $0x28] sm:$0x3]  ;;  %2315 = vmatpush.bf16.msrb.mxu3 %v3348_v10 }
 0x166   : > { %1516 = vst [vmem:[#allocation2 + $0x31] sm:$0xff] %v1462_v0  ;;  %v1565_v26 = vrot.slane %v4383_v19, 1  ;;  %v1566_v54 = vrot.slane %v4385_v31, 1 }
 0x167   : > { %2371 = vmatpush.bf16.msrb.mxu2 %v3366_v33  ;;  %v3392_v33 = vld [vmem:[%s4763_s2 + $0x1e0] sm:$0xff] }
 0x168   : > { %v4414_v38 = vsel %vm354_vm0, %v1565_v26, %v1566_v54  ;;  %v3395_v26 = vld [vmem:[%s4763_s2 + $0x1f8] sm:$0xff] }
 0x169   : > { %v1444_v2 = vpop.f32.mrf.mxu0  ;;  %2453 = vmatpush.bf16.msra.mxu1 %v3395_v26  ;;  %v4526_v26 = vld [vmem:[#allocation2 + $0x98] sm:$0x3] }
 0x16a   : > { %v1445_v28 = vadd.f32 %v1444_v2, %v4197_v56  ;;  %v1646_v2 = vpack.c.bf16 %v4383_v19, %v4348_v1 }
 0x16b   : > { %2372 = vmatpush.bf16.msrb.mxu2 %v3365_v35 }
 0x16c   : > { %v1463_v27 = vmax.f32 %v1445_v28, 0.0 }
 0x16d   : > { %v4398_v58 = vld [vmem:[#allocation2 + $0x30] sm:$0xff]  ;;  %v4400_v57 = vld [vmem:[#allocation2 + $0x38] sm:$0x3]  ;;  %2454 = vmatpush.bf16.msra.mxu1 %v3394_v7 }
 0x16e   : > { %1517 = vst [vmem:[#allocation2 + $0x41] sm:$0xff] %v1463_v27  ;;  %v1649_v56 = vpack.c.bf16 %v4398_v58, %v4383_v19  ;;  %v1568_v20 = vrot.slane %v4398_v58, 1  ;;  %v1569_v14 = vrot.slane %v4400_v57, 1  ;;  %v3379_v27 = vld [vmem:[%s4763_s2 + $0x178] sm:$0xff] }
 0x16f   : > { %2373 = vmatpush.bf16.msrb.mxu2 %v3364_v15  ;;  %v3377_v15 = vld [vmem:[%s4763_s2 + $0x168] sm:$0xff] }
 0x170   : > { %2263 = vmatmul.bf16.gmra.mxu1 %v1649_v56  ;;  %v4417_v50 = vsel %vm354_vm0, %v1568_v20, %v1569_v14 }
 0x171   : > { %v1446_v22 = vpop.f32.mrf.mxu0  ;;  %v4421_v18 = vpack.c.bf16 %v4417_v50, %v4414_v38 }
 0x172   : > { %v1447_v17 = vadd.f32 %v1446_v22, %v1413_v12  ;;  %v3378_v12 = vld [vmem:[%s4763_s2 + $0x170] sm:$0xff] }
 0x173   : > { %2292 = vmatmul.bf16.gmra.mxu0 %v4421_v18 }
 0x174   : > { %v1464_v40 = vmax.f32 %v1447_v17, 0.0 }
 0x175   : > { %v4436_v34 = vld [vmem:[#allocation2 + $0x40] sm:$0xff]  ;;  %v4438_v36 = vld [vmem:[#allocation2 + $0x48] sm:$0x3] }
 0x176   : > { %1518 = vst [vmem:[#allocation2 + $0x51] sm:$0xff] %v1464_v40  ;;  %v1571_v0 = vrot.slane %v4436_v34, 1  ;;  %v1572_v4 = vrot.slane %v4438_v36, 1 }
 0x178   : > { %v4463_v43 = vsel %vm354_vm0, %v1571_v0, %v1572_v4 }
 0x179   : > { %v1449_v21 = vpop.f32.mrf.mxu0 }
 0x17a   : > { %v1450_v41 = vadd.f32 %v1449_v21, %v4226_v13 }
 0x17c   : > { %v1465_v16 = vmax.f32 %v1450_v41, 0.0 }
 0x17d   : > { %v4449_v60 = vld [vmem:[#allocation2 + $0x50] sm:$0xff]  ;;  %v4451_v44 = vld [vmem:[#allocation2 + $0x58] sm:$0x3] }
 0x17e   : > { %1519 = vst [vmem:[#allocation2 + $0x61] sm:$0xff] %v1465_v16  ;;  %v1655_v42 = vpack.c.bf16 %v4449_v60, %v4436_v34  ;;  %v1574_v13 = vrot.slane %v4449_v60, 1  ;;  %v1575_v28 = vrot.slane %v4451_v44, 1 }
 0x180   : > { %2268 = vmatmul.bf16.vlgmr.msra.gmra.mxu3 %v1655_v42  ;;  %2345 = vmatmul.bf16.vlgmr.msrb.gmra.mxu1 %v1646_v2  ;;  %v4466_v59 = vsel %vm354_vm0, %v1574_v13, %v1575_v28  ;;  %v4512_v2 = vld [vmem:[#allocation2 + $0x90] sm:$0xff] }
 0x181   : > { %v1451_v54 = vpop.f32.mrf.mxu0  ;;  %v4476_v20 = vpack.c.bf16 %v4466_v59, %v4463_v43  ;;  %2395 = vmatpush.bf16.msra.mxu3 %v3379_v27  ;;  %v3391_v27 = vld [vmem:[%s4763_s2 + $0x1d8] sm:$0xff]  ;;  %v1639_v7 = vrot.slane %v4512_v2, 2 }
 0x182   : > { %v1452_v14 = vadd.f32 %v1451_v54, %v4247_v5  ;;  %v3402_v5 = vld [vmem:[%s4763_s2 + $0x230] sm:$0xff] }
 0x183   : > { %2297 = vmatmul.bf16.vlgmr.msra.gmra.mxu2 %v4476_v20  ;;  %2432 = vmatmul.bf16.vlgmr.msra.gmra.mxu0 %v1649_v56  ;;  %v3393_v56 = vld [vmem:[%s4763_s2 + $0x1e8] sm:$0xff] }
 0x184   : > { %v1466_v22 = vmax.f32 %v1452_v14, 0.0  ;;  %2482 = vmatpush.bf16.msra.mxu2 %v3403_v49  ;;  %2455 = vmatpush.bf16.msra.mxu1 %v3393_v56  ;;  %v3390_v49 = vld [vmem:[%s4763_s2 + $0x1d0] sm:$0xff] }
 0x185   : > { %2396 = vmatpush.bf16.msra.mxu3 %v3378_v12  ;;  %v4495_v11 = vld [vmem:[#allocation2 + $0x60] sm:$0xff]  ;;  %v4497_v3 = vld [vmem:[#allocation2 + $0x68] sm:$0x3] }
 0x186   : > { %1520 = vst [vmem:[#allocation2 + $0x71] sm:$0xff] %v1466_v22  ;;  %v1577_v21 = vrot.slane %v4495_v11, 1  ;;  %v1578_v10 = vrot.slane %v4497_v3, 1  ;;  %v3401_v12 = vld [vmem:[%s4763_s2 + $0x228] sm:$0xff]  ;;  %v3376_v22 = vld [vmem:[%s4763_s2 + $0x160] sm:$0xff] }
 0x188   : > { %2483 = vmatpush.bf16.msra.mxu2 %v3402_v5  ;;  %2456 = vmatpush.bf16.msra.mxu1 %v3392_v33  ;;  %v4515_v13 = vsel %vm354_vm0, %v1577_v21, %v1578_v10  ;;  %v1640_v5 = vrot.slane %v4526_v26, 2  ;;  %v1594_v21 = vrot.slane %v4348_v1, 2  ;;  %v1592_v10 = vrot.slane %v4329_v23, 2  ;;  %v3388_v1 = vld [vmem:[%s4763_s2 + $0x1c0] sm:$0xff] }
 0x189   : > { %v1454_v17 = vpop.f32.mrf.mxu0  ;;  %2397 = vmatpush.bf16.msra.mxu3 %v3377_v15 }
 0x18a   : > { %v1455_v40 = vadd.f32 %v1454_v17, %v4271_v45  ;;  %v1652_v45 = vpack.c.bf16 %v4436_v34, %v4398_v58  ;;  %v4562_v15 = vsel %vm385_vm1, %v1639_v7, %v1640_v5  ;;  %v1647_v5 = vpack.c.bf16 %v4414_v38, %v4366_v63 }
 0x18b   : > { %v1601_v63 = vrot.slane %v4400_v57, 2  ;;  %v1597_v38 = vrot.slane %v4383_v19, 2  ;;  %v1653_v19 = vpack.c.bf16 %v4463_v43, %v4417_v50  ;;  %v3397_v57 = vld [vmem:[%s4763_s2 + $0x208] sm:$0xff]  ;;  %v1607_v50 = vrot.slane %v4451_v44, 2 }
 0x18c   : > { %v1467_v37 = vmax.f32 %v1455_v40, 0.0  ;;  %2457 = vmatpush.bf16.msra.mxu1 %v3391_v27  ;;  %2484 = vmatpush.bf16.msra.mxu2 %v3401_v12  ;;  %v3400_v40 = vld [vmem:[%s4763_s2 + $0x220] sm:$0xff]  ;;  %v1658_v12 = vpack.c.bf16 %v4495_v11, %v4449_v60  ;;  %v1603_v43 = vrot.slane %v4436_v34, 2  ;;  %v1610_v34 = vrot.slane %v4497_v3, 2 }
 0x18d   : > { %v4505_v35 = vld [vmem:[#allocation2 + $0x70] sm:$0xff]  ;;  %v1538_v41 = vld [vmem:[#allocation2 + $0x78] sm:$0x3]  ;;  %2398 = vmatpush.bf16.msra.mxu3 %v3376_v22  ;;  %v1635_v3 = vrot.slane %v4512_v2, 1 }
 0x18e   : > { %1521 = vst [vmem:[#allocation2 + $0x81] sm:$0xff] %v1467_v37  ;;  %v1661_v16 = vpack.c.bf16 %v4505_v35, %v4495_v11  ;;  %v1580_v0 = vrot.slane %v4505_v35, 1  ;;  %v1581_v4 = vrot.slane %v1538_v41, 1  ;;  %v1612_v33 = vrot.slane %v4505_v35, 2  ;;  %v3375_v22 = vld [vmem:[%s4763_s2 + $0x158] sm:$0xff] }
 0x18f   : > { %v1591_v37 = vrot.slane %v4327_v6, 2 }
 0x190   : > { %2273 = vmatmul.bf16.gmra.mxu3 %v1661_v16  ;;  %2350 = vmatmul.bf16.gmra.mxu1 %v1652_v45  ;;  %v4518_v28 = vsel %vm354_vm0, %v1580_v0, %v1581_v4  ;;  %v3389_v45 = vld [vmem:[%s4763_s2 + $0x1c8] sm:$0xff] }
 0x191   : > { %v4530_v54 = vpack.c.bf16 %v4518_v28, %v4515_v13  ;;  %v1456_v14 = vpop.f32.mrf.mxu0  ;;  %2458 = vmatpush.bf16.msra.mxu1 %v3390_v49  ;;  %2485 = vmatpush.bf16.msra.mxu2 %v3400_v40  ;;  %v3374_v40 = vld [vmem:[%s4763_s2 + $0x150] sm:$0xff] }
 0x192   : > { %v1593_v14 = vsel %vm385_vm1, %v1591_v37, %v1592_v10  ;;  %2399 = vmatpush.bf16.msra.mxu3 %v3375_v22  ;;  %v1600_v37 = vrot.slane %v4398_v58, 2  ;;  %v3373_v58 = vld [vmem:[%s4763_s2 + $0x148] sm:$0xff] }
 0x193   : > { %2302 = vmatmul.bf16.gmra.mxu2 %v4530_v54  ;;  %2437 = vmatmul.bf16.gmra.mxu0 %v1655_v42  ;;  %v1613_v42 = vrot.slane %v1538_v41, 2  ;;  %v1595_v41 = vrot.slane %v4350_v53, 2 }
 0x195   : > { %v4544_v56 = vld [vmem:[#allocation2 + $0x80] sm:$0xff]  ;;  %v4546_v17 = vld [vmem:[#allocation2 + $0x88] sm:$0x3]  ;;  %v4565_v6 = vsel %vm385_vm1, %v1612_v33, %v1613_v42  ;;  %2459 = vmatpush.bf16.msra.mxu1 %v3389_v45  ;;  %v1596_v7 = vsel %vm385_vm1, %v1594_v21, %v1595_v41  ;;  %v3399_v42 = vld [vmem:[%s4763_s2 + $0x218] sm:$0xff]  ;;  %v1602_v21 = vsel %vm385_vm1, %v1600_v37, %v1601_v63 }
 0x196   : > { %v1629_v0 = vrot.slane %v4544_v56, 2  ;;  %v1630_v4 = vrot.slane %v4546_v17, 2  ;;  %v1645_v49 = vpack.c.bf16 %v1596_v7, %v1593_v14  ;;  %2486 = vmatpush.bf16.msra.mxu2 %v3399_v42  ;;  %v3398_v33 = vld [vmem:[%s4763_s2 + $0x210] sm:$0xff]  ;;  %2400 = vmatpush.bf16.msra.mxu3 %v3374_v40  ;;  %v1664_v41 = vpack.c.bf16 %v4544_v56, %v4505_v35  ;;  %v3372_v35 = vld [vmem:[%s4763_s2 + $0x140] sm:$0xff] }
 0x197   : > { %v1625_v44 = vrot.slane %v4544_v56, 1  ;;  %v1626_v22 = vrot.slane %v4546_v17, 1 }
 0x198   : > { %v4568_v23 = vsel %vm385_vm1, %v1629_v0, %v1630_v4  ;;  %v1606_v0 = vrot.slane %v4449_v60, 2  ;;  %v1604_v4 = vrot.slane %v4438_v36, 2  ;;  %v1659_v60 = vpack.c.bf16 %v4515_v13, %v4466_v59 }
 0x199   : > { %v1666_v53 = vpack.c.bf16 %v4568_v23, %v4565_v6  ;;  %v1669_v27 = vpack.c.bf16 %v4562_v15, %v4568_v23  ;;  %2460 = vmatpush.bf16.msra.mxu1 %v3388_v1  ;;  %v1609_v36 = vrot.slane %v4495_v11, 2  ;;  %v1627_v42 = vsel %vm354_vm0, %v1625_v44, %v1626_v22 }
 0x19a   : > { %2487 = vmatpush.bf16.msra.mxu2 %v3398_v33  ;;  %2401 = vmatpush.bf16.msra.mxu3 %v3373_v58  ;;  %v1608_v1 = vsel %vm385_vm1, %v1606_v0, %v1607_v50  ;;  %v1605_v14 = vsel %vm385_vm1, %v1603_v43, %v1604_v4  ;;  %v1636_v13 = vrot.slane %v4526_v26, 1 }
 0x19b   : > { %v1654_v33 = vpack.c.bf16 %v1605_v14, %v1602_v21 }
 0x19c   : > { %v1637_v17 = vsel %vm354_vm0, %v1635_v3, %v1636_v13 }
 0x19d   : > { %v1668_v37 = vpack.c.bf16 %v1637_v17, %v1627_v42 }
 0x19e   : > { %2488 = vmatpush.bf16.msra.mxu2 %v3397_v57  ;;  %2402 = vmatpush.bf16.msra.mxu3 %v3372_v35 }
 0x1a0   : > { %2316 = vmatmul.bf16.vlgmr.msrb.gmra.mxu3 %v1645_v49  ;;  %2355 = vmatmul.bf16.gmra.mxu1 %v1658_v12  ;;  %v1657_v49 = vpack.c.bf16 %v1608_v1, %v1605_v14  ;;  %v3396_v12 = vld [vmem:[%s4763_s2 + $0x200] sm:$0xff] }
 0x1a2   : > { %2489 = vmatpush.bf16.msra.mxu2 %v3396_v12 }
 0x1a3   : > { %2374 = vmatmul.bf16.vlgmr.msrb.gmra.mxu2 %v1647_v5  ;;  %2442 = vmatmul.bf16.gmra.mxu0 %v1661_v16  ;;  %v1598_v16 = vrot.slane %v4385_v31, 2  ;;  %v1667_v31 = vpack.c.bf16 %v4512_v2, %v4544_v56  ;;  %v1611_v5 = vsel %vm385_vm1, %v1609_v36, %v1610_v34  ;;  %v4648_v2 = vld [vmem:[%s4765_s4] ss:$0 sm:$0xff] }
 0x1a4   : > { %v1663_v40 = vpack.c.bf16 %v4565_v6, %v1611_v5 }
 0x1a5   : > { %v1599_v10 = vsel %vm385_vm1, %v1597_v38, %v1598_v16 }
 0x1a6   : > { %v1651_v45 = vpack.c.bf16 %v1602_v21, %v1599_v10  ;;  %v1648_v59 = vpack.c.bf16 %v1599_v10, %v1596_v7 }
 0x1b0   : > { %2321 = vmatmul.bf16.gmra.mxu3 %v1651_v45  ;;  %2360 = vmatmul.bf16.gmra.mxu1 %v1664_v41 }
 0x1b3   : > { %2379 = vmatmul.bf16.gmra.mxu2 %v1653_v19  ;;  %2447 = vmatmul.bf16.gmra.mxu0 %v1667_v31 }
 0x1c0   : > { %2326 = vmatmul.bf16.gmra.mxu3 %v1657_v49  ;;  %2461 = vmatmul.bf16.vlgmr.msra.gmra.mxu1 %v4421_v18  ;;  %v1665_v18 = vpack.c.bf16 %v1627_v42, %v4518_v28  ;;  %v1660_v28 = vpack.c.bf16 %v1611_v5, %v1608_v1 }
 0x1c3   : > { %2384 = vmatmul.bf16.gmra.mxu2 %v1659_v60 }
 0x1d0   : > { %2331 = vmatmul.bf16.gmra.mxu3 %v1663_v40  ;;  %2466 = vmatmul.bf16.gmra.mxu1 %v4476_v20 }
 0x1d3   : > { %2389 = vmatmul.bf16.gmra.mxu2 %v1665_v18 }
 0x1dd   : > { %v2259_v11 = vpop.f32.mrf.mxu1 }
 0x1de   : > { %v2260_v1 = vadd.f32 %v4648_v2, %v2259_v11 }
 0x1e0   : > { %2403 = vmatmul.bf16.vlgmr.msra.gmra.mxu3 %v1648_v59  ;;  %2471 = vmatmul.bf16.gmra.mxu1 %v4530_v54  ;;  %v2288_v0 = vpop.f32.mrf.mxu0 }
 0x1e3   : > { %2490 = vmatmul.bf16.vlgmr.msra.gmra.mxu2 %v1651_v45 }
 0x1e5   : > { %v4640_v56 = vpop.f32.mrf.mxu1 }
 0x1e8   : > { %v2290_v60 = vpop.f32.mrf.mxu0 }
 0x1ed   : > { %v2264_v20 = vpop.f32.mrf.mxu1 }
 0x1ee   : > { %v2265_v44 = vadd.f32 %v4648_v2, %v2264_v20 }
 0x1f0   : > { %2408 = vmatmul.bf16.gmra.mxu3 %v1654_v33  ;;  %2476 = vmatmul.bf16.gmra.mxu1 %v1668_v37  ;;  %v2293_v5 = vpop.f32.mrf.mxu0 }
 0x1f3   : > { %2495 = vmatmul.bf16.gmra.mxu2 %v1657_v49 }
 0x1f5   : > { %v4643_v7 = vpop.f32.mrf.mxu1 }
 0x1fd   : > { %v2346_v16 = vpop.f32.mrf.mxu1 }
 0x200   : > { %2413 = vmatmul.bf16.gmra.mxu3 %v1660_v28 }
 0x203   : > { %v2269_v26 = vpop.f32.mrf.mxu3  ;;  %2500 = vmatmul.bf16.gmra.mxu2 %v1663_v40  ;;  %v2294_v40 = vadd.f32 %v2293_v5, %v2265_v44 }
 0x204   : > { %v2270_v54 = vadd.f32 %v4648_v2, %v2269_v26 }
 0x205   : > { %v2348_v58 = vpop.f32.mrf.mxu1 }
 0x206   : > { %v2298_v63 = vpop.f32.mrf.mxu2 }
 0x207   : > { %v2299_v38 = vadd.f32 %v2298_v63, %v2270_v54 }
 0x20b   : > { %v2271_v21 = vpop.f32.mrf.mxu3 }
 0x20c   : > { %v2272_v10 = vadd.f32 %v4648_v2, %v2271_v21 }
 0x20d   : > { %v2351_v4 = vpop.f32.mrf.mxu1 }
 0x20e   : > { %v2300_v45 = vpop.f32.mrf.mxu2 }
 0x20f   : > { %v4652_v41 = vadd.f32 %v2300_v45, %v2272_v10  ;;  %v2295_v10 = vpop.f32.mrf.mxu0 }
 0x210   : > { %2418 = vmatmul.bf16.gmra.mxu3 %v1666_v53  ;;  %v2289_v53 = vadd.f32 %v2288_v0, %v2260_v1 }
 0x213   : > { %v2274_v19 = vpop.f32.mrf.mxu3  ;;  %2505 = vmatmul.bf16.gmra.mxu2 %v1669_v27 }
 0x214   : > { %v2275_v31 = vadd.f32 %v4648_v2, %v2274_v19 }
 0x215   : > { %v4665_v27 = vpop.f32.mrf.mxu1 }
 0x216   : > { %v2303_v57 = vpop.f32.mrf.mxu2 }
 0x217   : > { %v2304_v35 = vadd.f32 %v2303_v57, %v2275_v31 }
 0x21b   : > { %v2276_v50 = vpop.f32.mrf.mxu3 }
 0x21c   : > { %v2277_v43 = vadd.f32 %v4648_v2, %v2276_v50 }
 0x21d   : > { %v2356_v42 = vpop.f32.mrf.mxu1 }
 0x21e   : > { %v2305_v14 = vpop.f32.mrf.mxu2 }
 0x21f   : > { %v4663_v6 = vadd.f32 %v2305_v14, %v2277_v43  ;;  %v2433_v43 = vpop.f32.mrf.mxu0  ;;  %v2262_v14 = vadd.f32 %v4648_v2, %v4640_v56 }
 0x223   : > { %v2317_v49 = vpop.f32.mrf.mxu3 }
 0x224   : > { %v2318_v12 = vadd.f32 %v2317_v49, %v2289_v53  ;;  %v2291_v49 = vadd.f32 %v2290_v60, %v2262_v14  ;;  %v4784_v60 = vunpack.c.l.bf16 %v3605_v24 }
 0x225   : > { %v4668_v17 = vpop.f32.mrf.mxu1 }
 0x226   : > { %v2347_v15 = vadd.f32 %v2346_v16, %v2318_v12  ;;  %v2375_v23 = vpop.f32.mrf.mxu2 }
 0x227   : > { %v2435_v12 = vpop.f32.mrf.mxu0 }
 0x228   : > { %v2376_v34 = vadd.f32 %v2375_v23, %v2347_v15 }
 0x22b   : > { %v2319_v36 = vpop.f32.mrf.mxu3 }
 0x22c   : > { %v2320_v15 = vadd.f32 %v2319_v36, %v2291_v49  ;;  %v4785_v36 = vunpack.c.l.bf16 %v3608_v25 }
 0x22d   : > { %v2361_v54 = vpop.f32.mrf.mxu1 }
 0x22e   : > { %v2377_v22 = vpop.f32.mrf.mxu2 }
 0x233   : > { %v2322_v18 = vpop.f32.mrf.mxu3 }
 0x234   : > { %v2323_v59 = vadd.f32 %v2322_v18, %v2294_v40 }
 0x235   : > { %v4678_v19 = vpop.f32.mrf.mxu1 }
 0x236   : > { %v2352_v11 = vadd.f32 %v2351_v4, %v2323_v59  ;;  %v2380_v3 = vpop.f32.mrf.mxu2  ;;  %v2438_v59 = vpop.f32.mrf.mxu0 }
 0x238   : > { %v2381_v13 = vadd.f32 %v2380_v3, %v2352_v11  ;;  %v2267_v3 = vadd.f32 %v4648_v2, %v4643_v7 }
 0x23b   : > { %v2324_v33 = vpop.f32.mrf.mxu3 }
 0x23e   : > { %v4670_v37 = vpop.f32.mrf.mxu2 }
 0x243   : > { %v2327_v28 = vpop.f32.mrf.mxu3 }
 0x244   : > { %v2328_v26 = vadd.f32 %v2327_v28, %v2299_v38  ;;  %v2462_v38 = vpop.f32.mrf.mxu1 }
 0x246   : > { %v2357_v63 = vadd.f32 %v2356_v42, %v2328_v26  ;;  %v2385_v16 = vpop.f32.mrf.mxu2 }
 0x248   : > { %v4672_v20 = vadd.f32 %v2385_v16, %v2357_v63  ;;  %v2528_v63 = vrot.slane %v4785_v36, 2 }
 0x24b   : > { %v4674_v21 = vpop.f32.mrf.mxu3 }
 0x24c   : > { %v2464_v23 = vpop.f32.mrf.mxu1 }
 0x24e   : > { %v4676_v45 = vpop.f32.mrf.mxu2 }
 0x253   : > { %v2332_v31 = vpop.f32.mrf.mxu3 }
 0x254   : > { %v2333_v57 = vadd.f32 %v2332_v31, %v2304_v35  ;;  %v2349_v35 = vadd.f32 %v2348_v58, %v2320_v15  ;;  %v2467_v26 = vpop.f32.mrf.mxu1  ;;  %v4786_v58 = vunpack.c.l.bf16 %v3637_v48  ;;  %v2440_v15 = vpop.f32.mrf.mxu0 }
 0x256   : > { %v2362_v0 = vadd.f32 %v2361_v54, %v2333_v57  ;;  %v2390_v50 = vpop.f32.mrf.mxu2  ;;  %v2378_v18 = vadd.f32 %v2377_v22, %v2349_v35  ;;  %v2527_v54 = vrot.slane %v4784_v60, 2  ;;  %v4787_v22 = vunpack.c.l.bf16 %v3654_v55 }
 0x258   : > { %v4680_v4 = vadd.f32 %v2390_v50, %v2362_v0  ;;  %v2531_v16 = vrot.slane %v4787_v22, 2  ;;  %v2296_v0 = vadd.f32 %v2295_v10, %v2267_v3  ;;  %v2529_v50 = vsel %vm385_vm1, %v2527_v54, %v2528_v63 }
 0x259   : > { %v4790_v3 = vunpack.c.l.bf16 %v3741_v51 }
 0x25a   : > { %v2325_v24 = vadd.f32 %v2324_v33, %v2296_v0 }
 0x25b   : > { %v4682_v1 = vpop.f32.mrf.mxu3 }
 0x25c   : > { %v2354_v55 = vadd.f32 %v4665_v27, %v2325_v24  ;;  %v4791_v27 = vunpack.c.l.bf16 %v3744_v52 }
 0x25e   : > { %v4686_v53 = vpop.f32.mrf.mxu2 }
 0x263   : > { %v2404_v44 = vpop.f32.mrf.mxu3 }
 0x264   : > { %v2405_v5 = vadd.f32 %v2404_v44, %v2376_v34  ;;  %v2530_v34 = vrot.slane %v4786_v58, 2  ;;  %v2383_v44 = vadd.f32 %v4670_v37, %v2354_v55 }
 0x266   : > { %v2491_v42 = vpop.f32.mrf.mxu2  ;;  %v2434_v40 = vadd.f32 %v2433_v43, %v2405_v5  ;;  %v2532_v43 = vsel %vm385_vm1, %v2530_v34, %v2531_v16 }
 0x268   : > { %v2463_v28 = vadd.f32 %v2462_v38, %v2434_v40 }
 0x26a   : > { %v2492_v7 = vadd.f32 %v2491_v42, %v2463_v28  ;;  %v2536_v28 = vrot.slane %v4790_v3, 2 }
 0x26b   : > { %v2406_v11 = vpop.f32.mrf.mxu3 }
 0x26c   : > { %v2407_v56 = vadd.f32 %v2406_v11, %v2378_v18  ;;  %v2559_v14 = vadd.f32 %v2529_v50, %v2492_v7  ;;  %v4789_v18 = vunpack.c.l.bf16 %v3711_v30  ;;  %v2330_v30 = vadd.f32 %v4674_v21, %v4652_v41 }
 0x26d   : > { %v4792_v41 = vunpack.c.l.bf16 %v3772_v8  ;;  %v2335_v8 = vadd.f32 %v4682_v1, %v4663_v6  ;;  %v4796_v1 = vunpack.c.l.bf16 %v3869_v32 }
 0x26e   : > { %v2436_v31 = vadd.f32 %v2435_v12, %v2407_v56  ;;  %v2493_v57 = vpop.f32.mrf.mxu2  ;;  %v2534_v11 = vrot.slane %v4789_v18, 2  ;;  %v2537_v56 = vrot.slane %v4791_v27, 2  ;;  %v2359_v16 = vadd.f32 %v4668_v17, %v2330_v30 }
 0x26f   : > { %v2539_v21 = vrot.slane %v4792_v41, 2 }
 0x270   : > { %v2465_v2 = vadd.f32 %v2464_v23, %v2436_v31  ;;  %v2469_v23 = vpop.f32.mrf.mxu1 }
 0x272   : > { %v2494_v38 = vadd.f32 %v2493_v57, %v2465_v2  ;;  %v2388_v2 = vadd.f32 %v4676_v45, %v2359_v16 }
 0x273   : > { %v2409_v25 = vpop.f32.mrf.mxu3 }
 0x274   : > { %v2560_v49 = vadd.f32 %v2532_v43, %v2494_v38  ;;  %v2410_v48 = vadd.f32 %v2409_v25, %v2381_v13  ;;  %v4788_v13 = vunpack.c.l.bf16 %v3708_v29  ;;  %v2538_v29 = vsel %vm385_vm1, %v2536_v28, %v2537_v56 }
 0x275   : > { %v4793_v25 = vunpack.c.l.bf16 %v3775_v9  ;;  %v2545_v56 = vrot.slane %v4796_v1, 2 }
 0x276   : > { %v3407_v10 = vpack.c.bf16 %v2560_v49, %v2559_v14  ;;  %v2496_v12 = vpop.f32.mrf.mxu2  ;;  %v2439_v33 = vadd.f32 %v2438_v59, %v2410_v48  ;;  %v2533_v40 = vrot.slane %v4788_v13, 2  ;;  %v2443_v59 = vpop.f32.mrf.mxu0  ;;  %v4795_v49 = vunpack.c.l.bf16 %v3830_v47 }
 0x277   : > { %v2540_v14 = vrot.slane %v4793_v25, 2 }
 0x278   : > { %3408 = vst [vmem:[%s4704_s7] sm:$0xff] %v3407_v10   ;;  %v2468_v35 = vadd.f32 %v2467_v26, %v2439_v33  ;;  %v2472_v26 = vpop.f32.mrf.mxu1  ;;  %v2535_v63 = vsel %vm385_vm1, %v2533_v40, %v2534_v11  ;;  %v2543_v48 = vrot.slane %v4795_v49, 2 }
 0x27a   : > { %v2497_v37 = vadd.f32 %v2496_v12, %v2468_v35  ;;  %v2541_v12 = vsel %vm385_vm1, %v2539_v21, %v2540_v14 }
 0x27b   : > { %v2411_v5 = vpop.f32.mrf.mxu3 }
 0x27c   : > { %v2412_v42 = vadd.f32 %v2411_v5, %v2383_v44  ;;  %v2561_v34 = vadd.f32 %v2535_v63, %v2497_v37 }
 0x27e   : > { %v2441_v60 = vadd.f32 %v2440_v15, %v2412_v42  ;;  %v2498_v54 = vpop.f32.mrf.mxu2  ;;  %v2445_v7 = vpop.f32.mrf.mxu0  ;;  %v2364_v42 = vadd.f32 %v4678_v19, %v2335_v8 }
 0x280   : > { %v2470_v36 = vadd.f32 %v2469_v23, %v2441_v60  ;;  %v2474_v50 = vpop.f32.mrf.mxu1  ;;  %v2393_v11 = vadd.f32 %v4686_v53, %v2364_v42  ;;  %v4797_v60 = vunpack.c.l.bf16 %v3879_v39 }
 0x282   : > { %v2499_v58 = vadd.f32 %v2498_v54, %v2470_v36  ;;  %v4798_v54 = vunpack.c.l.bf16 %v3941_v61 }
 0x283   : > { %v2414_v51 = vpop.f32.mrf.mxu3 }
 0x284   : > { %v2562_v22 = vadd.f32 %v2538_v29, %v2499_v58  ;;  %v2415_v52 = vadd.f32 %v2414_v51, %v4672_v20  ;;  %v4794_v20 = vunpack.c.l.bf16 %v3827_v46  ;;  %v2548_v19 = vrot.slane %v4798_v54, 2 }
 0x286   : > { %v3412_v31 = vpack.c.bf16 %v2562_v22, %v2561_v34  ;;  %v2501_v57 = vpop.f32.mrf.mxu2  ;;  %v2444_v0 = vadd.f32 %v2443_v59, %v2415_v52  ;;  %v2542_v17 = vrot.slane %v4794_v20, 2  ;;  %v2448_v33 = vpop.f32.mrf.mxu0  ;;  %v4799_v59 = vunpack.c.l.bf16 %v3944_v62 }
 0x288   : > { %3424 = vst [vmem:[%s4704_s7 + $0x8] sm:$0xff] %v3412_v31   ;;  %v2473_v24 = vadd.f32 %v2472_v26, %v2444_v0  ;;  %v2544_v23 = vsel %vm385_vm1, %v2542_v17, %v2543_v48  ;;  %v2477_v35 = vpop.f32.mrf.mxu1  ;;  %v2549_v37 = vrot.slane %v4799_v59, 2 }
 0x28a   : > { %v2502_v45 = vadd.f32 %v2501_v57, %v2473_v24  ;;  %v2550_v32 = vsel %vm385_vm1, %v2548_v19, %v2549_v37 }
 0x28b   : > { %v2416_v43 = vpop.f32.mrf.mxu3 }
 0x28c   : > { %v2417_v38 = vadd.f32 %v2416_v43, %v2388_v2  ;;  %v2563_v46 = vadd.f32 %v2541_v12, %v2502_v45 }
 0x28e   : > { %v2446_v15 = vadd.f32 %v2445_v7, %v2417_v38  ;;  %v2503_v55 = vpop.f32.mrf.mxu2  ;;  %v2450_v6 = vpop.f32.mrf.mxu0 }
 0x290   : > { %v2475_v10 = vadd.f32 %v2474_v50, %v2446_v15  ;;  %v2479_v26 = vpop.f32.mrf.mxu1 }
 0x292   : > { %v2504_v9 = vadd.f32 %v2503_v55, %v2475_v10 }
 0x293   : > { %v2419_v44 = vpop.f32.mrf.mxu3 }
 0x294   : > { %v2564_v5 = vadd.f32 %v2544_v23, %v2504_v9  ;;  %v2420_v47 = vadd.f32 %v2419_v44, %v4680_v4  ;;  %v2546_v4 = vrot.slane %v4797_v60, 2 }
 0x296   : > { %v3417_v13 = vpack.c.bf16 %v2564_v5, %v2563_v46  ;;  %v2506_v40 = vpop.f32.mrf.mxu2  ;;  %v2449_v18 = vadd.f32 %v2448_v33, %v2420_v47  ;;  %v2547_v29 = vsel %vm385_vm1, %v2545_v56, %v2546_v4 }
 0x298   : > { %3425 = vst [vmem:[%s4704_s7 + $0x10] sm:$0xff] %v3417_v13   ;;  %v2478_v28 = vadd.f32 %v2477_v35, %v2449_v18 }
 0x29a   : > { %v2507_v53 = vadd.f32 %v2506_v40, %v2478_v28 }
 0x29b   : > { %v2421_v3 = vpop.f32.mrf.mxu3 }
 0x29c   : > { %v2422_v27 = vadd.f32 %v2421_v3, %v2393_v11  ;;  %v2565_v51 = vadd.f32 %v2547_v29, %v2507_v53 }
 0x29e   : > { %v2451_v36 = vadd.f32 %v2450_v6, %v2422_v27  ;;  %v2508_v30 = vpop.f32.mrf.mxu2 }
 0x2a0   : > { %v2480_v63 = vadd.f32 %v2479_v26, %v2451_v36 }
 0x2a2   : > { %v2509_v58 = vadd.f32 %v2508_v30, %v2480_v63 }
 0x2a4   : > { %v2566_v34 = vadd.f32 %v2550_v32, %v2509_v58 }
 0x2a6   : > { %v3422_v39 = vpack.c.bf16 %v2566_v34, %v2565_v51 }
 0x2a8   : > { %3426 = vst [vmem:[%s4704_s7 + $0x18] sm:$0xff] %v3422_v39  }
 0x2a9 PF: > { %s15_s20 = sadd.s32 1, %s3493_s20   ;;  %s4800_s18 = smov %s3489_s19 }
 0x2aa   : > { %p12_p5 = scmp.ge.s32.totalorder %s15_s20, 4   ;;  %s4801_s19 = smov %s4803_s21 }
 0x2ac   :  { %14 = sbr.rel (!%p12_p5) target bundleno = 2 (0x2), region = 70 }

</bundles_post_ra>
